<compile_context>
chip_gen: v7x
topology: tpu7x:2x2x1
jax: 0.10.0
libtpu: 0.0.40
codegen_flags: <defaults>
</compile_context>

<pallas_src>
import functools

import jax
import jax.numpy as jnp
from jax.experimental import pallas as pl
from jax.experimental.pallas import tpu as pltpu

BN_EPS = 1e-5
LRELU_SLOPE = 0.2
LANE = 128
VMEM_LIMIT = 32 * 1024 * 1024          # safe on v5e/v6e/v7x
A_TILE_BUDGET = 4 * 1024 * 1024        # bytes for one bf16 A tile (double-buffered)


def _round_up(x, m):
    return (x + m - 1) // m * m


def _choose_tm(m, k):
    """Pick the M tile: big (<=1024 rows) but bounded by the VMEM tile budget."""
    tm = A_TILE_BUDGET // max(k * 2, 1)      # bf16 A rows that fit the budget
    tm = max(8, min(1024, tm))
    tm = (tm // 8) * 8                       # sublane multiple
    tm = min(tm, _round_up(m, 8))
    return tm


def _mosaic_params():
    return pltpu.CompilerParams(
        dimension_semantics=("parallel",),   # M-tiles are independent
        vmem_limit_bytes=VMEM_LIMIT)


def _lrelu(y):
    # Equivalent to LeakyReLU(0.2) for slope in (0, 1); cheaper than where().
    return jnp.maximum(y, LRELU_SLOPE * y)


# ----------------------------------------------------------------------------
# Pallas kernels
# ----------------------------------------------------------------------------
def _matmul_act_kernel(a_ref, w_ref, o_ref, *, act):
    """One (TM, K) x (K, Coutp) tile: MXU matmul + fused activation."""
    y = jnp.dot(a_ref[...], w_ref[...], preferred_element_type=jnp.float32)
    if act == "lrelu":
        y = _lrelu(y)
    elif act == "sigmoid":
        y = jax.nn.sigmoid(y)
    o_ref[...] = y.astype(o_ref.dtype)


def _matmul_stats_kernel(a_ref, w_ref, y_ref, stats_ref):
    """Tile matmul + per-tile column sum / sum-of-squares partials (f32)."""
    y = jnp.dot(a_ref[...], w_ref[...], preferred_element_type=jnp.float32)
    y_ref[...] = y.astype(y_ref.dtype)
    # stats tile is (1, 8, Coutp); row 0 = sum, row 1 = sum of squares.
    # Rows 2..7 are never read by the glue reduction, so they stay unwritten.
    # Column (lane) dim is fully dense; only the sublane dim is partial.
    stats_ref[0, 0:1, :] = jnp.sum(y, axis=0, keepdims=True)
    stats_ref[0, 1:2, :] = jnp.sum(y * y, axis=0, keepdims=True)


def _bn_lrelu_kernel(y_ref, scale_ref, shift_ref, o_ref):
    """Apply precomputed global BN scale/shift + LeakyReLU on a (TM, Coutp) tile."""
    y = y_ref[...].astype(jnp.float32) * scale_ref[...] + shift_ref[...]
    o_ref[...] = _lrelu(y).astype(o_ref.dtype)


# ----------------------------------------------------------------------------
# pallas_call wrappers
# ----------------------------------------------------------------------------
def _matmul_act(a, w, *, tm, act, out_dtype):
    m_pad, k = a.shape
    coutp = w.shape[1]
    g = m_pad // tm
    cost = pl.CostEstimate(
        flops=2 * m_pad * k * coutp,
        transcendentals=(m_pad * coutp) if act == "sigmoid" else 0,
        bytes_accessed=(a.size * a.dtype.itemsize + w.size * w.dtype.itemsize
                        + m_pad * coutp * jnp.dtype(out_dtype).itemsize))
    return pl.pallas_call(
        functools.partial(_matmul_act_kernel, act=act),
        out_shape=jax.ShapeDtypeStruct((m_pad, coutp), out_dtype),
        grid_spec=pltpu.PrefetchScalarGridSpec(
            num_scalar_prefetch=0,
            grid=(g,),
            in_specs=[pl.BlockSpec((tm, k), lambda i: (i, 0)),
                      pl.BlockSpec((k, coutp), lambda i: (0, 0))],
            out_specs=pl.BlockSpec((tm, coutp), lambda i: (i, 0))),
        compiler_params=_mosaic_params(),
        cost_estimate=cost,
    )(a, w)


def _matmul_stats(a, w, *, tm, y_dtype):
    m_pad, k = a.shape
    coutp = w.shape[1]
    g = m_pad // tm
    cost = pl.CostEstimate(
        flops=2 * m_pad * k * coutp + 3 * m_pad * coutp,
        transcendentals=0,
        bytes_accessed=(a.size * a.dtype.itemsize + w.size * w.dtype.itemsize
                        + m_pad * coutp * jnp.dtype(y_dtype).itemsize
                        + g * 8 * coutp * 4))
    return pl.pallas_call(
        _matmul_stats_kernel,
        out_shape=(jax.ShapeDtypeStruct((m_pad, coutp), y_dtype),
                   jax.ShapeDtypeStruct((g, 8, coutp), jnp.float32)),
        grid_spec=pltpu.PrefetchScalarGridSpec(
            num_scalar_prefetch=0,
            grid=(g,),
            in_specs=[pl.BlockSpec((tm, k), lambda i: (i, 0)),
                      pl.BlockSpec((k, coutp), lambda i: (0, 0))],
            out_specs=[pl.BlockSpec((tm, coutp), lambda i: (i, 0)),
                       pl.BlockSpec((1, 8, coutp), lambda i: (i, 0, 0))]),
        compiler_params=_mosaic_params(),
        cost_estimate=cost,
    )(a, w)


def _bn_lrelu(y, scale, shift, *, tm, out_dtype):
    m_pad, coutp = y.shape
    g = m_pad // tm
    cost = pl.CostEstimate(
        flops=4 * m_pad * coutp,
        transcendentals=0,
        bytes_accessed=(m_pad * coutp * y.dtype.itemsize + 2 * coutp * 4
                        + m_pad * coutp * jnp.dtype(out_dtype).itemsize))
    return pl.pallas_call(
        _bn_lrelu_kernel,
        out_shape=jax.ShapeDtypeStruct((m_pad, coutp), out_dtype),
        grid_spec=pltpu.PrefetchScalarGridSpec(
            num_scalar_prefetch=0,
            grid=(g,),
            in_specs=[pl.BlockSpec((tm, coutp), lambda i: (i, 0)),
                      pl.BlockSpec((1, coutp), lambda i: (0, 0)),
                      pl.BlockSpec((1, coutp), lambda i: (0, 0))],
            out_specs=pl.BlockSpec((tm, coutp), lambda i: (i, 0))),
        compiler_params=_mosaic_params(),
        cost_estimate=cost,
    )(y, scale, shift)


# ----------------------------------------------------------------------------
# Glue: im2col patch extraction (pure data movement / reshapes)
# ----------------------------------------------------------------------------
def _im2col(x_nhwc, k, stride, pad):
    n, h, w, c = x_nhwc.shape
    xp = jnp.pad(x_nhwc, ((0, 0), (pad, pad), (pad, pad), (0, 0)))
    hp, wp = h + 2 * pad, w + 2 * pad
    ho = (hp - k) // stride + 1
    wo = (wp - k) // stride + 1
    patches = []
    for kh in range(k):
        for kw in range(k):
            patches.append(
                xp[:, kh:kh + stride * ho:stride, kw:kw + stride * wo:stride, :]
            )
    a = jnp.stack(patches, axis=-2)            # (N, Ho, Wo, k*k, C)
    a = a.reshape(n * ho * wo, k * k * c)      # cols ordered (kh, kw, c)
    return a, ho, wo


def _conv_layer(x_nhwc, w_oihw, *, stride, pad, use_bn, act, out_dtype):
    """One conv block: im2col (glue) + tiled Pallas matmul (+BN) + activation."""
    cout, cin, kh, kw = w_oihw.shape
    n = x_nhwc.shape[0]

    # bf16 matmul inputs (MXU native); f32 accumulation happens in-kernel.
    a, ho, wo = _im2col(x_nhwc.astype(jnp.bfloat16), kh, stride, pad)
    m, k = a.shape

    # Lane-dense output: zero-pad Cout to a multiple of 128.
    coutp = _round_up(cout, LANE)
    w_mat = jnp.transpose(w_oihw, (2, 3, 1, 0)).reshape(k, cout)
    w_mat = jnp.pad(w_mat, ((0, 0), (0, coutp - cout))).astype(jnp.bfloat16)

    # M tiling: padded zero rows contribute nothing to sums, so padding is safe.
    tm = _choose_tm(m, k)
    m_pad = _round_up(m, tm)
    if m_pad != m:
        a = jnp.pad(a, ((0, m_pad - m), (0, 0)))

    if use_bn:
        # Pass 1: tiled matmul + per-tile partial statistics (f32), y in bf16.
        y, stats = _matmul_stats(a, w_mat, tm=tm, y_dtype=jnp.bfloat16)
        # Tiny glue reduction -> GLOBAL batch statistics (training-mode BN,
        # biased variance, gamma=1, beta=0), all in f32.  Divide by the true
        # row count m (padding rows are exactly zero in both sums).
        s_tot = jnp.sum(stats[:, 0, :], axis=0)
        q_tot = jnp.sum(stats[:, 1, :], axis=0)
        mean = s_tot / m
        var = jnp.maximum(q_tot / m - mean * mean, 0.0)
        scale = jax.lax.rsqrt(var + BN_EPS)
        shift = -mean * scale
        # Pass 2: fused normalize + LeakyReLU, tiled over M.
        out = _bn_lrelu(y, scale.reshape(1, coutp), shift.reshape(1, coutp),
                        tm=tm, out_dtype=out_dtype)
    else:
        out = _matmul_act(a, w_mat, tm=tm, act=act, out_dtype=out_dtype)

    out = out[:m, :cout].reshape(n, ho, wo, cout)
    return out


# ----------------------------------------------------------------------------
# DC_Discriminator forward  (gan_type='normal' -> sigmoid at the end)
# ----------------------------------------------------------------------------
def dc_discriminator_forward(x_nchw, weights):
    x = jnp.transpose(x_nchw, (0, 2, 3, 1))    # NCHW -> NHWC
    bf16 = jnp.bfloat16
    x = _conv_layer(x, weights[0], stride=2, pad=1, use_bn=False, act="lrelu",
                    out_dtype=bf16)
    x = _conv_layer(x, weights[1], stride=2, pad=1, use_bn=True, act="lrelu",
                    out_dtype=bf16)
    x = _conv_layer(x, weights[2], stride=2, pad=1, use_bn=True, act="lrelu",
                    out_dtype=bf16)
    x = _conv_layer(x, weights[3], stride=2, pad=1, use_bn=True, act="lrelu",
                    out_dtype=bf16)
    x = _conv_layer(x, weights[4], stride=1, pad=0, use_bn=False, act="sigmoid",
                    out_dtype=jnp.float32)
    return x.reshape(-1)                       # .view(-1)


# ----------------------------------------------------------------------------
# Pure-JAX f32 reference (for correctness check)
# ----------------------------------------------------------------------------
def _ref_forward(x_nchw, weights):
    x = jnp.transpose(x_nchw, (0, 2, 3, 1)).astype(jnp.float32)

    def conv(x, w_oihw, stride, pad):
        w_hwio = jnp.transpose(w_oihw, (2, 3, 1, 0))
        return jax.lax.conv_general_dilated(
            x, w_hwio, window_strides=(stride, stride),
            padding=[(pad, pad), (pad, pad)],
            dimension_numbers=("NHWC", "HWIO", "NHWC"))

    def bn(x):
        mean = jnp.mean(x, axis=(0, 1, 2), keepdims=True)
        var = jnp.mean((x - mean) ** 2, axis=(0, 1, 2), keepdims=True)
        return (x - mean) * jax.lax.rsqrt(var + BN_EPS)

    def lrelu(x):
        return jnp.where(x > 0, x, LRELU_SLOPE * x)

    x = lrelu(conv(x, weights[0], 2, 1))
    x = lrelu(bn(conv(x, weights[1], 2, 1)))
    x = lrelu(bn(conv(x, weights[2], 2, 1)))
    x = lrelu(bn(conv(x, weights[3], 2, 1)))
    x = jax.nn.sigmoid(conv(x, weights[4], 1, 0))
    return x.reshape(-1)


# ----------------------------------------------------------------------------
def init_weights(key, ndf):
    # DCGAN-style deterministic init: N(0, 0.02) on each conv weight.
    shapes = [
        (ndf,     3,       4, 4),
        (ndf * 2, ndf,     4, 4),
        (ndf * 4, ndf * 2, 4, 4),
        (ndf * 8, ndf * 4, 4, 4),
        (1,       ndf * 8, 4, 4),
    ]
    keys = jax.random.split(key, len(shapes))
    return [0.02 * jax.random.normal(k, s, dtype=jnp.float32)
            for k, s in zip(keys, shapes)]


if __name__ == "__main__":
    key = jax.random.PRNGKey(0)
    k_x, k_w = jax.random.split(key)

    ndf = 8          # small ndf (module default is 64; shapes kept small)
    batch = 2
    # 64x64 spatial is the minimum the architecture supports (final 4x4 valid conv)
    x = jax.random.normal(k_x, (batch, 3, 64, 64), dtype=jnp.float32)
    weights = init_weights(k_w, ndf)

    out = jax.block_until_ready(jax.jit(dc_discriminator_forward)(x, weights))
    assert out.shape == (batch,), out.shape

    ref = jax.block_until_ready(jax.jit(_ref_forward)(x, weights))
    # bf16 MXU inputs / bf16 inter-pass activations (f32 accumulation, BN stats
    # and activations) -> looser tolerance than the pure-f32 path.
    assert jnp.allclose(out, ref, rtol=2e-2, atol=2e-2), (out, ref)

    print("KERNEL_OK")
</pallas_src>

<mosaic_0001>
module attributes {stable_mosaic.version = 11 : i64} {
  func.func @_matmul_act_kernel(%arg0: i32, %arg1: memref<1024x48xbf16, #tpu.memory_space<vmem>>, %arg2: memref<48x128xbf16, #tpu.memory_space<vmem>>, %arg3: memref<1024x128xbf16, #tpu.memory_space<vmem>>) attributes {dimension_semantics = [#tpu.dimension_semantics<parallel>], iteration_bounds = array<i64: 2>, scalar_prefetch = 0 : i64, scratch_operands = 0 : i64, tpu.core_type = #tpu.core_type<tc>, window_params = [{transform_indices = @transform_0, window_bounds = array<i64: 1024, 48>}, {pipeline_mode = #tpu.pipeline_mode<synchronous>, transform_indices = @transform_1, window_bounds = array<i64: 48, 128>}, {transform_indices = @transform_2, window_bounds = array<i64: 1024, 128>}]} {
    %c0 = arith.constant 0 : index
    %c0_0 = arith.constant 0 : index
    %0 = vector.load %arg1[%c0, %c0_0] : memref<1024x48xbf16, #tpu.memory_space<vmem>>, vector<1024x48xbf16>
    %c0_1 = arith.constant 0 : index
    %c0_2 = arith.constant 0 : index
    %1 = vector.load %arg2[%c0_1, %c0_2] : memref<48x128xbf16, #tpu.memory_space<vmem>>, vector<48x128xbf16>
    %cst = arith.constant dense<0.000000e+00> : vector<1024x128xf32>
    %2 = tpu.matmul %0, %1, %cst {dimension_numbers = #tpu.dot_dimension_numbers<[1], [0], [0], [1], [0, 0, 1, 1], [], []>} : vector<1024x48xbf16>, vector<48x128xbf16>, vector<1024x128xf32> -> vector<1024x128xf32>
    %cst_3 = arith.constant 2.000000e-01 : f32
    %3 = vector.broadcast %cst_3 : f32 to vector<1024x128xf32>
    %4 = arith.mulf %3, %2 : vector<1024x128xf32>
    %5 = arith.maximumf %2, %4 : vector<1024x128xf32>
    %6 = arith.truncf %5 : vector<1024x128xf32> to vector<1024x128xbf16>
    %c0_4 = arith.constant 0 : index
    %c0_5 = arith.constant 0 : index
    %7 = vector.load %arg3[%c0_4, %c0_5] : memref<1024x128xbf16, #tpu.memory_space<vmem>>, vector<1024x128xbf16>
    tpu.vector_store %arg3[%c0_4, %c0_5], %6 {strides = array<i32>} : memref<1024x128xbf16, #tpu.memory_space<vmem>>, vector<1024x128xbf16>,
    return
  }
  func.func @transform_0(%arg0: i32) -> (i32, i32) {
    %c0_i32 = arith.constant 0 : i32
    %c0_i32_0 = arith.constant 0 : i32
    return %arg0, %c0_i32 : i32, i32
  }
  func.func @transform_1(%arg0: i32) -> (i32, i32) {
    %c0_i32 = arith.constant 0 : i32
    %c0_i32_0 = arith.constant 0 : i32
    %c0_i32_1 = arith.constant 0 : i32
    return %c0_i32, %c0_i32_0 : i32, i32
  }
  func.func @transform_2(%arg0: i32) -> (i32, i32) {
    %c0_i32 = arith.constant 0 : i32
    %c0_i32_0 = arith.constant 0 : i32
    return %arg0, %c0_i32 : i32, i32
  }
}

module attributes {stable_mosaic.version = 11 : i64} {
  func.func @_matmul_stats_kernel(%arg0: i32, %arg1: memref<512x128xbf16, #tpu.memory_space<vmem>>, %arg2: memref<128x128xbf16, #tpu.memory_space<vmem>>, %arg3: memref<512x128xbf16, #tpu.memory_space<vmem>>, %arg4: memref<1x8x128xf32, #tpu.memory_space<vmem>>) attributes {dimension_semantics = [#tpu.dimension_semantics<parallel>], iteration_bounds = array<i64: 1>, scalar_prefetch = 0 : i64, scratch_operands = 0 : i64, tpu.core_type = #tpu.core_type<tc>, window_params = [{transform_indices = @transform_0, window_bounds = array<i64: 512, 128>}, {pipeline_mode = #tpu.pipeline_mode<synchronous>, transform_indices = @transform_1, window_bounds = array<i64: 128, 128>}, {transform_indices = @transform_2, window_bounds = array<i64: 512, 128>}, {transform_indices = @transform_3, window_bounds = array<i64: 1, 8, 128>}]} {
    %c0 = arith.constant 0 : index
    %c0_0 = arith.constant 0 : index
    %0 = vector.load %arg1[%c0, %c0_0] : memref<512x128xbf16, #tpu.memory_space<vmem>>, vector<512x128xbf16>
    %c0_1 = arith.constant 0 : index
    %c0_2 = arith.constant 0 : index
    %1 = vector.load %arg2[%c0_1, %c0_2] : memref<128x128xbf16, #tpu.memory_space<vmem>>, vector<128x128xbf16>
    %cst = arith.constant dense<0.000000e+00> : vector<512x128xf32>
    %2 = tpu.matmul %0, %1, %cst {dimension_numbers = #tpu.dot_dimension_numbers<[1], [0], [0], [1], [0, 0, 1, 1], [], []>} : vector<512x128xbf16>, vector<128x128xbf16>, vector<512x128xf32> -> vector<512x128xf32>
    %3 = arith.truncf %2 : vector<512x128xf32> to vector<512x128xbf16>
    %c0_3 = arith.constant 0 : index
    %c0_4 = arith.constant 0 : index
    %4 = vector.load %arg3[%c0_3, %c0_4] : memref<512x128xbf16, #tpu.memory_space<vmem>>, vector<512x128xbf16>
    tpu.vector_store %arg3[%c0_3, %c0_4], %3 {strides = array<i32>} : memref<512x128xbf16, #tpu.memory_space<vmem>>, vector<512x128xbf16>,
    %cst_5 = arith.constant dense<0.000000e+00> : vector<128xf32>
    %5 = vector.multi_reduction <add>, %2, %cst_5 [0] : vector<512x128xf32> to vector<128xf32>
    %6 = vector.shape_cast %5 : vector<128xf32> to vector<1x128xf32>
    %c0_6 = arith.constant 0 : index
    %c0_7 = arith.constant 0 : index
    %c0_8 = arith.constant 0 : index
    %7 = vector.load %arg4[%c0_6, %c0_7, %c0_8] : memref<1x8x128xf32, #tpu.memory_space<vmem>>, vector<1x1x128xf32>
    %8 = vector.shape_cast %7 : vector<1x1x128xf32> to vector<1x128xf32>
    %9 = vector.shape_cast %6 : vector<1x128xf32> to vector<1x1x128xf32>
    tpu.vector_store %arg4[%c0_6, %c0_7, %c0_8], %9 {strides = array<i32>} : memref<1x8x128xf32, #tpu.memory_space<vmem>>, vector<1x1x128xf32>,
    %10 = arith.mulf %2, %2 : vector<512x128xf32>
    %cst_9 = arith.constant dense<0.000000e+00> : vector<128xf32>
    %11 = vector.multi_reduction <add>, %10, %cst_9 [0] : vector<512x128xf32> to vector<128xf32>
    %12 = vector.shape_cast %11 : vector<128xf32> to vector<1x128xf32>
    %c0_10 = arith.constant 0 : index
    %c1 = arith.constant 1 : index
    %c0_11 = arith.constant 0 : index
    %13 = vector.load %arg4[%c0_10, %c1, %c0_11] : memref<1x8x128xf32, #tpu.memory_space<vmem>>, vector<1x1x128xf32>
    %14 = vector.shape_cast %13 : vector<1x1x128xf32> to vector<1x128xf32>
    %15 = vector.shape_cast %12 : vector<1x128xf32> to vector<1x1x128xf32>
    tpu.vector_store %arg4[%c0_10, %c1, %c0_11], %15 {strides = array<i32>} : memref<1x8x128xf32, #tpu.memory_space<vmem>>, vector<1x1x128xf32>,
    return
  }
  func.func @transform_0(%arg0: i32) -> (i32, i32) {
    %c0_i32 = arith.constant 0 : i32
    %c0_i32_0 = arith.constant 0 : i32
    return %arg0, %c0_i32 : i32, i32
  }
  func.func @transform_1(%arg0: i32) -> (i32, i32) {
    %c0_i32 = arith.constant 0 : i32
    %c0_i32_0 = arith.constant 0 : i32
    %c0_i32_1 = arith.constant 0 : i32
    return %c0_i32, %c0_i32_0 : i32, i32
  }
  func.func @transform_2(%arg0: i32) -> (i32, i32) {
    %c0_i32 = arith.constant 0 : i32
    %c0_i32_0 = arith.constant 0 : i32
    return %arg0, %c0_i32 : i32, i32
  }
  func.func @transform_3(%arg0: i32) -> (i32, i32, i32) {
    %c0_i32 = arith.constant 0 : i32
    %c0_i32_0 = arith.constant 0 : i32
    %c0_i32_1 = arith.constant 0 : i32
    return %arg0, %c0_i32, %c0_i32_0 : i32, i32, i32
  }
}

module attributes {stable_mosaic.version = 11 : i64} {
  func.func @_bn_lrelu_kernel(%arg0: i32, %arg1: memref<512x128xbf16, #tpu.memory_space<vmem>>, %arg2: memref<1x128xf32, #tpu.memory_space<vmem>>, %arg3: memref<1x128xf32, #tpu.memory_space<vmem>>, %arg4: memref<512x128xbf16, #tpu.memory_space<vmem>>) attributes {dimension_semantics = [#tpu.dimension_semantics<parallel>], iteration_bounds = array<i64: 1>, scalar_prefetch = 0 : i64, scratch_operands = 0 : i64, tpu.core_type = #tpu.core_type<tc>, window_params = [{transform_indices = @transform_0, window_bounds = array<i64: 512, 128>}, {pipeline_mode = #tpu.pipeline_mode<synchronous>, transform_indices = @transform_1, window_bounds = array<i64: 1, 128>}, {pipeline_mode = #tpu.pipeline_mode<synchronous>, transform_indices = @transform_2, window_bounds = array<i64: 1, 128>}, {transform_indices = @transform_3, window_bounds = array<i64: 512, 128>}]} {
    %c0 = arith.constant 0 : index
    %c0_0 = arith.constant 0 : index
    %0 = vector.load %arg1[%c0, %c0_0] : memref<512x128xbf16, #tpu.memory_space<vmem>>, vector<512x128xbf16>
    %1 = arith.extf %0 : vector<512x128xbf16> to vector<512x128xf32>
    %c0_1 = arith.constant 0 : index
    %c0_2 = arith.constant 0 : index
    %2 = vector.load %arg2[%c0_1, %c0_2] : memref<1x128xf32, #tpu.memory_space<vmem>>, vector<1x128xf32>
    %3 = vector.broadcast %2 : vector<1x128xf32> to vector<512x128xf32>
    %4 = arith.mulf %1, %3 : vector<512x128xf32>
    %c0_3 = arith.constant 0 : index
    %c0_4 = arith.constant 0 : index
    %5 = vector.load %arg3[%c0_3, %c0_4] : memref<1x128xf32, #tpu.memory_space<vmem>>, vector<1x128xf32>
    %6 = vector.broadcast %5 : vector<1x128xf32> to vector<512x128xf32>
    %7 = arith.addf %4, %6 : vector<512x128xf32>
    %cst = arith.constant 2.000000e-01 : f32
    %8 = vector.broadcast %cst : f32 to vector<512x128xf32>
    %9 = arith.mulf %8, %7 : vector<512x128xf32>
    %10 = arith.maximumf %7, %9 : vector<512x128xf32>
    %11 = arith.truncf %10 : vector<512x128xf32> to vector<512x128xbf16>
    %c0_5 = arith.constant 0 : index
    %c0_6 = arith.constant 0 : index
    %12 = vector.load %arg4[%c0_5, %c0_6] : memref<512x128xbf16, #tpu.memory_space<vmem>>, vector<512x128xbf16>
    tpu.vector_store %arg4[%c0_5, %c0_6], %11 {strides = array<i32>} : memref<512x128xbf16, #tpu.memory_space<vmem>>, vector<512x128xbf16>,
    return
  }
  func.func @transform_0(%arg0: i32) -> (i32, i32) {
    %c0_i32 = arith.constant 0 : i32
    %c0_i32_0 = arith.constant 0 : i32
    return %arg0, %c0_i32 : i32, i32
  }
  func.func @transform_1(%arg0: i32) -> (i32, i32) {
    %c0_i32 = arith.constant 0 : i32
    %c0_i32_0 = arith.constant 0 : i32
    %c0_i32_1 = arith.constant 0 : i32
    return %c0_i32, %c0_i32_0 : i32, i32
  }
  func.func @transform_2(%arg0: i32) -> (i32, i32) {
    %c0_i32 = arith.constant 0 : i32
    %c0_i32_0 = arith.constant 0 : i32
    %c0_i32_1 = arith.constant 0 : i32
    return %c0_i32, %c0_i32_0 : i32, i32
  }
  func.func @transform_3(%arg0: i32) -> (i32, i32) {
    %c0_i32 = arith.constant 0 : i32
    %c0_i32_0 = arith.constant 0 : i32
    return %arg0, %c0_i32 : i32, i32
  }
}

module attributes {stable_mosaic.version = 11 : i64} {
  func.func @_matmul_stats_kernel(%arg0: i32, %arg1: memref<128x256xbf16, #tpu.memory_space<vmem>>, %arg2: memref<256x128xbf16, #tpu.memory_space<vmem>>, %arg3: memref<128x128xbf16, #tpu.memory_space<vmem>>, %arg4: memref<1x8x128xf32, #tpu.memory_space<vmem>>) attributes {dimension_semantics = [#tpu.dimension_semantics<parallel>], iteration_bounds = array<i64: 1>, scalar_prefetch = 0 : i64, scratch_operands = 0 : i64, tpu.core_type = #tpu.core_type<tc>, window_params = [{transform_indices = @transform_0, window_bounds = array<i64: 128, 256>}, {pipeline_mode = #tpu.pipeline_mode<synchronous>, transform_indices = @transform_1, window_bounds = array<i64: 256, 128>}, {transform_indices = @transform_2, window_bounds = array<i64: 128, 128>}, {transform_indices = @transform_3, window_bounds = array<i64: 1, 8, 128>}]} {
    %c0 = arith.constant 0 : index
    %c0_0 = arith.constant 0 : index
    %0 = vector.load %arg1[%c0, %c0_0] : memref<128x256xbf16, #tpu.memory_space<vmem>>, vector<128x256xbf16>
    %c0_1 = arith.constant 0 : index
    %c0_2 = arith.constant 0 : index
    %1 = vector.load %arg2[%c0_1, %c0_2] : memref<256x128xbf16, #tpu.memory_space<vmem>>, vector<256x128xbf16>
    %cst = arith.constant dense<0.000000e+00> : vector<128x128xf32>
    %2 = tpu.matmul %0, %1, %cst {dimension_numbers = #tpu.dot_dimension_numbers<[1], [0], [0], [1], [0, 0, 1, 1], [], []>} : vector<128x256xbf16>, vector<256x128xbf16>, vector<128x128xf32> -> vector<128x128xf32>
    %3 = arith.truncf %2 : vector<128x128xf32> to vector<128x128xbf16>
    %c0_3 = arith.constant 0 : index
    %c0_4 = arith.constant 0 : index
    %4 = vector.load %arg3[%c0_3, %c0_4] : memref<128x128xbf16, #tpu.memory_space<vmem>>, vector<128x128xbf16>
    tpu.vector_store %arg3[%c0_3, %c0_4], %3 {strides = array<i32>} : memref<128x128xbf16, #tpu.memory_space<vmem>>, vector<128x128xbf16>,
    %cst_5 = arith.constant dense<0.000000e+00> : vector<128xf32>
    %5 = vector.multi_reduction <add>, %2, %cst_5 [0] : vector<128x128xf32> to vector<128xf32>
    %6 = vector.shape_cast %5 : vector<128xf32> to vector<1x128xf32>
    %c0_6 = arith.constant 0 : index
    %c0_7 = arith.constant 0 : index
    %c0_8 = arith.constant 0 : index
    %7 = vector.load %arg4[%c0_6, %c0_7, %c0_8] : memref<1x8x128xf32, #tpu.memory_space<vmem>>, vector<1x1x128xf32>
    %8 = vector.shape_cast %7 : vector<1x1x128xf32> to vector<1x128xf32>
    %9 = vector.shape_cast %6 : vector<1x128xf32> to vector<1x1x128xf32>
    tpu.vector_store %arg4[%c0_6, %c0_7, %c0_8], %9 {strides = array<i32>} : memref<1x8x128xf32, #tpu.memory_space<vmem>>, vector<1x1x128xf32>,
    %10 = arith.mulf %2, %2 : vector<128x128xf32>
    %cst_9 = arith.constant dense<0.000000e+00> : vector<128xf32>
    %11 = vector.multi_reduction <add>, %10, %cst_9 [0] : vector<128x128xf32> to vector<128xf32>
    %12 = vector.shape_cast %11 : vector<128xf32> to vector<1x128xf32>
    %c0_10 = arith.constant 0 : index
    %c1 = arith.constant 1 : index
    %c0_11 = arith.constant 0 : index
    %13 = vector.load %arg4[%c0_10, %c1, %c0_11] : memref<1x8x128xf32, #tpu.memory_space<vmem>>, vector<1x1x128xf32>
    %14 = vector.shape_cast %13 : vector<1x1x128xf32> to vector<1x128xf32>
    %15 = vector.shape_cast %12 : vector<1x128xf32> to vector<1x1x128xf32>
    tpu.vector_store %arg4[%c0_10, %c1, %c0_11], %15 {strides = array<i32>} : memref<1x8x128xf32, #tpu.memory_space<vmem>>, vector<1x1x128xf32>,
    return
  }
  func.func @transform_0(%arg0: i32) -> (i32, i32) {
    %c0_i32 = arith.constant 0 : i32
    %c0_i32_0 = arith.constant 0 : i32
    return %arg0, %c0_i32 : i32, i32
  }
  func.func @transform_1(%arg0: i32) -> (i32, i32) {
    %c0_i32 = arith.constant 0 : i32
    %c0_i32_0 = arith.constant 0 : i32
    %c0_i32_1 = arith.constant 0 : i32
    return %c0_i32, %c0_i32_0 : i32, i32
  }
  func.func @transform_2(%arg0: i32) -> (i32, i32) {
    %c0_i32 = arith.constant 0 : i32
    %c0_i32_0 = arith.constant 0 : i32
    return %arg0, %c0_i32 : i32, i32
  }
  func.func @transform_3(%arg0: i32) -> (i32, i32, i32) {
    %c0_i32 = arith.constant 0 : i32
    %c0_i32_0 = arith.constant 0 : i32
    %c0_i32_1 = arith.constant 0 : i32
    return %arg0, %c0_i32, %c0_i32_0 : i32, i32, i32
  }
}

module attributes {stable_mosaic.version = 11 : i64} {
  func.func @_bn_lrelu_kernel(%arg0: i32, %arg1: memref<128x128xbf16, #tpu.memory_space<vmem>>, %arg2: memref<1x128xf32, #tpu.memory_space<vmem>>, %arg3: memref<1x128xf32, #tpu.memory_space<vmem>>, %arg4: memref<128x128xbf16, #tpu.memory_space<vmem>>) attributes {dimension_semantics = [#tpu.dimension_semantics<parallel>], iteration_bounds = array<i64: 1>, scalar_prefetch = 0 : i64, scratch_operands = 0 : i64, tpu.core_type = #tpu.core_type<tc>, window_params = [{transform_indices = @transform_0, window_bounds = array<i64: 128, 128>}, {pipeline_mode = #tpu.pipeline_mode<synchronous>, transform_indices = @transform_1, window_bounds = array<i64: 1, 128>}, {pipeline_mode = #tpu.pipeline_mode<synchronous>, transform_indices = @transform_2, window_bounds = array<i64: 1, 128>}, {transform_indices = @transform_3, window_bounds = array<i64: 128, 128>}]} {
    %c0 = arith.constant 0 : index
    %c0_0 = arith.constant 0 : index
    %0 = vector.load %arg1[%c0, %c0_0] : memref<128x128xbf16, #tpu.memory_space<vmem>>, vector<128x128xbf16>
    %1 = arith.extf %0 : vector<128x128xbf16> to vector<128x128xf32>
    %c0_1 = arith.constant 0 : index
    %c0_2 = arith.constant 0 : index
    %2 = vector.load %arg2[%c0_1, %c0_2] : memref<1x128xf32, #tpu.memory_space<vmem>>, vector<1x128xf32>
    %3 = vector.broadcast %2 : vector<1x128xf32> to vector<128x128xf32>
    %4 = arith.mulf %1, %3 : vector<128x128xf32>
    %c0_3 = arith.constant 0 : index
    %c0_4 = arith.constant 0 : index
    %5 = vector.load %arg3[%c0_3, %c0_4] : memref<1x128xf32, #tpu.memory_space<vmem>>, vector<1x128xf32>
    %6 = vector.broadcast %5 : vector<1x128xf32> to vector<128x128xf32>
    %7 = arith.addf %4, %6 : vector<128x128xf32>
    %cst = arith.constant 2.000000e-01 : f32
    %8 = vector.broadcast %cst : f32 to vector<128x128xf32>
    %9 = arith.mulf %8, %7 : vector<128x128xf32>
    %10 = arith.maximumf %7, %9 : vector<128x128xf32>
    %11 = arith.truncf %10 : vector<128x128xf32> to vector<128x128xbf16>
    %c0_5 = arith.constant 0 : index
    %c0_6 = arith.constant 0 : index
    %12 = vector.load %arg4[%c0_5, %c0_6] : memref<128x128xbf16, #tpu.memory_space<vmem>>, vector<128x128xbf16>
    tpu.vector_store %arg4[%c0_5, %c0_6], %11 {strides = array<i32>} : memref<128x128xbf16, #tpu.memory_space<vmem>>, vector<128x128xbf16>,
    return
  }
  func.func @transform_0(%arg0: i32) -> (i32, i32) {
    %c0_i32 = arith.constant 0 : i32
    %c0_i32_0 = arith.constant 0 : i32
    return %arg0, %c0_i32 : i32, i32
  }
  func.func @transform_1(%arg0: i32) -> (i32, i32) {
    %c0_i32 = arith.constant 0 : i32
    %c0_i32_0 = arith.constant 0 : i32
    %c0_i32_1 = arith.constant 0 : i32
    return %c0_i32, %c0_i32_0 : i32, i32
  }
  func.func @transform_2(%arg0: i32) -> (i32, i32) {
    %c0_i32 = arith.constant 0 : i32
    %c0_i32_0 = arith.constant 0 : i32
    %c0_i32_1 = arith.constant 0 : i32
    return %c0_i32, %c0_i32_0 : i32, i32
  }
  func.func @transform_3(%arg0: i32) -> (i32, i32) {
    %c0_i32 = arith.constant 0 : i32
    %c0_i32_0 = arith.constant 0 : i32
    return %arg0, %c0_i32 : i32, i32
  }
}

module attributes {stable_mosaic.version = 11 : i64} {
  func.func @_matmul_stats_kernel(%arg0: i32, %arg1: memref<32x512xbf16, #tpu.memory_space<vmem>>, %arg2: memref<512x128xbf16, #tpu.memory_space<vmem>>, %arg3: memref<32x128xbf16, #tpu.memory_space<vmem>>, %arg4: memref<1x8x128xf32, #tpu.memory_space<vmem>>) attributes {dimension_semantics = [#tpu.dimension_semantics<parallel>], iteration_bounds = array<i64: 1>, scalar_prefetch = 0 : i64, scratch_operands = 0 : i64, tpu.core_type = #tpu.core_type<tc>, window_params = [{transform_indices = @transform_0, window_bounds = array<i64: 32, 512>}, {pipeline_mode = #tpu.pipeline_mode<synchronous>, transform_indices = @transform_1, window_bounds = array<i64: 512, 128>}, {transform_indices = @transform_2, window_bounds = array<i64: 32, 128>}, {transform_indices = @transform_3, window_bounds = array<i64: 1, 8, 128>}]} {
    %c0 = arith.constant 0 : index
    %c0_0 = arith.constant 0 : index
    %0 = vector.load %arg1[%c0, %c0_0] : memref<32x512xbf16, #tpu.memory_space<vmem>>, vector<32x512xbf16>
    %c0_1 = arith.constant 0 : index
    %c0_2 = arith.constant 0 : index
    %1 = vector.load %arg2[%c0_1, %c0_2] : memref<512x128xbf16, #tpu.memory_space<vmem>>, vector<512x128xbf16>
    %cst = arith.constant dense<0.000000e+00> : vector<32x128xf32>
    %2 = tpu.matmul %0, %1, %cst {dimension_numbers = #tpu.dot_dimension_numbers<[1], [0], [0], [1], [0, 0, 1, 1], [], []>} : vector<32x512xbf16>, vector<512x128xbf16>, vector<32x128xf32> -> vector<32x128xf32>
    %3 = arith.truncf %2 : vector<32x128xf32> to vector<32x128xbf16>
    %c0_3 = arith.constant 0 : index
    %c0_4 = arith.constant 0 : index
    %4 = vector.load %arg3[%c0_3, %c0_4] : memref<32x128xbf16, #tpu.memory_space<vmem>>, vector<32x128xbf16>
    tpu.vector_store %arg3[%c0_3, %c0_4], %3 {strides = array<i32>} : memref<32x128xbf16, #tpu.memory_space<vmem>>, vector<32x128xbf16>,
    %cst_5 = arith.constant dense<0.000000e+00> : vector<128xf32>
    %5 = vector.multi_reduction <add>, %2, %cst_5 [0] : vector<32x128xf32> to vector<128xf32>
    %6 = vector.shape_cast %5 : vector<128xf32> to vector<1x128xf32>
    %c0_6 = arith.constant 0 : index
    %c0_7 = arith.constant 0 : index
    %c0_8 = arith.constant 0 : index
    %7 = vector.load %arg4[%c0_6, %c0_7, %c0_8] : memref<1x8x128xf32, #tpu.memory_space<vmem>>, vector<1x1x128xf32>
    %8 = vector.shape_cast %7 : vector<1x1x128xf32> to vector<1x128xf32>
    %9 = vector.shape_cast %6 : vector<1x128xf32> to vector<1x1x128xf32>
    tpu.vector_store %arg4[%c0_6, %c0_7, %c0_8], %9 {strides = array<i32>} : memref<1x8x128xf32, #tpu.memory_space<vmem>>, vector<1x1x128xf32>,
    %10 = arith.mulf %2, %2 : vector<32x128xf32>
    %cst_9 = arith.constant dense<0.000000e+00> : vector<128xf32>
    %11 = vector.multi_reduction <add>, %10, %cst_9 [0] : vector<32x128xf32> to vector<128xf32>
    %12 = vector.shape_cast %11 : vector<128xf32> to vector<1x128xf32>
    %c0_10 = arith.constant 0 : index
    %c1 = arith.constant 1 : index
    %c0_11 = arith.constant 0 : index
    %13 = vector.load %arg4[%c0_10, %c1, %c0_11] : memref<1x8x128xf32, #tpu.memory_space<vmem>>, vector<1x1x128xf32>
    %14 = vector.shape_cast %13 : vector<1x1x128xf32> to vector<1x128xf32>
    %15 = vector.shape_cast %12 : vector<1x128xf32> to vector<1x1x128xf32>
    tpu.vector_store %arg4[%c0_10, %c1, %c0_11], %15 {strides = array<i32>} : memref<1x8x128xf32, #tpu.memory_space<vmem>>, vector<1x1x128xf32>,
    return
  }
  func.func @transform_0(%arg0: i32) -> (i32, i32) {
    %c0_i32 = arith.constant 0 : i32
    %c0_i32_0 = arith.constant 0 : i32
    return %arg0, %c0_i32 : i32, i32
  }
  func.func @transform_1(%arg0: i32) -> (i32, i32) {
    %c0_i32 = arith.constant 0 : i32
    %c0_i32_0 = arith.constant 0 : i32
    %c0_i32_1 = arith.constant 0 : i32
    return %c0_i32, %c0_i32_0 : i32, i32
  }
  func.func @transform_2(%arg0: i32) -> (i32, i32) {
    %c0_i32 = arith.constant 0 : i32
    %c0_i32_0 = arith.constant 0 : i32
    return %arg0, %c0_i32 : i32, i32
  }
  func.func @transform_3(%arg0: i32) -> (i32, i32, i32) {
    %c0_i32 = arith.constant 0 : i32
    %c0_i32_0 = arith.constant 0 : i32
    %c0_i32_1 = arith.constant 0 : i32
    return %arg0, %c0_i32, %c0_i32_0 : i32, i32, i32
  }
}

module attributes {stable_mosaic.version = 11 : i64} {
  func.func @_bn_lrelu_kernel(%arg0: i32, %arg1: memref<32x128xbf16, #tpu.memory_space<vmem>>, %arg2: memref<1x128xf32, #tpu.memory_space<vmem>>, %arg3: memref<1x128xf32, #tpu.memory_space<vmem>>, %arg4: memref<32x128xbf16, #tpu.memory_space<vmem>>) attributes {dimension_semantics = [#tpu.dimension_semantics<parallel>], iteration_bounds = array<i64: 1>, scalar_prefetch = 0 : i64, scratch_operands = 0 : i64, tpu.core_type = #tpu.core_type<tc>, window_params = [{transform_indices = @transform_0, window_bounds = array<i64: 32, 128>}, {pipeline_mode = #tpu.pipeline_mode<synchronous>, transform_indices = @transform_1, window_bounds = array<i64: 1, 128>}, {pipeline_mode = #tpu.pipeline_mode<synchronous>, transform_indices = @transform_2, window_bounds = array<i64: 1, 128>}, {transform_indices = @transform_3, window_bounds = array<i64: 32, 128>}]} {
    %c0 = arith.constant 0 : index
    %c0_0 = arith.constant 0 : index
    %0 = vector.load %arg1[%c0, %c0_0] : memref<32x128xbf16, #tpu.memory_space<vmem>>, vector<32x128xbf16>
    %1 = arith.extf %0 : vector<32x128xbf16> to vector<32x128xf32>
    %c0_1 = arith.constant 0 : index
    %c0_2 = arith.constant 0 : index
    %2 = vector.load %arg2[%c0_1, %c0_2] : memref<1x128xf32, #tpu.memory_space<vmem>>, vector<1x128xf32>
    %3 = vector.broadcast %2 : vector<1x128xf32> to vector<32x128xf32>
    %4 = arith.mulf %1, %3 : vector<32x128xf32>
    %c0_3 = arith.constant 0 : index
    %c0_4 = arith.constant 0 : index
    %5 = vector.load %arg3[%c0_3, %c0_4] : memref<1x128xf32, #tpu.memory_space<vmem>>, vector<1x128xf32>
    %6 = vector.broadcast %5 : vector<1x128xf32> to vector<32x128xf32>
    %7 = arith.addf %4, %6 : vector<32x128xf32>
    %cst = arith.constant 2.000000e-01 : f32
    %8 = vector.broadcast %cst : f32 to vector<32x128xf32>
    %9 = arith.mulf %8, %7 : vector<32x128xf32>
    %10 = arith.maximumf %7, %9 : vector<32x128xf32>
    %11 = arith.truncf %10 : vector<32x128xf32> to vector<32x128xbf16>
    %c0_5 = arith.constant 0 : index
    %c0_6 = arith.constant 0 : index
    %12 = vector.load %arg4[%c0_5, %c0_6] : memref<32x128xbf16, #tpu.memory_space<vmem>>, vector<32x128xbf16>
    tpu.vector_store %arg4[%c0_5, %c0_6], %11 {strides = array<i32>} : memref<32x128xbf16, #tpu.memory_space<vmem>>, vector<32x128xbf16>,
    return
  }
  func.func @transform_0(%arg0: i32) -> (i32, i32) {
    %c0_i32 = arith.constant 0 : i32
    %c0_i32_0 = arith.constant 0 : i32
    return %arg0, %c0_i32 : i32, i32
  }
  func.func @transform_1(%arg0: i32) -> (i32, i32) {
    %c0_i32 = arith.constant 0 : i32
    %c0_i32_0 = arith.constant 0 : i32
    %c0_i32_1 = arith.constant 0 : i32
    return %c0_i32, %c0_i32_0 : i32, i32
  }
  func.func @transform_2(%arg0: i32) -> (i32, i32) {
    %c0_i32 = arith.constant 0 : i32
    %c0_i32_0 = arith.constant 0 : i32
    %c0_i32_1 = arith.constant 0 : i32
    return %c0_i32, %c0_i32_0 : i32, i32
  }
  func.func @transform_3(%arg0: i32) -> (i32, i32) {
    %c0_i32 = arith.constant 0 : i32
    %c0_i32_0 = arith.constant 0 : i32
    return %arg0, %c0_i32 : i32, i32
  }
}

module attributes {stable_mosaic.version = 11 : i64} {
  func.func @_matmul_act_kernel(%arg0: i32, %arg1: memref<8x1024xbf16, #tpu.memory_space<vmem>>, %arg2: memref<1024x128xbf16, #tpu.memory_space<vmem>>, %arg3: memref<8x128xf32, #tpu.memory_space<vmem>>) attributes {dimension_semantics = [#tpu.dimension_semantics<parallel>], iteration_bounds = array<i64: 1>, scalar_prefetch = 0 : i64, scratch_operands = 0 : i64, tpu.core_type = #tpu.core_type<tc>, window_params = [{transform_indices = @transform_0, window_bounds = array<i64: 8, 1024>}, {pipeline_mode = #tpu.pipeline_mode<synchronous>, transform_indices = @transform_1, window_bounds = array<i64: 1024, 128>}, {transform_indices = @transform_2, window_bounds = array<i64: 8, 128>}]} {
    %c0 = arith.constant 0 : index
    %c0_0 = arith.constant 0 : index
    %0 = vector.load %arg1[%c0, %c0_0] : memref<8x1024xbf16, #tpu.memory_space<vmem>>, vector<8x1024xbf16>
    %c0_1 = arith.constant 0 : index
    %c0_2 = arith.constant 0 : index
    %1 = vector.load %arg2[%c0_1, %c0_2] : memref<1024x128xbf16, #tpu.memory_space<vmem>>, vector<1024x128xbf16>
    %cst = arith.constant dense<0.000000e+00> : vector<8x128xf32>
    %2 = tpu.matmul %0, %1, %cst {dimension_numbers = #tpu.dot_dimension_numbers<[1], [0], [0], [1], [0, 0, 1, 1], [], []>} : vector<8x1024xbf16>, vector<1024x128xbf16>, vector<8x128xf32> -> vector<8x128xf32>
    %3 = arith.negf %2 : vector<8x128xf32>
    %4 = math.exp %3 : vector<8x128xf32>
    %cst_3 = arith.constant 1.000000e+00 : f32
    %5 = vector.broadcast %cst_3 : f32 to vector<8x128xf32>
    %6 = arith.addf %5, %4 : vector<8x128xf32>
    %7 = arith.divf %5, %6 : vector<8x128xf32>
    %c0_4 = arith.constant 0 : index
    %c0_5 = arith.constant 0 : index
    %8 = vector.load %arg3[%c0_4, %c0_5] : memref<8x128xf32, #tpu.memory_space<vmem>>, vector<8x128xf32>
    tpu.vector_store %arg3[%c0_4, %c0_5], %7 {strides = array<i32>} : memref<8x128xf32, #tpu.memory_space<vmem>>, vector<8x128xf32>,
    return
  }
  func.func @transform_0(%arg0: i32) -> (i32, i32) {
    %c0_i32 = arith.constant 0 : i32
    %c0_i32_0 = arith.constant 0 : i32
    return %arg0, %c0_i32 : i32, i32
  }
  func.func @transform_1(%arg0: i32) -> (i32, i32) {
    %c0_i32 = arith.constant 0 : i32
    %c0_i32_0 = arith.constant 0 : i32
    %c0_i32_1 = arith.constant 0 : i32
    return %c0_i32, %c0_i32_0 : i32, i32
  }
  func.func @transform_2(%arg0: i32) -> (i32, i32) {
    %c0_i32 = arith.constant 0 : i32
    %c0_i32_0 = arith.constant 0 : i32
    return %arg0, %c0_i32 : i32, i32
  }
}

</mosaic_0001>

<bundles_post_ra>
// kernel: dc_discriminator_forward.8
= control target key start
LH: loop header
LB: loop body
LE: loop exit
PB: predicated region body
PF: predicated region fallthrough
CT: control target
= control target key end

     0   :  { %s3396_s9 = smov 0   ;;  %s3625_s0 = inlined_call_operand.vmem [shape: bf16[2048,48], index: 0, kind: input, shape index: {}]   ;;  %s3626_s1 = inlined_call_operand.vmem [shape: bf16[48,128], index: 1, kind: input, shape index: {}]   ;;  %s3627_s2 = inlined_call_operand.vmem [shape: bf16[2048,128], index: 2, kind: output, shape index: {}]  }
   0x1 LB: > { %s2310_s10 = sadd.s32 4294967295, %s3379_s9   ;;  %p2314_p0 = scmp.ge.s32.totalorder %s3379_s9, 1  ;;  %s3379_s9 = sphi %s3396_s9, %s12_s9  }
   0x2   : > { %p113_p1 = scmp.lt.s32.totalorder %s3379_s9, 3 }
   0x4   : > { %p114_p2 = pnand %p2314_p0, %p113_p1 }
   0x5   : > { %v3306_v0 = vld [vmem:[%s3626_s1] sm:$0xff] (!%p114_p2)   ;;  %s2315_s13 = sshll.u32 (!%p114_p2), %s2310_s10, 7  ;;  %v3307_v1 = vld [vmem:[%s3626_s1 + $0x8] sm:$0xff] (!%p114_p2)   ;;  %v3308_v2 = vld [vmem:[%s3626_s1 + $0x10] sm:$0xff] (!%p114_p2)   ;;  %vm620_vm0 = vcmask (!%p114_p2), 392192  }
   0x6   : > { %117 = sbr.rel (%p114_p2) target bundleno = 362 (0x16a), region = 28  ;;  %p136_p3 = scmp.lt.s32.totalorder (!%p114_p2), %s2315_s13, 255  ;;  %3158 = vmatprep.subr.bf16.mxu0 (!%p114_p2), %v3306_v0  ;;  %3292 = vmatprep.subr.bf16.mxu1 (!%p114_p2), %v3306_v0 }
   0x7   : > { %3159 = vmatpush3.bf16.msra.mxu0 (!%p114_p2), %v3306_v0  ;;  %3295 = vmatpush3.bf16.msra.mxu1 (!%p114_p2), %v3306_v0 }
   0x8   : > { %3160 = vmatprep.subr.bf16.mxu0 (!%p114_p2), %v3307_v1  ;;  %3293 = vmatprep.subr.bf16.mxu1 (!%p114_p2), %v3307_v1 }
   0xb   : > { %3161 = vmatpush3.bf16.msra.mxu0 (!%p114_p2), %v3307_v1  ;;  %3296 = vmatpush3.bf16.msra.mxu1 (!%p114_p2), %v3307_v1 }
   0xc   : > { %3162 = vmatprep.subr.bf16.mxu0 (!%p114_p2), %v3308_v2  ;;  %3294 = vmatprep.subr.bf16.mxu1 (!%p114_p2), %v3308_v2 }
   0xd   : > { %s3629_s13 = smov (!%p136_p3, %s2315_s13), 255 }
   0xe   : > { %s2316_s18 = sshll.u32 %s3629_s13, 2 }
   0xf   : > { %s3421_s21 = scalar_lea.vmem %s3625_s0, %s2316_s18  ;;  %3163 = vmatpush3.bf16.msra.mxu0 %v3308_v2  ;;  %3297 = vmatpush3.bf16.msra.mxu1 %v3308_v2  ;;  %s3556_s24 = scalar_lea.vmem %s3627_s2, %s2316_s18 }
  0x10   : > { %v3309_v3 = vld [vmem:[%s3421_s21] sm:$0xff]   ;;  %v3311_v5 = vld [vmem:[%s3421_s21 + $0x8] sm:$0xff]   ;;  %v3313_v7 = vld [vmem:[%s3421_s21 + $0x10] sm:$0xff]  }
  0x11   : > { %v3310_v4 = vld [vmem:[%s3421_s21 + $0x100] sm:$0xff]   ;;  %3164 = vmatprep.mubr.msk.bf16.mxu0 %vm620_vm0, %v3309_v3  ;;  %v3312_v6 = vld [vmem:[%s3421_s21 + $0x108] sm:$0xff]   ;;  %v3314_v8 = vld [vmem:[%s3421_s21 + $0x110] sm:$0xff]  }
  0x12   : > { %3228 = vmatprep.mubr.msk.bf16.mxu1 %vm620_vm0, %v3310_v4  ;;  %3165 = vmatmul.mubr.msk.bf16.vlgmr.msra.gmra.mrb[0].mxu0 %vm620_vm0, %v3311_v5  ;;  %v3315_v9 = vld [vmem:[%s3421_s21 + $0x18] sm:$0xff]   ;;  %v3317_v11 = vld [vmem:[%s3421_s21 + $0x20] sm:$0xff]   ;;  %v3319_v13 = vld [vmem:[%s3421_s21 + $0x28] sm:$0xff]  }
  0x13   : > { %3229 = vmatmul.mubr.msk.bf16.vlgmr.msra.gmra.mrb[0].mxu1 %vm620_vm0, %v3312_v6  ;;  %3168 = vmatprep.mubr.msk.bf16.mxu0 %vm620_vm0, %v3313_v7  ;;  %v3316_v10 = vld [vmem:[%s3421_s21 + $0x118] sm:$0xff]   ;;  %v3318_v12 = vld [vmem:[%s3421_s21 + $0x120] sm:$0xff]   ;;  %v3320_v14 = vld [vmem:[%s3421_s21 + $0x128] sm:$0xff]  }
  0x14   : > { %3232 = vmatprep.mubr.msk.bf16.mxu1 %vm620_vm0, %v3314_v8  ;;  %v3321_v15 = vld [vmem:[%s3421_s21 + $0x30] sm:$0xff]   ;;  %v3323_v17 = vld [vmem:[%s3421_s21 + $0x38] sm:$0xff]   ;;  %v3325_v19 = vld [vmem:[%s3421_s21 + $0x40] sm:$0xff]  }
  0x15   : > { %v3322_v16 = vld [vmem:[%s3421_s21 + $0x130] sm:$0xff]   ;;  %v3324_v18 = vld [vmem:[%s3421_s21 + $0x138] sm:$0xff]   ;;  %v3326_v20 = vld [vmem:[%s3421_s21 + $0x140] sm:$0xff]  }
  0x16   : > { %v3327_v21 = vld [vmem:[%s3421_s21 + $0x48] sm:$0xff]   ;;  %v3329_v23 = vld [vmem:[%s3421_s21 + $0x50] sm:$0xff]   ;;  %v3331_v25 = vld [vmem:[%s3421_s21 + $0x58] sm:$0xff]  }
  0x17   : > { %v3328_v22 = vld [vmem:[%s3421_s21 + $0x148] sm:$0xff]   ;;  %v3330_v24 = vld [vmem:[%s3421_s21 + $0x150] sm:$0xff]   ;;  %v3332_v26 = vld [vmem:[%s3421_s21 + $0x158] sm:$0xff]  }
  0x18   : > { %v3333_v27 = vld [vmem:[%s3421_s21 + $0x60] sm:$0xff]   ;;  %v3335_v29 = vld [vmem:[%s3421_s21 + $0x68] sm:$0xff]   ;;  %v3337_v31 = vld [vmem:[%s3421_s21 + $0x70] sm:$0xff]  }
  0x19   : > { %v3334_v28 = vld [vmem:[%s3421_s21 + $0x160] sm:$0xff]   ;;  %v3336_v30 = vld [vmem:[%s3421_s21 + $0x168] sm:$0xff]   ;;  %v3338_v32 = vld [vmem:[%s3421_s21 + $0x170] sm:$0xff]  }
  0x1a   : > { %3169 = vmatmul.mubr.msk.bf16.gmra.mrb[4].mxu0 %vm620_vm0, %v3315_v9  ;;  %v3339_v33 = vld [vmem:[%s3421_s21 + $0x78] sm:$0xff]   ;;  %v3341_v35 = vld [vmem:[%s3421_s21 + $0x80] sm:$0xff]   ;;  %v3343_v37 = vld [vmem:[%s3421_s21 + $0x88] sm:$0xff]  }
  0x1b   : > { %3233 = vmatmul.mubr.msk.bf16.gmra.mrb[4].mxu1 %vm620_vm0, %v3316_v10  ;;  %3172 = vmatprep.mubr.msk.bf16.mxu0 %vm620_vm0, %v3317_v11  ;;  %v3340_v34 = vld [vmem:[%s3421_s21 + $0x178] sm:$0xff]   ;;  %v3342_v36 = vld [vmem:[%s3421_s21 + $0x180] sm:$0xff]   ;;  %v3344_v38 = vld [vmem:[%s3421_s21 + $0x188] sm:$0xff]  }
  0x1c   : > { %3236 = vmatprep.mubr.msk.bf16.mxu1 %vm620_vm0, %v3318_v12  ;;  %v3345_v39 = vld [vmem:[%s3421_s21 + $0x90] sm:$0xff]   ;;  %v3347_v41 = vld [vmem:[%s3421_s21 + $0x98] sm:$0xff]   ;;  %v3349_v43 = vld [vmem:[%s3421_s21 + $0xa0] sm:$0xff]  }
  0x1d   : > { %v3346_v40 = vld [vmem:[%s3421_s21 + $0x190] sm:$0xff]   ;;  %v3348_v42 = vld [vmem:[%s3421_s21 + $0x198] sm:$0xff]   ;;  %v3350_v44 = vld [vmem:[%s3421_s21 + $0x1a0] sm:$0xff]  }
  0x1e   : > { %v3351_v45 = vld [vmem:[%s3421_s21 + $0xa8] sm:$0xff]   ;;  %v3353_v47 = vld [vmem:[%s3421_s21 + $0xb0] sm:$0xff]   ;;  %v3355_v49 = vld [vmem:[%s3421_s21 + $0xb8] sm:$0xff]  }
  0x1f   : > { %v3352_v46 = vld [vmem:[%s3421_s21 + $0x1a8] sm:$0xff]   ;;  %v3354_v48 = vld [vmem:[%s3421_s21 + $0x1b0] sm:$0xff]   ;;  %v3356_v50 = vld [vmem:[%s3421_s21 + $0x1b8] sm:$0xff]  }
  0x20   : > { %v3357_v51 = vld [vmem:[%s3421_s21 + $0xc0] sm:$0xff]   ;;  %v3359_v53 = vld [vmem:[%s3421_s21 + $0xc8] sm:$0xff]   ;;  %v3361_v55 = vld [vmem:[%s3421_s21 + $0xd0] sm:$0xff]  }
  0x21   : > { %v3358_v52 = vld [vmem:[%s3421_s21 + $0x1c0] sm:$0xff]   ;;  %v3360_v54 = vld [vmem:[%s3421_s21 + $0x1c8] sm:$0xff]   ;;  %v3362_v56 = vld [vmem:[%s3421_s21 + $0x1d0] sm:$0xff]  }
  0x22   : > { %3173 = vmatmul.mubr.msk.bf16.gmra.mrb[8].mxu0 %vm620_vm0, %v3319_v13  ;;  %v3363_v57 = vld [vmem:[%s3421_s21 + $0xd8] sm:$0xff]   ;;  %v3365_v59 = vld [vmem:[%s3421_s21 + $0xe0] sm:$0xff]   ;;  %v3367_v61 = vld [vmem:[%s3421_s21 + $0xe8] sm:$0xff]  }
  0x23   : > { %3237 = vmatmul.mubr.msk.bf16.gmra.mrb[8].mxu1 %vm620_vm0, %v3320_v14  ;;  %3176 = vmatprep.mubr.msk.bf16.mxu0 %vm620_vm0, %v3321_v15  ;;  %v3364_v58 = vld [vmem:[%s3421_s21 + $0x1d8] sm:$0xff]   ;;  %v3366_v60 = vld [vmem:[%s3421_s21 + $0x1e0] sm:$0xff]   ;;  %v3368_v62 = vld [vmem:[%s3421_s21 + $0x1e8] sm:$0xff]  }
  0x24   : > { %3240 = vmatprep.mubr.msk.bf16.mxu1 %vm620_vm0, %v3322_v16  ;;  %v3369_v63 = vld [vmem:[%s3421_s21 + $0xf0] sm:$0xff]   ;;  %v3371_v1 = vld [vmem:[%s3421_s21 + $0xf8] sm:$0xff]  }
  0x25   : > { %v3370_v0 = vld [vmem:[%s3421_s21 + $0x1f0] sm:$0xff]   ;;  %v3372_v2 = vld [vmem:[%s3421_s21 + $0x1f8] sm:$0xff]  }
  0x2a   : > { %3177 = vmatmul.mubr.msk.bf16.gmra.mrb[12].mxu0 %vm620_vm0, %v3323_v17 }
  0x2b   : > { %3241 = vmatmul.mubr.msk.bf16.gmra.mrb[12].mxu1 %vm620_vm0, %v3324_v18  ;;  %3180 = vmatprep.mubr.msk.bf16.mxu0 %vm620_vm0, %v3325_v19 }
  0x2c   : > { %3244 = vmatprep.mubr.msk.bf16.mxu1 %vm620_vm0, %v3326_v20 }
  0x32   : > { %3181 = vmatmul.mubr.msk.bf16.gmra.mrb[16].mxu0 %vm620_vm0, %v3327_v21 }
  0x33   : > { %3245 = vmatmul.mubr.msk.bf16.gmra.mrb[16].mxu1 %vm620_vm0, %v3328_v22  ;;  %3184 = vmatprep.mubr.msk.bf16.mxu0 %vm620_vm0, %v3329_v23 }
  0x34   : > { %3248 = vmatprep.mubr.msk.bf16.mxu1 %vm620_vm0, %v3330_v24 }
  0x3a   : > { %3185 = vmatmul.mubr.msk.bf16.gmra.mrb[20].mxu0 %vm620_vm0, %v3331_v25 }
  0x3b   : > { %3249 = vmatmul.mubr.msk.bf16.gmra.mrb[20].mxu1 %vm620_vm0, %v3332_v26  ;;  %3188 = vmatprep.mubr.msk.bf16.mxu0 %vm620_vm0, %v3333_v27 }
  0x3c   : > { %3252 = vmatprep.mubr.msk.bf16.mxu1 %vm620_vm0, %v3334_v28 }
  0x42   : > { %3189 = vmatmul.mubr.msk.bf16.gmra.mrb[24].mxu0 %vm620_vm0, %v3335_v29 }
  0x43   : > { %3253 = vmatmul.mubr.msk.bf16.gmra.mrb[24].mxu1 %vm620_vm0, %v3336_v30  ;;  %3192 = vmatprep.mubr.msk.bf16.mxu0 %vm620_vm0, %v3337_v31 }
  0x44   : > { %3256 = vmatprep.mubr.msk.bf16.mxu1 %vm620_vm0, %v3338_v32 }
  0x4a   : > { %3193 = vmatmul.mubr.msk.bf16.gmra.mrb[28].mxu0 %vm620_vm0, %v3339_v33 }
  0x4b   : > { %3257 = vmatmul.mubr.msk.bf16.gmra.mrb[28].mxu1 %vm620_vm0, %v3340_v34  ;;  %3196 = vmatprep.mubr.msk.bf16.mxu0 %vm620_vm0, %v3341_v35 }
  0x4c   : > { %3260 = vmatprep.mubr.msk.bf16.mxu1 %vm620_vm0, %v3342_v36 }
  0x52   : > { %3197 = vmatmul.mubr.msk.bf16.gmra.mrb[32].mxu0 %vm620_vm0, %v3343_v37 }
  0x53   : > { %3261 = vmatmul.mubr.msk.bf16.gmra.mrb[32].mxu1 %vm620_vm0, %v3344_v38  ;;  %3200 = vmatprep.mubr.msk.bf16.mxu0 %vm620_vm0, %v3345_v39 }
  0x54   : > { %3264 = vmatprep.mubr.msk.bf16.mxu1 %vm620_vm0, %v3346_v40 }
  0x5a   : > { %3201 = vmatmul.mubr.msk.bf16.gmra.mrb[36].mxu0 %vm620_vm0, %v3347_v41 }
  0x5b   : > { %3265 = vmatmul.mubr.msk.bf16.gmra.mrb[36].mxu1 %vm620_vm0, %v3348_v42  ;;  %3204 = vmatprep.mubr.msk.bf16.mxu0 %vm620_vm0, %v3349_v43 }
  0x5c   : > { %3268 = vmatprep.mubr.msk.bf16.mxu1 %vm620_vm0, %v3350_v44 }
  0x62   : > { %3205 = vmatmul.mubr.msk.bf16.gmra.mrb[40].mxu0 %vm620_vm0, %v3351_v45 }
  0x63   : > { %3269 = vmatmul.mubr.msk.bf16.gmra.mrb[40].mxu1 %vm620_vm0, %v3352_v46  ;;  %3208 = vmatprep.mubr.msk.bf16.mxu0 %vm620_vm0, %v3353_v47 }
  0x64   : > { %3272 = vmatprep.mubr.msk.bf16.mxu1 %vm620_vm0, %v3354_v48 }
  0x6a   : > { %3209 = vmatmul.mubr.msk.bf16.gmra.mrb[44].mxu0 %vm620_vm0, %v3355_v49 }
  0x6b   : > { %3273 = vmatmul.mubr.msk.bf16.gmra.mrb[44].mxu1 %vm620_vm0, %v3356_v50  ;;  %3212 = vmatprep.mubr.msk.bf16.mxu0 %vm620_vm0, %v3357_v51 }
  0x6c   : > { %3276 = vmatprep.mubr.msk.bf16.mxu1 %vm620_vm0, %v3358_v52 }
  0x72   : > { %3213 = vmatmul.mubr.msk.bf16.gmra.mrb[48].mxu0 %vm620_vm0, %v3359_v53 }
  0x73   : > { %3277 = vmatmul.mubr.msk.bf16.gmra.mrb[48].mxu1 %vm620_vm0, %v3360_v54  ;;  %3216 = vmatprep.mubr.msk.bf16.mxu0 %vm620_vm0, %v3361_v55 }
  0x74   : > { %3280 = vmatprep.mubr.msk.bf16.mxu1 %vm620_vm0, %v3362_v56 }
  0x7a   : > { %3217 = vmatmul.mubr.msk.bf16.gmra.mrb[52].mxu0 %vm620_vm0, %v3363_v57 }
  0x7b   : > { %3281 = vmatmul.mubr.msk.bf16.gmra.mrb[52].mxu1 %vm620_vm0, %v3364_v58  ;;  %3220 = vmatprep.mubr.msk.bf16.mxu0 %vm620_vm0, %v3365_v59 }
  0x7c   : > { %3284 = vmatprep.mubr.msk.bf16.mxu1 %vm620_vm0, %v3366_v60 }
  0x82   : > { %3221 = vmatmul.mubr.msk.bf16.gmra.mrb[56].mxu0 %vm620_vm0, %v3367_v61 }
  0x83   : > { %3285 = vmatmul.mubr.msk.bf16.gmra.mrb[56].mxu1 %vm620_vm0, %v3368_v62  ;;  %3224 = vmatprep.mubr.msk.bf16.mxu0 %vm620_vm0, %v3369_v63 }
  0x84   : > { %3288 = vmatprep.mubr.msk.bf16.mxu1 %vm620_vm0, %v3370_v0 }
  0x8a   : > { %3225 = vmatmul.mubr.msk.bf16.gmra.mrb[60].mxu0 %vm620_vm0, %v3371_v1 }
  0x8b   : > { %3289 = vmatmul.mubr.msk.bf16.gmra.mrb[60].mxu1 %vm620_vm0, %v3372_v2 }
  0xe5   : > { %v3166_v3 = vpop.f32.mrb[0].mxu0 }
  0xe6   : > { %v3230_v4 = vpop.f32.mrb[0].mxu1  ;;  %v1360_v5 = vmul.f32 0.2, %v3166_v3  ;;  %v847_v7 = vpop.f32.mrb[1].mxu0 }
  0xe7   : > { %v1424_v6 = vmul.f32 0.2, %v3230_v4  ;;  %v1103_v8 = vpop.f32.mrb[1].mxu1  ;;  %v1358_v9 = vmul.f32 0.2, %v847_v7  ;;  %v3167_v11 = vpop.f32.mrb[2].mxu0 }
  0xe8   : > { %v1422_v10 = vmul.f32 0.2, %v1103_v8  ;;  %v3231_v12 = vpop.f32.mrb[2].mxu1  ;;  %v1361_v13 = vmul.f32 0.2, %v3167_v11  ;;  %v850_v15 = vpop.f32.mrb[3].mxu0  ;;  %v1488_v19 = vmax.f32 %v3166_v3, %v1360_v5 }
  0xe9   : > { %v1425_v14 = vmul.f32 0.2, %v3231_v12  ;;  %v1106_v16 = vpop.f32.mrb[3].mxu1  ;;  %v1359_v17 = vmul.f32 0.2, %v850_v15  ;;  %v1552_v20 = vmax.f32 %v3230_v4, %v1424_v6  ;;  %v1486_v23 = vmax.f32 %v847_v7, %v1358_v9 }
  0xea   : > { %v1423_v18 = vmul.f32 0.2, %v1106_v16  ;;  %v1489_v21 = vmax.f32 %v3167_v11, %v1361_v13  ;;  %v1550_v24 = vmax.f32 %v1103_v8, %v1422_v10 }
  0xeb   : > { %v1553_v22 = vmax.f32 %v3231_v12, %v1425_v14  ;;  %v1487_v25 = vmax.f32 %v850_v15, %v1359_v17 }
  0xec   : > { %v1551_v26 = vmax.f32 %v1106_v16, %v1423_v18  ;;  %v2716_v27 = vpack.c.bf16 %v1489_v21, %v1488_v19 }
  0xed   : > { %v2876_v28 = vpack.c.bf16 %v1553_v22, %v1552_v20  ;;  %v2711_v29 = vpack.c.bf16 %v1487_v25, %v1486_v23  ;;  %v3170_v31 = vpop.f32.mrb[4].mxu0 }
  0xee   : > { %v2871_v30 = vpack.c.bf16 %v1551_v26, %v1550_v24  ;;  %v3234_v32 = vpop.f32.mrb[4].mxu1  ;;  %3028 = vst [vmem:[%s3556_s24 + $0x8] sm:$0xff] %v2716_v27   ;;  %v1364_v33 = vmul.f32 0.2, %v3170_v31  ;;  %v863_v35 = vpop.f32.mrb[5].mxu0 }
  0xef   : > { %3060 = vst [vmem:[%s3556_s24 + $0x108] sm:$0xff] %v2876_v28   ;;  %v1428_v34 = vmul.f32 0.2, %v3234_v32  ;;  %v1119_v36 = vpop.f32.mrb[5].mxu1  ;;  %2712 = vst [vmem:[%s3556_s24] sm:$0xff] %v2711_v29   ;;  %v1362_v37 = vmul.f32 0.2, %v863_v35 }
  0xf0   : > { %3059 = vst [vmem:[%s3556_s24 + $0x100] sm:$0xff] %v2871_v30   ;;  %v1426_v38 = vmul.f32 0.2, %v1119_v36  ;;  %v3171_v39 = vpop.f32.mrb[6].mxu0  ;;  %v3235_v40 = vpop.f32.mrb[6].mxu1  ;;  %v1492_v47 = vmax.f32 %v3170_v31, %v1364_v33 }
  0xf1   : > { %v1365_v41 = vmul.f32 0.2, %v3171_v39  ;;  %v1429_v42 = vmul.f32 0.2, %v3235_v40  ;;  %v866_v43 = vpop.f32.mrb[7].mxu0  ;;  %v1122_v44 = vpop.f32.mrb[7].mxu1  ;;  %v1556_v48 = vmax.f32 %v3234_v32, %v1428_v34  ;;  %v1490_v51 = vmax.f32 %v863_v35, %v1362_v37 }
  0xf2   : > { %v1363_v45 = vmul.f32 0.2, %v866_v43  ;;  %v1427_v46 = vmul.f32 0.2, %v1122_v44  ;;  %v1554_v52 = vmax.f32 %v1119_v36, %v1426_v38 }
  0xf3   : > { %v1493_v49 = vmax.f32 %v3171_v39, %v1365_v41  ;;  %v1557_v50 = vmax.f32 %v3235_v40, %v1429_v42 }
  0xf4   : > { %v1491_v53 = vmax.f32 %v866_v43, %v1363_v45  ;;  %v1555_v54 = vmax.f32 %v1122_v44, %v1427_v46 }
  0xf5   : > { %v2726_v55 = vpack.c.bf16 %v1493_v49, %v1492_v47  ;;  %v2886_v56 = vpack.c.bf16 %v1557_v50, %v1556_v48  ;;  %v3174_v59 = vpop.f32.mrb[8].mxu0 }
  0xf6   : > { %v2721_v57 = vpack.c.bf16 %v1491_v53, %v1490_v51  ;;  %v2881_v58 = vpack.c.bf16 %v1555_v54, %v1554_v52  ;;  %v3238_v60 = vpop.f32.mrb[8].mxu1  ;;  %v1368_v61 = vmul.f32 0.2, %v3174_v59  ;;  %v879_v63 = vpop.f32.mrb[9].mxu0 }
  0xf7   : > { %3030 = vst [vmem:[%s3556_s24 + $0x18] sm:$0xff] %v2726_v55   ;;  %3062 = vst [vmem:[%s3556_s24 + $0x118] sm:$0xff] %v2886_v56   ;;  %v1432_v62 = vmul.f32 0.2, %v3238_v60  ;;  %v1135_v0 = vpop.f32.mrb[9].mxu1  ;;  %v3175_v3 = vpop.f32.mrb[10].mxu0 }
  0xf8   : > { %3029 = vst [vmem:[%s3556_s24 + $0x10] sm:$0xff] %v2721_v57   ;;  %3061 = vst [vmem:[%s3556_s24 + $0x110] sm:$0xff] %v2881_v58   ;;  %v1366_v1 = vmul.f32 0.2, %v879_v63  ;;  %v1430_v2 = vmul.f32 0.2, %v1135_v0  ;;  %v1496_v11 = vmax.f32 %v3174_v59, %v1368_v61 }
  0xf9   : > { %v3239_v4 = vpop.f32.mrb[10].mxu1  ;;  %v1369_v5 = vmul.f32 0.2, %v3175_v3  ;;  %v882_v7 = vpop.f32.mrb[11].mxu0  ;;  %v1560_v12 = vmax.f32 %v3238_v60, %v1432_v62 }
  0xfa   : > { %v1433_v6 = vmul.f32 0.2, %v3239_v4  ;;  %v1138_v8 = vpop.f32.mrb[11].mxu1  ;;  %v1367_v9 = vmul.f32 0.2, %v882_v7  ;;  %v1494_v15 = vmax.f32 %v879_v63, %v1366_v1  ;;  %v1558_v16 = vmax.f32 %v1135_v0, %v1430_v2 }
  0xfb   : > { %v1431_v10 = vmul.f32 0.2, %v1138_v8  ;;  %v1497_v13 = vmax.f32 %v3175_v3, %v1369_v5 }
  0xfc   : > { %v1561_v14 = vmax.f32 %v3239_v4, %v1433_v6  ;;  %v1495_v17 = vmax.f32 %v882_v7, %v1367_v9 }
  0xfd   : > { %v1559_v18 = vmax.f32 %v1138_v8, %v1431_v10  ;;  %v2736_v19 = vpack.c.bf16 %v1497_v13, %v1496_v11  ;;  %v3178_v23 = vpop.f32.mrb[12].mxu0 }
  0xfe   : > { %v2896_v20 = vpack.c.bf16 %v1561_v14, %v1560_v12  ;;  %v2731_v21 = vpack.c.bf16 %v1495_v17, %v1494_v15  ;;  %v3242_v24 = vpop.f32.mrb[12].mxu1  ;;  %v1372_v25 = vmul.f32 0.2, %v3178_v23  ;;  %v895_v27 = vpop.f32.mrb[13].mxu0 }
  0xff   : > { %v2891_v22 = vpack.c.bf16 %v1559_v18, %v1558_v16  ;;  %3032 = vst [vmem:[%s3556_s24 + $0x28] sm:$0xff] %v2736_v19   ;;  %v1436_v26 = vmul.f32 0.2, %v3242_v24  ;;  %v1151_v28 = vpop.f32.mrb[13].mxu1  ;;  %v1370_v29 = vmul.f32 0.2, %v895_v27 }
 0x100   : > { %3064 = vst [vmem:[%s3556_s24 + $0x128] sm:$0xff] %v2896_v20   ;;  %3031 = vst [vmem:[%s3556_s24 + $0x20] sm:$0xff] %v2731_v21   ;;  %v1434_v30 = vmul.f32 0.2, %v1151_v28  ;;  %v3179_v31 = vpop.f32.mrb[14].mxu0  ;;  %v3243_v32 = vpop.f32.mrb[14].mxu1  ;;  %v1500_v39 = vmax.f32 %v3178_v23, %v1372_v25 }
 0x101   : > { %3063 = vst [vmem:[%s3556_s24 + $0x120] sm:$0xff] %v2891_v22   ;;  %v1373_v33 = vmul.f32 0.2, %v3179_v31  ;;  %v1437_v34 = vmul.f32 0.2, %v3243_v32  ;;  %v898_v35 = vpop.f32.mrb[15].mxu0  ;;  %v1564_v40 = vmax.f32 %v3242_v24, %v1436_v26  ;;  %v1498_v43 = vmax.f32 %v895_v27, %v1370_v29 }
 0x102   : > { %v1154_v36 = vpop.f32.mrb[15].mxu1  ;;  %v1371_v37 = vmul.f32 0.2, %v898_v35  ;;  %v1562_v44 = vmax.f32 %v1151_v28, %v1434_v30 }
 0x103   : > { %v1435_v38 = vmul.f32 0.2, %v1154_v36  ;;  %v1501_v41 = vmax.f32 %v3179_v31, %v1373_v33  ;;  %v1565_v42 = vmax.f32 %v3243_v32, %v1437_v34 }
 0x104   : > { %v1499_v45 = vmax.f32 %v898_v35, %v1371_v37 }
 0x105   : > { %v1563_v46 = vmax.f32 %v1154_v36, %v1435_v38  ;;  %v2746_v47 = vpack.c.bf16 %v1501_v41, %v1500_v39  ;;  %v2906_v48 = vpack.c.bf16 %v1565_v42, %v1564_v40  ;;  %v3182_v51 = vpop.f32.mrb[16].mxu0 }
 0x106   : > { %v2741_v49 = vpack.c.bf16 %v1499_v45, %v1498_v43  ;;  %v3246_v52 = vpop.f32.mrb[16].mxu1  ;;  %v1376_v53 = vmul.f32 0.2, %v3182_v51  ;;  %v911_v55 = vpop.f32.mrb[17].mxu0 }
 0x107   : > { %v2901_v50 = vpack.c.bf16 %v1563_v46, %v1562_v44  ;;  %3034 = vst [vmem:[%s3556_s24 + $0x38] sm:$0xff] %v2746_v47   ;;  %3066 = vst [vmem:[%s3556_s24 + $0x138] sm:$0xff] %v2906_v48   ;;  %v1440_v54 = vmul.f32 0.2, %v3246_v52  ;;  %v1167_v56 = vpop.f32.mrb[17].mxu1  ;;  %v3183_v59 = vpop.f32.mrb[18].mxu0 }
 0x108   : > { %3033 = vst [vmem:[%s3556_s24 + $0x30] sm:$0xff] %v2741_v49   ;;  %v1374_v57 = vmul.f32 0.2, %v911_v55  ;;  %v1438_v58 = vmul.f32 0.2, %v1167_v56  ;;  %v3247_v60 = vpop.f32.mrb[18].mxu1  ;;  %v1504_v3 = vmax.f32 %v3182_v51, %v1376_v53 }
 0x109   : > { %3065 = vst [vmem:[%s3556_s24 + $0x130] sm:$0xff] %v2901_v50   ;;  %v1377_v61 = vmul.f32 0.2, %v3183_v59  ;;  %v1441_v62 = vmul.f32 0.2, %v3247_v60  ;;  %v914_v63 = vpop.f32.mrb[19].mxu0  ;;  %v1568_v4 = vmax.f32 %v3246_v52, %v1440_v54 }
 0x10a   : > { %v1170_v0 = vpop.f32.mrb[19].mxu1  ;;  %v1375_v1 = vmul.f32 0.2, %v914_v63  ;;  %v1502_v7 = vmax.f32 %v911_v55, %v1374_v57  ;;  %v1566_v8 = vmax.f32 %v1167_v56, %v1438_v58 }
 0x10b   : > { %v1439_v2 = vmul.f32 0.2, %v1170_v0  ;;  %v1505_v5 = vmax.f32 %v3183_v59, %v1377_v61  ;;  %v1569_v6 = vmax.f32 %v3247_v60, %v1441_v62 }
 0x10c   : > { %v1503_v9 = vmax.f32 %v914_v63, %v1375_v1 }
 0x10d   : > { %v1567_v10 = vmax.f32 %v1170_v0, %v1439_v2  ;;  %v2756_v11 = vpack.c.bf16 %v1505_v5, %v1504_v3  ;;  %v2916_v12 = vpack.c.bf16 %v1569_v6, %v1568_v4  ;;  %v3186_v15 = vpop.f32.mrb[20].mxu0 }
 0x10e   : > { %v2751_v13 = vpack.c.bf16 %v1503_v9, %v1502_v7  ;;  %v3250_v16 = vpop.f32.mrb[20].mxu1  ;;  %v1380_v17 = vmul.f32 0.2, %v3186_v15  ;;  %v927_v19 = vpop.f32.mrb[21].mxu0 }
 0x10f   : > { %v2911_v14 = vpack.c.bf16 %v1567_v10, %v1566_v8  ;;  %3036 = vst [vmem:[%s3556_s24 + $0x48] sm:$0xff] %v2756_v11   ;;  %3068 = vst [vmem:[%s3556_s24 + $0x148] sm:$0xff] %v2916_v12   ;;  %v1444_v18 = vmul.f32 0.2, %v3250_v16  ;;  %v1183_v20 = vpop.f32.mrb[21].mxu1  ;;  %v3187_v23 = vpop.f32.mrb[22].mxu0 }
 0x110   : > { %3035 = vst [vmem:[%s3556_s24 + $0x40] sm:$0xff] %v2751_v13   ;;  %v1378_v21 = vmul.f32 0.2, %v927_v19  ;;  %v1442_v22 = vmul.f32 0.2, %v1183_v20  ;;  %v3251_v24 = vpop.f32.mrb[22].mxu1  ;;  %v1508_v31 = vmax.f32 %v3186_v15, %v1380_v17 }
 0x111   : > { %3067 = vst [vmem:[%s3556_s24 + $0x140] sm:$0xff] %v2911_v14   ;;  %v1381_v25 = vmul.f32 0.2, %v3187_v23  ;;  %v1445_v26 = vmul.f32 0.2, %v3251_v24  ;;  %v930_v27 = vpop.f32.mrb[23].mxu0  ;;  %v1572_v32 = vmax.f32 %v3250_v16, %v1444_v18 }
 0x112   : > { %v1186_v28 = vpop.f32.mrb[23].mxu1  ;;  %v1379_v29 = vmul.f32 0.2, %v930_v27  ;;  %v1506_v35 = vmax.f32 %v927_v19, %v1378_v21  ;;  %v1570_v36 = vmax.f32 %v1183_v20, %v1442_v22 }
 0x113   : > { %v1443_v30 = vmul.f32 0.2, %v1186_v28  ;;  %v1509_v33 = vmax.f32 %v3187_v23, %v1381_v25  ;;  %v1573_v34 = vmax.f32 %v3251_v24, %v1445_v26 }
 0x114   : > { %v1507_v37 = vmax.f32 %v930_v27, %v1379_v29 }
 0x115   : > { %v1571_v38 = vmax.f32 %v1186_v28, %v1443_v30  ;;  %v2766_v39 = vpack.c.bf16 %v1509_v33, %v1508_v31  ;;  %v2926_v40 = vpack.c.bf16 %v1573_v34, %v1572_v32  ;;  %v3190_v43 = vpop.f32.mrb[24].mxu0 }
 0x116   : > { %v2761_v41 = vpack.c.bf16 %v1507_v37, %v1506_v35  ;;  %v3254_v44 = vpop.f32.mrb[24].mxu1  ;;  %v1384_v45 = vmul.f32 0.2, %v3190_v43  ;;  %v943_v47 = vpop.f32.mrb[25].mxu0 }
 0x117   : > { %v2921_v42 = vpack.c.bf16 %v1571_v38, %v1570_v36  ;;  %3038 = vst [vmem:[%s3556_s24 + $0x58] sm:$0xff] %v2766_v39   ;;  %3070 = vst [vmem:[%s3556_s24 + $0x158] sm:$0xff] %v2926_v40   ;;  %v1448_v46 = vmul.f32 0.2, %v3254_v44  ;;  %v1199_v48 = vpop.f32.mrb[25].mxu1  ;;  %v3191_v51 = vpop.f32.mrb[26].mxu0 }
 0x118   : > { %3037 = vst [vmem:[%s3556_s24 + $0x50] sm:$0xff] %v2761_v41   ;;  %v1382_v49 = vmul.f32 0.2, %v943_v47  ;;  %v1446_v50 = vmul.f32 0.2, %v1199_v48  ;;  %v3255_v52 = vpop.f32.mrb[26].mxu1  ;;  %v1512_v59 = vmax.f32 %v3190_v43, %v1384_v45 }
 0x119   : > { %3069 = vst [vmem:[%s3556_s24 + $0x150] sm:$0xff] %v2921_v42   ;;  %v1385_v53 = vmul.f32 0.2, %v3191_v51  ;;  %v1449_v54 = vmul.f32 0.2, %v3255_v52  ;;  %v946_v55 = vpop.f32.mrb[27].mxu0  ;;  %v1576_v60 = vmax.f32 %v3254_v44, %v1448_v46 }
 0x11a   : > { %v1202_v56 = vpop.f32.mrb[27].mxu1  ;;  %v1383_v57 = vmul.f32 0.2, %v946_v55  ;;  %v1510_v63 = vmax.f32 %v943_v47, %v1382_v49  ;;  %v1574_v0 = vmax.f32 %v1199_v48, %v1446_v50 }
 0x11b   : > { %v1447_v58 = vmul.f32 0.2, %v1202_v56  ;;  %v1513_v61 = vmax.f32 %v3191_v51, %v1385_v53  ;;  %v1577_v62 = vmax.f32 %v3255_v52, %v1449_v54 }
 0x11c   : > { %v1511_v1 = vmax.f32 %v946_v55, %v1383_v57 }
 0x11d   : > { %v1575_v2 = vmax.f32 %v1202_v56, %v1447_v58  ;;  %v2776_v3 = vpack.c.bf16 %v1513_v61, %v1512_v59  ;;  %v2936_v4 = vpack.c.bf16 %v1577_v62, %v1576_v60  ;;  %v3194_v7 = vpop.f32.mrb[28].mxu0 }
 0x11e   : > { %v2771_v5 = vpack.c.bf16 %v1511_v1, %v1510_v63  ;;  %v3258_v8 = vpop.f32.mrb[28].mxu1  ;;  %v1388_v9 = vmul.f32 0.2, %v3194_v7  ;;  %v959_v11 = vpop.f32.mrb[29].mxu0 }
 0x11f   : > { %v2931_v6 = vpack.c.bf16 %v1575_v2, %v1574_v0  ;;  %3040 = vst [vmem:[%s3556_s24 + $0x68] sm:$0xff] %v2776_v3   ;;  %3072 = vst [vmem:[%s3556_s24 + $0x168] sm:$0xff] %v2936_v4   ;;  %v1452_v10 = vmul.f32 0.2, %v3258_v8  ;;  %v1215_v12 = vpop.f32.mrb[29].mxu1  ;;  %v3195_v15 = vpop.f32.mrb[30].mxu0 }
 0x120   : > { %3039 = vst [vmem:[%s3556_s24 + $0x60] sm:$0xff] %v2771_v5   ;;  %v1386_v13 = vmul.f32 0.2, %v959_v11  ;;  %v1450_v14 = vmul.f32 0.2, %v1215_v12  ;;  %v3259_v16 = vpop.f32.mrb[30].mxu1  ;;  %v1516_v23 = vmax.f32 %v3194_v7, %v1388_v9 }
 0x121   : > { %3071 = vst [vmem:[%s3556_s24 + $0x160] sm:$0xff] %v2931_v6   ;;  %v1389_v17 = vmul.f32 0.2, %v3195_v15  ;;  %v1453_v18 = vmul.f32 0.2, %v3259_v16  ;;  %v962_v19 = vpop.f32.mrb[31].mxu0  ;;  %v1580_v24 = vmax.f32 %v3258_v8, %v1452_v10 }
 0x122   : > { %v1218_v20 = vpop.f32.mrb[31].mxu1  ;;  %v1387_v21 = vmul.f32 0.2, %v962_v19  ;;  %v1514_v27 = vmax.f32 %v959_v11, %v1386_v13  ;;  %v1578_v28 = vmax.f32 %v1215_v12, %v1450_v14 }
 0x123   : > { %v1451_v22 = vmul.f32 0.2, %v1218_v20  ;;  %v1517_v25 = vmax.f32 %v3195_v15, %v1389_v17  ;;  %v1581_v26 = vmax.f32 %v3259_v16, %v1453_v18 }
 0x124   : > { %v1515_v29 = vmax.f32 %v962_v19, %v1387_v21 }
 0x125   : > { %v1579_v30 = vmax.f32 %v1218_v20, %v1451_v22  ;;  %v2786_v31 = vpack.c.bf16 %v1517_v25, %v1516_v23  ;;  %v2946_v32 = vpack.c.bf16 %v1581_v26, %v1580_v24  ;;  %v3198_v35 = vpop.f32.mrb[32].mxu0 }
 0x126   : > { %v2781_v33 = vpack.c.bf16 %v1515_v29, %v1514_v27  ;;  %v3262_v36 = vpop.f32.mrb[32].mxu1  ;;  %v1392_v37 = vmul.f32 0.2, %v3198_v35  ;;  %v975_v39 = vpop.f32.mrb[33].mxu0 }
 0x127   : > { %v2941_v34 = vpack.c.bf16 %v1579_v30, %v1578_v28  ;;  %3042 = vst [vmem:[%s3556_s24 + $0x78] sm:$0xff] %v2786_v31   ;;  %3074 = vst [vmem:[%s3556_s24 + $0x178] sm:$0xff] %v2946_v32   ;;  %v1456_v38 = vmul.f32 0.2, %v3262_v36  ;;  %v1231_v40 = vpop.f32.mrb[33].mxu1  ;;  %v3199_v43 = vpop.f32.mrb[34].mxu0 }
 0x128   : > { %3041 = vst [vmem:[%s3556_s24 + $0x70] sm:$0xff] %v2781_v33   ;;  %v1390_v41 = vmul.f32 0.2, %v975_v39  ;;  %v1454_v42 = vmul.f32 0.2, %v1231_v40  ;;  %v3263_v44 = vpop.f32.mrb[34].mxu1  ;;  %v1520_v51 = vmax.f32 %v3198_v35, %v1392_v37 }
 0x129   : > { %3073 = vst [vmem:[%s3556_s24 + $0x170] sm:$0xff] %v2941_v34   ;;  %v1393_v45 = vmul.f32 0.2, %v3199_v43  ;;  %v1457_v46 = vmul.f32 0.2, %v3263_v44  ;;  %v978_v47 = vpop.f32.mrb[35].mxu0  ;;  %v1584_v52 = vmax.f32 %v3262_v36, %v1456_v38 }
 0x12a   : > { %v1234_v48 = vpop.f32.mrb[35].mxu1  ;;  %v1391_v49 = vmul.f32 0.2, %v978_v47  ;;  %v1518_v55 = vmax.f32 %v975_v39, %v1390_v41  ;;  %v1582_v56 = vmax.f32 %v1231_v40, %v1454_v42 }
 0x12b   : > { %v1455_v50 = vmul.f32 0.2, %v1234_v48  ;;  %v1521_v53 = vmax.f32 %v3199_v43, %v1393_v45  ;;  %v1585_v54 = vmax.f32 %v3263_v44, %v1457_v46 }
 0x12c   : > { %v1519_v57 = vmax.f32 %v978_v47, %v1391_v49 }
 0x12d   : > { %v1583_v58 = vmax.f32 %v1234_v48, %v1455_v50  ;;  %v2796_v59 = vpack.c.bf16 %v1521_v53, %v1520_v51  ;;  %v2956_v60 = vpack.c.bf16 %v1585_v54, %v1584_v52  ;;  %v3202_v63 = vpop.f32.mrb[36].mxu0 }
 0x12e   : > { %v2791_v61 = vpack.c.bf16 %v1519_v57, %v1518_v55  ;;  %v3266_v0 = vpop.f32.mrb[36].mxu1  ;;  %v1396_v1 = vmul.f32 0.2, %v3202_v63  ;;  %v991_v3 = vpop.f32.mrb[37].mxu0 }
 0x12f   : > { %v2951_v62 = vpack.c.bf16 %v1583_v58, %v1582_v56  ;;  %3044 = vst [vmem:[%s3556_s24 + $0x88] sm:$0xff] %v2796_v59   ;;  %3076 = vst [vmem:[%s3556_s24 + $0x188] sm:$0xff] %v2956_v60   ;;  %v1460_v2 = vmul.f32 0.2, %v3266_v0  ;;  %v1247_v4 = vpop.f32.mrb[37].mxu1  ;;  %v3203_v7 = vpop.f32.mrb[38].mxu0 }
 0x130   : > { %3043 = vst [vmem:[%s3556_s24 + $0x80] sm:$0xff] %v2791_v61   ;;  %v1394_v5 = vmul.f32 0.2, %v991_v3  ;;  %v1458_v6 = vmul.f32 0.2, %v1247_v4  ;;  %v3267_v8 = vpop.f32.mrb[38].mxu1  ;;  %v1524_v15 = vmax.f32 %v3202_v63, %v1396_v1 }
 0x131   : > { %3075 = vst [vmem:[%s3556_s24 + $0x180] sm:$0xff] %v2951_v62   ;;  %v1397_v9 = vmul.f32 0.2, %v3203_v7  ;;  %v1461_v10 = vmul.f32 0.2, %v3267_v8  ;;  %v994_v11 = vpop.f32.mrb[39].mxu0  ;;  %v1588_v16 = vmax.f32 %v3266_v0, %v1460_v2 }
 0x132   : > { %v1250_v12 = vpop.f32.mrb[39].mxu1  ;;  %v1395_v13 = vmul.f32 0.2, %v994_v11  ;;  %v1522_v19 = vmax.f32 %v991_v3, %v1394_v5  ;;  %v1586_v20 = vmax.f32 %v1247_v4, %v1458_v6 }
 0x133   : > { %v1459_v14 = vmul.f32 0.2, %v1250_v12  ;;  %v1525_v17 = vmax.f32 %v3203_v7, %v1397_v9  ;;  %v1589_v18 = vmax.f32 %v3267_v8, %v1461_v10 }
 0x134   : > { %v1523_v21 = vmax.f32 %v994_v11, %v1395_v13 }
 0x135   : > { %v1587_v22 = vmax.f32 %v1250_v12, %v1459_v14  ;;  %v2806_v23 = vpack.c.bf16 %v1525_v17, %v1524_v15  ;;  %v2966_v24 = vpack.c.bf16 %v1589_v18, %v1588_v16  ;;  %v3206_v27 = vpop.f32.mrb[40].mxu0 }
 0x136   : > { %v2801_v25 = vpack.c.bf16 %v1523_v21, %v1522_v19  ;;  %v3270_v28 = vpop.f32.mrb[40].mxu1  ;;  %v1400_v29 = vmul.f32 0.2, %v3206_v27  ;;  %v1007_v31 = vpop.f32.mrb[41].mxu0 }
 0x137   : > { %v2961_v26 = vpack.c.bf16 %v1587_v22, %v1586_v20  ;;  %3046 = vst [vmem:[%s3556_s24 + $0x98] sm:$0xff] %v2806_v23   ;;  %3078 = vst [vmem:[%s3556_s24 + $0x198] sm:$0xff] %v2966_v24   ;;  %v1464_v30 = vmul.f32 0.2, %v3270_v28  ;;  %v1263_v32 = vpop.f32.mrb[41].mxu1  ;;  %v3207_v35 = vpop.f32.mrb[42].mxu0 }
 0x138   : > { %3045 = vst [vmem:[%s3556_s24 + $0x90] sm:$0xff] %v2801_v25   ;;  %v1398_v33 = vmul.f32 0.2, %v1007_v31  ;;  %v1462_v34 = vmul.f32 0.2, %v1263_v32  ;;  %v3271_v36 = vpop.f32.mrb[42].mxu1  ;;  %v1528_v43 = vmax.f32 %v3206_v27, %v1400_v29 }
 0x139   : > { %3077 = vst [vmem:[%s3556_s24 + $0x190] sm:$0xff] %v2961_v26   ;;  %v1401_v37 = vmul.f32 0.2, %v3207_v35  ;;  %v1465_v38 = vmul.f32 0.2, %v3271_v36  ;;  %v1010_v39 = vpop.f32.mrb[43].mxu0  ;;  %v1592_v44 = vmax.f32 %v3270_v28, %v1464_v30 }
 0x13a   : > { %v1266_v40 = vpop.f32.mrb[43].mxu1  ;;  %v1399_v41 = vmul.f32 0.2, %v1010_v39  ;;  %v1526_v47 = vmax.f32 %v1007_v31, %v1398_v33  ;;  %v1590_v48 = vmax.f32 %v1263_v32, %v1462_v34 }
 0x13b   : > { %v1463_v42 = vmul.f32 0.2, %v1266_v40  ;;  %v1529_v45 = vmax.f32 %v3207_v35, %v1401_v37  ;;  %v1593_v46 = vmax.f32 %v3271_v36, %v1465_v38 }
 0x13c   : > { %v1527_v49 = vmax.f32 %v1010_v39, %v1399_v41 }
 0x13d   : > { %v1591_v50 = vmax.f32 %v1266_v40, %v1463_v42  ;;  %v2816_v51 = vpack.c.bf16 %v1529_v45, %v1528_v43  ;;  %v2976_v52 = vpack.c.bf16 %v1593_v46, %v1592_v44  ;;  %v3210_v55 = vpop.f32.mrb[44].mxu0 }
 0x13e   : > { %v2811_v53 = vpack.c.bf16 %v1527_v49, %v1526_v47  ;;  %v3274_v56 = vpop.f32.mrb[44].mxu1  ;;  %v1404_v57 = vmul.f32 0.2, %v3210_v55  ;;  %v1023_v59 = vpop.f32.mrb[45].mxu0 }
 0x13f   : > { %v2971_v54 = vpack.c.bf16 %v1591_v50, %v1590_v48  ;;  %3048 = vst [vmem:[%s3556_s24 + $0xa8] sm:$0xff] %v2816_v51   ;;  %3080 = vst [vmem:[%s3556_s24 + $0x1a8] sm:$0xff] %v2976_v52   ;;  %v1468_v58 = vmul.f32 0.2, %v3274_v56  ;;  %v1279_v60 = vpop.f32.mrb[45].mxu1  ;;  %v3211_v63 = vpop.f32.mrb[46].mxu0 }
 0x140   : > { %3047 = vst [vmem:[%s3556_s24 + $0xa0] sm:$0xff] %v2811_v53   ;;  %v1402_v61 = vmul.f32 0.2, %v1023_v59  ;;  %v1466_v62 = vmul.f32 0.2, %v1279_v60  ;;  %v3275_v0 = vpop.f32.mrb[46].mxu1  ;;  %v1532_v7 = vmax.f32 %v3210_v55, %v1404_v57 }
 0x141   : > { %3079 = vst [vmem:[%s3556_s24 + $0x1a0] sm:$0xff] %v2971_v54   ;;  %v1405_v1 = vmul.f32 0.2, %v3211_v63  ;;  %v1469_v2 = vmul.f32 0.2, %v3275_v0  ;;  %v1026_v3 = vpop.f32.mrb[47].mxu0  ;;  %v1596_v8 = vmax.f32 %v3274_v56, %v1468_v58 }
 0x142   : > { %v1282_v4 = vpop.f32.mrb[47].mxu1  ;;  %v1403_v5 = vmul.f32 0.2, %v1026_v3  ;;  %v1530_v11 = vmax.f32 %v1023_v59, %v1402_v61  ;;  %v1594_v12 = vmax.f32 %v1279_v60, %v1466_v62 }
 0x143   : > { %v1467_v6 = vmul.f32 0.2, %v1282_v4  ;;  %v1533_v9 = vmax.f32 %v3211_v63, %v1405_v1  ;;  %v1597_v10 = vmax.f32 %v3275_v0, %v1469_v2 }
 0x144   : > { %v1531_v13 = vmax.f32 %v1026_v3, %v1403_v5 }
 0x145   : > { %v1595_v14 = vmax.f32 %v1282_v4, %v1467_v6  ;;  %v2826_v15 = vpack.c.bf16 %v1533_v9, %v1532_v7  ;;  %v2986_v16 = vpack.c.bf16 %v1597_v10, %v1596_v8  ;;  %v3214_v19 = vpop.f32.mrb[48].mxu0 }
 0x146   : > { %v2821_v17 = vpack.c.bf16 %v1531_v13, %v1530_v11  ;;  %v3278_v20 = vpop.f32.mrb[48].mxu1  ;;  %v1408_v21 = vmul.f32 0.2, %v3214_v19  ;;  %v1039_v23 = vpop.f32.mrb[49].mxu0 }
 0x147   : > { %v2981_v18 = vpack.c.bf16 %v1595_v14, %v1594_v12  ;;  %3050 = vst [vmem:[%s3556_s24 + $0xb8] sm:$0xff] %v2826_v15   ;;  %3082 = vst [vmem:[%s3556_s24 + $0x1b8] sm:$0xff] %v2986_v16   ;;  %v1472_v22 = vmul.f32 0.2, %v3278_v20  ;;  %v1295_v24 = vpop.f32.mrb[49].mxu1  ;;  %v3215_v27 = vpop.f32.mrb[50].mxu0 }
 0x148   : > { %3049 = vst [vmem:[%s3556_s24 + $0xb0] sm:$0xff] %v2821_v17   ;;  %v1406_v25 = vmul.f32 0.2, %v1039_v23  ;;  %v1470_v26 = vmul.f32 0.2, %v1295_v24  ;;  %v3279_v28 = vpop.f32.mrb[50].mxu1  ;;  %v1536_v35 = vmax.f32 %v3214_v19, %v1408_v21 }
 0x149   : > { %3081 = vst [vmem:[%s3556_s24 + $0x1b0] sm:$0xff] %v2981_v18   ;;  %v1409_v29 = vmul.f32 0.2, %v3215_v27  ;;  %v1473_v30 = vmul.f32 0.2, %v3279_v28  ;;  %v1042_v31 = vpop.f32.mrb[51].mxu0  ;;  %v1600_v36 = vmax.f32 %v3278_v20, %v1472_v22 }
 0x14a   : > { %v1298_v32 = vpop.f32.mrb[51].mxu1  ;;  %v1407_v33 = vmul.f32 0.2, %v1042_v31  ;;  %v1534_v39 = vmax.f32 %v1039_v23, %v1406_v25  ;;  %v1598_v40 = vmax.f32 %v1295_v24, %v1470_v26 }
 0x14b   : > { %v1471_v34 = vmul.f32 0.2, %v1298_v32  ;;  %v1537_v37 = vmax.f32 %v3215_v27, %v1409_v29  ;;  %v1601_v38 = vmax.f32 %v3279_v28, %v1473_v30 }
 0x14c   : > { %v1535_v41 = vmax.f32 %v1042_v31, %v1407_v33 }
 0x14d   : > { %v1599_v42 = vmax.f32 %v1298_v32, %v1471_v34  ;;  %v2836_v43 = vpack.c.bf16 %v1537_v37, %v1536_v35  ;;  %v2996_v44 = vpack.c.bf16 %v1601_v38, %v1600_v36  ;;  %v3218_v47 = vpop.f32.mrb[52].mxu0 }
 0x14e   : > { %v2831_v45 = vpack.c.bf16 %v1535_v41, %v1534_v39  ;;  %v3282_v48 = vpop.f32.mrb[52].mxu1  ;;  %v1412_v49 = vmul.f32 0.2, %v3218_v47  ;;  %v1055_v51 = vpop.f32.mrb[53].mxu0 }
 0x14f   : > { %v2991_v46 = vpack.c.bf16 %v1599_v42, %v1598_v40  ;;  %3052 = vst [vmem:[%s3556_s24 + $0xc8] sm:$0xff] %v2836_v43   ;;  %3084 = vst [vmem:[%s3556_s24 + $0x1c8] sm:$0xff] %v2996_v44   ;;  %v1476_v50 = vmul.f32 0.2, %v3282_v48  ;;  %v1311_v52 = vpop.f32.mrb[53].mxu1  ;;  %v3219_v55 = vpop.f32.mrb[54].mxu0 }
 0x150   : > { %3051 = vst [vmem:[%s3556_s24 + $0xc0] sm:$0xff] %v2831_v45   ;;  %v1410_v53 = vmul.f32 0.2, %v1055_v51  ;;  %v1474_v54 = vmul.f32 0.2, %v1311_v52  ;;  %v3283_v56 = vpop.f32.mrb[54].mxu1  ;;  %v1540_v63 = vmax.f32 %v3218_v47, %v1412_v49 }
 0x151   : > { %3083 = vst [vmem:[%s3556_s24 + $0x1c0] sm:$0xff] %v2991_v46   ;;  %v1413_v57 = vmul.f32 0.2, %v3219_v55  ;;  %v1477_v58 = vmul.f32 0.2, %v3283_v56  ;;  %v1058_v59 = vpop.f32.mrb[55].mxu0  ;;  %v1604_v0 = vmax.f32 %v3282_v48, %v1476_v50 }
 0x152   : > { %v1314_v60 = vpop.f32.mrb[55].mxu1  ;;  %v1411_v61 = vmul.f32 0.2, %v1058_v59  ;;  %v1538_v3 = vmax.f32 %v1055_v51, %v1410_v53  ;;  %v1602_v4 = vmax.f32 %v1311_v52, %v1474_v54 }
 0x153   : > { %v1475_v62 = vmul.f32 0.2, %v1314_v60  ;;  %v1541_v1 = vmax.f32 %v3219_v55, %v1413_v57  ;;  %v1605_v2 = vmax.f32 %v3283_v56, %v1477_v58 }
 0x154   : > { %v1539_v5 = vmax.f32 %v1058_v59, %v1411_v61 }
 0x155   : > { %v1603_v6 = vmax.f32 %v1314_v60, %v1475_v62  ;;  %v2846_v7 = vpack.c.bf16 %v1541_v1, %v1540_v63  ;;  %v3006_v8 = vpack.c.bf16 %v1605_v2, %v1604_v0  ;;  %v3222_v11 = vpop.f32.mrb[56].mxu0 }
 0x156   : > { %v2841_v9 = vpack.c.bf16 %v1539_v5, %v1538_v3  ;;  %v3286_v12 = vpop.f32.mrb[56].mxu1  ;;  %v1416_v13 = vmul.f32 0.2, %v3222_v11  ;;  %v1071_v15 = vpop.f32.mrb[57].mxu0 }
 0x157   : > { %v3001_v10 = vpack.c.bf16 %v1603_v6, %v1602_v4  ;;  %3054 = vst [vmem:[%s3556_s24 + $0xd8] sm:$0xff] %v2846_v7   ;;  %3086 = vst [vmem:[%s3556_s24 + $0x1d8] sm:$0xff] %v3006_v8   ;;  %v1480_v14 = vmul.f32 0.2, %v3286_v12  ;;  %v1327_v16 = vpop.f32.mrb[57].mxu1  ;;  %v3223_v19 = vpop.f32.mrb[58].mxu0 }
 0x158   : > { %3053 = vst [vmem:[%s3556_s24 + $0xd0] sm:$0xff] %v2841_v9   ;;  %v1414_v17 = vmul.f32 0.2, %v1071_v15  ;;  %v1478_v18 = vmul.f32 0.2, %v1327_v16  ;;  %v3287_v20 = vpop.f32.mrb[58].mxu1  ;;  %v1544_v27 = vmax.f32 %v3222_v11, %v1416_v13 }
 0x159   : > { %3085 = vst [vmem:[%s3556_s24 + $0x1d0] sm:$0xff] %v3001_v10   ;;  %v1417_v21 = vmul.f32 0.2, %v3223_v19  ;;  %v1481_v22 = vmul.f32 0.2, %v3287_v20  ;;  %v1074_v23 = vpop.f32.mrb[59].mxu0  ;;  %v1608_v28 = vmax.f32 %v3286_v12, %v1480_v14 }
 0x15a   : > { %v1330_v24 = vpop.f32.mrb[59].mxu1  ;;  %v1415_v25 = vmul.f32 0.2, %v1074_v23  ;;  %v1542_v31 = vmax.f32 %v1071_v15, %v1414_v17  ;;  %v1606_v32 = vmax.f32 %v1327_v16, %v1478_v18 }
 0x15b   : > { %v1479_v26 = vmul.f32 0.2, %v1330_v24  ;;  %v1545_v29 = vmax.f32 %v3223_v19, %v1417_v21  ;;  %v1609_v30 = vmax.f32 %v3287_v20, %v1481_v22 }
 0x15c   : > { %v1543_v33 = vmax.f32 %v1074_v23, %v1415_v25 }
 0x15d   : > { %v1607_v34 = vmax.f32 %v1330_v24, %v1479_v26  ;;  %v2856_v35 = vpack.c.bf16 %v1545_v29, %v1544_v27  ;;  %v3016_v36 = vpack.c.bf16 %v1609_v30, %v1608_v28  ;;  %v3226_v39 = vpop.f32.mrb[60].mxu0 }
 0x15e   : > { %v2851_v37 = vpack.c.bf16 %v1543_v33, %v1542_v31  ;;  %v3290_v40 = vpop.f32.mrb[60].mxu1  ;;  %v1420_v41 = vmul.f32 0.2, %v3226_v39  ;;  %v1087_v43 = vpop.f32.mrb[61].mxu0 }
 0x15f   : > { %v3011_v38 = vpack.c.bf16 %v1607_v34, %v1606_v32  ;;  %3056 = vst [vmem:[%s3556_s24 + $0xe8] sm:$0xff] %v2856_v35   ;;  %3088 = vst [vmem:[%s3556_s24 + $0x1e8] sm:$0xff] %v3016_v36   ;;  %v1484_v42 = vmul.f32 0.2, %v3290_v40  ;;  %v1343_v44 = vpop.f32.mrb[61].mxu1  ;;  %v3227_v47 = vpop.f32.mrb[62].mxu0 }
 0x160   : > { %3055 = vst [vmem:[%s3556_s24 + $0xe0] sm:$0xff] %v2851_v37   ;;  %v1418_v45 = vmul.f32 0.2, %v1087_v43  ;;  %v1482_v46 = vmul.f32 0.2, %v1343_v44  ;;  %v3291_v48 = vpop.f32.mrb[62].mxu1  ;;  %v1548_v55 = vmax.f32 %v3226_v39, %v1420_v41 }
 0x161   : > { %3087 = vst [vmem:[%s3556_s24 + $0x1e0] sm:$0xff] %v3011_v38   ;;  %v1421_v49 = vmul.f32 0.2, %v3227_v47  ;;  %v1485_v50 = vmul.f32 0.2, %v3291_v48  ;;  %v1090_v51 = vpop.f32.mrb[63].mxu0  ;;  %v1612_v56 = vmax.f32 %v3290_v40, %v1484_v42 }
 0x162   : > { %v1346_v52 = vpop.f32.mrb[63].mxu1  ;;  %v1419_v53 = vmul.f32 0.2, %v1090_v51  ;;  %v1546_v59 = vmax.f32 %v1087_v43, %v1418_v45  ;;  %v1610_v60 = vmax.f32 %v1343_v44, %v1482_v46 }
 0x163   : > { %v1483_v54 = vmul.f32 0.2, %v1346_v52  ;;  %v1549_v57 = vmax.f32 %v3227_v47, %v1421_v49  ;;  %v1613_v58 = vmax.f32 %v3291_v48, %v1485_v50 }
 0x164   : > { %v1547_v61 = vmax.f32 %v1090_v51, %v1419_v53 }
 0x165   : > { %v1611_v62 = vmax.f32 %v1346_v52, %v1483_v54  ;;  %v2866_v63 = vpack.c.bf16 %v1549_v57, %v1548_v55  ;;  %v3026_v0 = vpack.c.bf16 %v1613_v58, %v1612_v56 }
 0x166   : > { %v2861_v1 = vpack.c.bf16 %v1547_v61, %v1546_v59 }
 0x167   : > { %v3021_v2 = vpack.c.bf16 %v1611_v62, %v1610_v60  ;;  %3058 = vst [vmem:[%s3556_s24 + $0xf8] sm:$0xff] %v2866_v63   ;;  %3090 = vst [vmem:[%s3556_s24 + $0x1f8] sm:$0xff] %v3026_v0  }
 0x168   : > { %3057 = vst [vmem:[%s3556_s24 + $0xf0] sm:$0xff] %v2861_v1  }
 0x169   : > { %3089 = vst [vmem:[%s3556_s24 + $0x1f0] sm:$0xff] %v3021_v2  }
 0x16a PF: > { %s12_s9 = sadd.s32 1, %s3379_s9  }
 0x16b   : > { %p9_p4 = scmp.ge.s32.totalorder %s12_s9, 4  }
 0x16d   :  { %11 = sbr.rel (!%p9_p4) target bundleno = 1 (0x1), region = 58 }

// kernel: dc_discriminator_forward.9
= control target key start
LH: loop header
LB: loop body
LE: loop exit
PB: predicated region body
PF: predicated region fallthrough
CT: control target
= control target key end

     0   :  { %s2124_s1 = inlined_call_operand.vmem [shape: bf16[128,128], index: 1, kind: input, shape index: {}]   ;;  %s2125_s0 = inlined_call_operand.vmem [shape: bf16[512,128], index: 0, kind: input, shape index: {}]   ;;  %s2126_s2 = inlined_call_operand.vmem [shape: bf16[512,128], index: 2, kind: output, shape index: {0}]   ;;  %s2127_s3 = inlined_call_operand.vmem [shape: f32[1,8,128], index: 3, kind: output, shape index: {1}]  }
   0x1   :  { %v1650_v0 = vld [vmem:[%s2124_s1] sm:$0xff]   ;;  %v1651_v1 = vld [vmem:[%s2124_s1 + $0x8] sm:$0xff]   ;;  %v1652_v2 = vld [vmem:[%s2124_s1 + $0x10] sm:$0xff]  }
   0x2   :  { %1554 = vmatprep.subr.bf16.mxu0 %v1650_v0  ;;  %1634 = vmatprep.subr.bf16.mxu1 %v1650_v0  ;;  %v1653_v3 = vld [vmem:[%s2124_s1 + $0x18] sm:$0xff]   ;;  %v1658_v4 = vld [vmem:[%s2125_s0] sm:$0xff]   ;;  %v1655_v6 = vld [vmem:[%s2124_s1 + $0x28] sm:$0xff]  }
   0x3   :  { %1555 = vmatpush3.bf16.msra.mxu0 %v1650_v0  ;;  %1642 = vmatpush3.bf16.msra.mxu1 %v1650_v0  ;;  %v1654_v5 = vld [vmem:[%s2124_s1 + $0x20] sm:$0xff]   ;;  %v1656_v7 = vld [vmem:[%s2124_s1 + $0x30] sm:$0xff]   ;;  %v1657_v8 = vld [vmem:[%s2124_s1 + $0x38] sm:$0xff]  }
   0x4   :  { %1556 = vmatprep.subr.bf16.mxu0 %v1651_v1  ;;  %1635 = vmatprep.subr.bf16.mxu1 %v1651_v1  ;;  %v1674_v9 = vld [vmem:[%s2125_s0 + $0x80] sm:$0xff]   ;;  %v1659_v10 = vld [vmem:[%s2125_s0 + $0x8] sm:$0xff]   ;;  %v1660_v11 = vld [vmem:[%s2125_s0 + $0x10] sm:$0xff]  }
   0x5   :  { %1570 = vmatprep.mubr.bf16.mxu0 %v1658_v4  ;;  %1602 = vmatprep.mubr.bf16.mxu1 %v1674_v9  ;;  %v1675_v12 = vld [vmem:[%s2125_s0 + $0x88] sm:$0xff]   ;;  %v1676_v13 = vld [vmem:[%s2125_s0 + $0x90] sm:$0xff]   ;;  %v1661_v14 = vld [vmem:[%s2125_s0 + $0x18] sm:$0xff]  }
   0x6   :  { %v1662_v15 = vld [vmem:[%s2125_s0 + $0x20] sm:$0xff]   ;;  %v1677_v16 = vld [vmem:[%s2125_s0 + $0x98] sm:$0xff]   ;;  %v1663_v18 = vld [vmem:[%s2125_s0 + $0x28] sm:$0xff]  }
   0x7   :  { %1557 = vmatpush3.bf16.msra.mxu0 %v1651_v1  ;;  %1643 = vmatpush3.bf16.msra.mxu1 %v1651_v1  ;;  %v1678_v17 = vld [vmem:[%s2125_s0 + $0xa0] sm:$0xff]   ;;  %v1679_v19 = vld [vmem:[%s2125_s0 + $0xa8] sm:$0xff]   ;;  %v1664_v20 = vld [vmem:[%s2125_s0 + $0x30] sm:$0xff]  }
   0x8   :  { %1558 = vmatprep.subr.bf16.mxu0 %v1652_v2  ;;  %1636 = vmatprep.subr.bf16.mxu1 %v1652_v2  ;;  %v1680_v21 = vld [vmem:[%s2125_s0 + $0xb0] sm:$0xff]   ;;  %v1665_v22 = vld [vmem:[%s2125_s0 + $0x38] sm:$0xff]   ;;  %v1666_v24 = vld [vmem:[%s2125_s0 + $0x40] sm:$0xff]  }
   0x9   :  { %v1681_v23 = vld [vmem:[%s2125_s0 + $0xb8] sm:$0xff]   ;;  %v1682_v25 = vld [vmem:[%s2125_s0 + $0xc0] sm:$0xff]   ;;  %v1667_v26 = vld [vmem:[%s2125_s0 + $0x48] sm:$0xff]  }
   0xa   :  { %v1683_v27 = vld [vmem:[%s2125_s0 + $0xc8] sm:$0xff]   ;;  %v1668_v28 = vld [vmem:[%s2125_s0 + $0x50] sm:$0xff]   ;;  %v1669_v30 = vld [vmem:[%s2125_s0 + $0x58] sm:$0xff]  }
   0xb   :  { %1559 = vmatpush3.bf16.msra.mxu0 %v1652_v2  ;;  %1644 = vmatpush3.bf16.msra.mxu1 %v1652_v2  ;;  %v1684_v29 = vld [vmem:[%s2125_s0 + $0xd0] sm:$0xff]   ;;  %v1685_v31 = vld [vmem:[%s2125_s0 + $0xd8] sm:$0xff]   ;;  %v1670_v32 = vld [vmem:[%s2125_s0 + $0x60] sm:$0xff]  }
   0xc   :  { %1560 = vmatprep.subr.bf16.mxu0 %v1653_v3  ;;  %1637 = vmatprep.subr.bf16.mxu1 %v1653_v3  ;;  %v1686_v33 = vld [vmem:[%s2125_s0 + $0xe0] sm:$0xff]   ;;  %v1671_v34 = vld [vmem:[%s2125_s0 + $0x68] sm:$0xff]   ;;  %v1672_v36 = vld [vmem:[%s2125_s0 + $0x70] sm:$0xff]  }
   0xd   :  { %v1687_v35 = vld [vmem:[%s2125_s0 + $0xe8] sm:$0xff]   ;;  %v1688_v37 = vld [vmem:[%s2125_s0 + $0xf0] sm:$0xff]   ;;  %v1673_v38 = vld [vmem:[%s2125_s0 + $0x78] sm:$0xff]  }
   0xe   :  { %v1689_v39 = vld [vmem:[%s2125_s0 + $0xf8] sm:$0xff]  }
   0xf   :  { %1561 = vmatpush3.bf16.msra.mxu0 %v1653_v3  ;;  %1645 = vmatpush3.bf16.msra.mxu1 %v1653_v3 }
  0x10   :  { %1562 = vmatprep.subr.bf16.mxu0 %v1654_v5  ;;  %1638 = vmatprep.subr.bf16.mxu1 %v1654_v5 }
  0x13   :  { %1563 = vmatpush3.bf16.msra.mxu0 %v1654_v5  ;;  %1646 = vmatpush3.bf16.msra.mxu1 %v1654_v5 }
  0x14   :  { %1564 = vmatprep.subr.bf16.mxu0 %v1655_v6  ;;  %1639 = vmatprep.subr.bf16.mxu1 %v1655_v6 }
  0x17   :  { %1565 = vmatpush3.bf16.msra.mxu0 %v1655_v6  ;;  %1647 = vmatpush3.bf16.msra.mxu1 %v1655_v6 }
  0x18   :  { %1566 = vmatprep.subr.bf16.mxu0 %v1656_v7  ;;  %1640 = vmatprep.subr.bf16.mxu1 %v1656_v7 }
  0x1b   :  { %1567 = vmatpush3.bf16.msra.mxu0 %v1656_v7  ;;  %1648 = vmatpush3.bf16.msra.mxu1 %v1656_v7 }
  0x1c   :  { %1568 = vmatprep.subr.bf16.mxu0 %v1657_v8  ;;  %1641 = vmatprep.subr.bf16.mxu1 %v1657_v8 }
  0x1f   :  { %1569 = vmatpush3.bf16.msra.mxu0 %v1657_v8  ;;  %1649 = vmatpush3.bf16.msra.mxu1 %v1657_v8 }
  0x22   :  { %1571 = vmatmul.mubr.bf16.vlgmr.msra.gmra.mrb[0].mxu0 %v1659_v10  ;;  %1603 = vmatmul.mubr.bf16.vlgmr.msra.gmra.mrb[0].mxu1 %v1675_v12 }
  0x23   :  { %1574 = vmatprep.mubr.bf16.mxu0 %v1660_v11  ;;  %1606 = vmatprep.mubr.bf16.mxu1 %v1676_v13 }
  0x2a   :  { %1575 = vmatmul.mubr.bf16.gmra.mrb[4].mxu0 %v1661_v14  ;;  %1607 = vmatmul.mubr.bf16.gmra.mrb[4].mxu1 %v1677_v16 }
  0x2b   :  { %1578 = vmatprep.mubr.bf16.mxu0 %v1662_v15  ;;  %1610 = vmatprep.mubr.bf16.mxu1 %v1678_v17 }
  0x32   :  { %1579 = vmatmul.mubr.bf16.gmra.mrb[8].mxu0 %v1663_v18  ;;  %1611 = vmatmul.mubr.bf16.gmra.mrb[8].mxu1 %v1679_v19 }
  0x33   :  { %1582 = vmatprep.mubr.bf16.mxu0 %v1664_v20  ;;  %1614 = vmatprep.mubr.bf16.mxu1 %v1680_v21 }
  0x3a   :  { %1583 = vmatmul.mubr.bf16.gmra.mrb[12].mxu0 %v1665_v22  ;;  %1615 = vmatmul.mubr.bf16.gmra.mrb[12].mxu1 %v1681_v23 }
  0x3b   :  { %1586 = vmatprep.mubr.bf16.mxu0 %v1666_v24  ;;  %1618 = vmatprep.mubr.bf16.mxu1 %v1682_v25 }
  0x42   :  { %1587 = vmatmul.mubr.bf16.gmra.mrb[16].mxu0 %v1667_v26  ;;  %1619 = vmatmul.mubr.bf16.gmra.mrb[16].mxu1 %v1683_v27 }
  0x43   :  { %1590 = vmatprep.mubr.bf16.mxu0 %v1668_v28  ;;  %1622 = vmatprep.mubr.bf16.mxu1 %v1684_v29 }
  0x4a   :  { %1591 = vmatmul.mubr.bf16.gmra.mrb[20].mxu0 %v1669_v30  ;;  %1623 = vmatmul.mubr.bf16.gmra.mrb[20].mxu1 %v1685_v31 }
  0x4b   :  { %1594 = vmatprep.mubr.bf16.mxu0 %v1670_v32  ;;  %1626 = vmatprep.mubr.bf16.mxu1 %v1686_v33 }
  0x52   :  { %1595 = vmatmul.mubr.bf16.gmra.mrb[24].mxu0 %v1671_v34  ;;  %1627 = vmatmul.mubr.bf16.gmra.mrb[24].mxu1 %v1687_v35 }
  0x53   :  { %1598 = vmatprep.mubr.bf16.mxu0 %v1672_v36  ;;  %1630 = vmatprep.mubr.bf16.mxu1 %v1688_v37 }
  0x5a   :  { %1599 = vmatmul.mubr.bf16.gmra.mrb[28].mxu0 %v1673_v38  ;;  %1631 = vmatmul.mubr.bf16.gmra.mrb[28].mxu1 %v1689_v39 }
  0xf5   :  { %v1572_v40 = vpop.f32.mrb[0].mxu0  ;;  %v1830_v41 = vpop.f32.mrb[0].mxu1 }
  0xf6   :  { %v368_v42 = vpop.f32.mrb[1].mxu0  ;;  %v1832_v43 = vpop.f32.mrb[1].mxu1  ;;  %v1015_v55 = vmul.f32 %v1572_v40, %v1572_v40 }
  0xf7   :  { %v1573_v44 = vpop.f32.mrb[2].mxu0  ;;  %v1834_v45 = vpop.f32.mrb[2].mxu1  ;;  %v1013_v46 = vmul.f32 %v368_v42, %v368_v42 }
  0xf8   :  { %v1331_v47 = vpack.c.bf16 %v1573_v44, %v1572_v40  ;;  %v371_v48 = vpop.f32.mrb[3].mxu0  ;;  %v1411_v49 = vpack.c.bf16 %v1834_v45, %v1830_v41  ;;  %v1838_v50 = vpop.f32.mrb[3].mxu1  ;;  %v1016_v58 = vmul.f32 %v1573_v44, %v1573_v44 }
  0xf9   :  { %v1326_v51 = vpack.c.bf16 %v371_v48, %v368_v42  ;;  %v943_v52 = vadd.f32 %v371_v48, %v368_v42  ;;  %v1014_v53 = vmul.f32 %v371_v48, %v371_v48  ;;  %v1406_v54 = vpack.c.bf16 %v1838_v50, %v1832_v43 }
  0xfa   :  { %1483 = vst [vmem:[%s2126_s2 + $0x8] sm:$0xff] %v1331_v47   ;;  %1499 = vst [vmem:[%s2126_s2 + $0x88] sm:$0xff] %v1411_v49  }
  0xfb   :  { %1327 = vst [vmem:[%s2126_s2] sm:$0xff] %v1326_v51   ;;  %v944_v56 = vadd.f32 %v1572_v40, %v943_v52  ;;  %v1077_v57 = vadd.f32 %v1014_v53, %v1013_v46  ;;  %1498 = vst [vmem:[%s2126_s2 + $0x80] sm:$0xff] %v1406_v54  }
  0xfd   :  { %v1078_v59 = vadd.f32 %v1077_v57, %v1015_v55  ;;  %v1576_v60 = vpop.f32.mrb[4].mxu0  ;;  %v945_v61 = vadd.f32 %v1573_v44, %v944_v56  ;;  %v1854_v62 = vpop.f32.mrb[4].mxu1 }
  0xfe   :  { %v384_v63 = vpop.f32.mrb[5].mxu0  ;;  %v1856_v0 = vpop.f32.mrb[5].mxu1  ;;  %v1019_v15 = vmul.f32 %v1576_v60, %v1576_v60 }
  0xff   :  { %v946_v1 = vadd.f32 %v945_v61, %v384_v63  ;;  %v1017_v2 = vmul.f32 %v384_v63, %v384_v63  ;;  %v1079_v3 = vadd.f32 %v1078_v59, %v1016_v58  ;;  %v1577_v4 = vpop.f32.mrb[6].mxu0  ;;  %v1858_v5 = vpop.f32.mrb[6].mxu1 }
 0x100   :  { %v1341_v6 = vpack.c.bf16 %v1577_v4, %v1576_v60  ;;  %v387_v7 = vpop.f32.mrb[7].mxu0  ;;  %v1421_v8 = vpack.c.bf16 %v1858_v5, %v1854_v62  ;;  %v1862_v9 = vpop.f32.mrb[7].mxu1  ;;  %v1020_v18 = vmul.f32 %v1577_v4, %v1577_v4 }
 0x101   :  { %v1080_v10 = vadd.f32 %v1079_v3, %v1017_v2  ;;  %v1336_v11 = vpack.c.bf16 %v387_v7, %v384_v63  ;;  %v947_v12 = vadd.f32 %v946_v1, %v387_v7  ;;  %v1018_v13 = vmul.f32 %v387_v7, %v387_v7 }
 0x102   :  { %1485 = vst [vmem:[%s2126_s2 + $0x18] sm:$0xff] %v1341_v6   ;;  %1501 = vst [vmem:[%s2126_s2 + $0x98] sm:$0xff] %v1421_v8   ;;  %v1416_v14 = vpack.c.bf16 %v1862_v9, %v1856_v0 }
 0x103   :  { %1484 = vst [vmem:[%s2126_s2 + $0x10] sm:$0xff] %v1336_v11   ;;  %v948_v16 = vadd.f32 %v1576_v60, %v947_v12  ;;  %v1081_v17 = vadd.f32 %v1080_v10, %v1018_v13 }
 0x104   :  { %1500 = vst [vmem:[%s2126_s2 + $0x90] sm:$0xff] %v1416_v14  }
 0x105   :  { %v1082_v19 = vadd.f32 %v1081_v17, %v1019_v15  ;;  %v1580_v20 = vpop.f32.mrb[8].mxu0  ;;  %v949_v21 = vadd.f32 %v1577_v4, %v948_v16  ;;  %v1878_v22 = vpop.f32.mrb[8].mxu1 }
 0x106   :  { %v400_v23 = vpop.f32.mrb[9].mxu0  ;;  %v1880_v24 = vpop.f32.mrb[9].mxu1  ;;  %v1023_v39 = vmul.f32 %v1580_v20, %v1580_v20 }
 0x107   :  { %v950_v25 = vadd.f32 %v949_v21, %v400_v23  ;;  %v1021_v26 = vmul.f32 %v400_v23, %v400_v23  ;;  %v1083_v27 = vadd.f32 %v1082_v19, %v1020_v18  ;;  %v1581_v28 = vpop.f32.mrb[10].mxu0  ;;  %v1882_v29 = vpop.f32.mrb[10].mxu1 }
 0x108   :  { %v1351_v30 = vpack.c.bf16 %v1581_v28, %v1580_v20  ;;  %v403_v31 = vpop.f32.mrb[11].mxu0  ;;  %v1431_v32 = vpack.c.bf16 %v1882_v29, %v1878_v22  ;;  %v1886_v33 = vpop.f32.mrb[11].mxu1  ;;  %v1024_v44 = vmul.f32 %v1581_v28, %v1581_v28 }
 0x109   :  { %v1084_v34 = vadd.f32 %v1083_v27, %v1021_v26  ;;  %v1346_v35 = vpack.c.bf16 %v403_v31, %v400_v23  ;;  %v951_v36 = vadd.f32 %v950_v25, %v403_v31  ;;  %v1022_v37 = vmul.f32 %v403_v31, %v403_v31 }
 0x10a   :  { %1487 = vst [vmem:[%s2126_s2 + $0x28] sm:$0xff] %v1351_v30   ;;  %1503 = vst [vmem:[%s2126_s2 + $0xa8] sm:$0xff] %v1431_v32   ;;  %v1426_v38 = vpack.c.bf16 %v1886_v33, %v1880_v24 }
 0x10b   :  { %1486 = vst [vmem:[%s2126_s2 + $0x20] sm:$0xff] %v1346_v35   ;;  %v952_v40 = vadd.f32 %v1580_v20, %v951_v36  ;;  %v1085_v42 = vadd.f32 %v1084_v34, %v1022_v37 }
 0x10c   :  { %1502 = vst [vmem:[%s2126_s2 + $0xa0] sm:$0xff] %v1426_v38  }
 0x10d   :  { %v1086_v46 = vadd.f32 %v1085_v42, %v1023_v39  ;;  %v1584_v47 = vpop.f32.mrb[12].mxu0  ;;  %v953_v48 = vadd.f32 %v1581_v28, %v952_v40  ;;  %v1902_v49 = vpop.f32.mrb[12].mxu1 }
 0x10e   :  { %v416_v51 = vpop.f32.mrb[13].mxu0  ;;  %v1904_v52 = vpop.f32.mrb[13].mxu1  ;;  %v1027_v6 = vmul.f32 %v1584_v47, %v1584_v47 }
 0x10f   :  { %v954_v53 = vadd.f32 %v953_v48, %v416_v51  ;;  %v1025_v54 = vmul.f32 %v416_v51, %v416_v51  ;;  %v1087_v55 = vadd.f32 %v1086_v46, %v1024_v44  ;;  %v1585_v56 = vpop.f32.mrb[14].mxu0  ;;  %v1906_v57 = vpop.f32.mrb[14].mxu1 }
 0x110   :  { %v1361_v58 = vpack.c.bf16 %v1585_v56, %v1584_v47  ;;  %v419_v59 = vpop.f32.mrb[15].mxu0  ;;  %v1441_v60 = vpack.c.bf16 %v1906_v57, %v1902_v49  ;;  %v1910_v61 = vpop.f32.mrb[15].mxu1  ;;  %v1028_v10 = vmul.f32 %v1585_v56, %v1585_v56 }
 0x111   :  { %v1088_v63 = vadd.f32 %v1087_v55, %v1025_v54  ;;  %v1356_v1 = vpack.c.bf16 %v419_v59, %v416_v51  ;;  %v955_v2 = vadd.f32 %v954_v53, %v419_v59  ;;  %v1026_v3 = vmul.f32 %v419_v59, %v419_v59 }
 0x112   :  { %1489 = vst [vmem:[%s2126_s2 + $0x38] sm:$0xff] %v1361_v58   ;;  %1505 = vst [vmem:[%s2126_s2 + $0xb8] sm:$0xff] %v1441_v60   ;;  %v1436_v4 = vpack.c.bf16 %v1910_v61, %v1904_v52 }
 0x113   :  { %1488 = vst [vmem:[%s2126_s2 + $0x30] sm:$0xff] %v1356_v1   ;;  %v956_v7 = vadd.f32 %v1584_v47, %v955_v2  ;;  %v1089_v8 = vadd.f32 %v1088_v63, %v1026_v3 }
 0x114   :  { %1504 = vst [vmem:[%s2126_s2 + $0xb0] sm:$0xff] %v1436_v4  }
 0x115   :  { %v1090_v11 = vadd.f32 %v1089_v8, %v1027_v6  ;;  %v1588_v12 = vpop.f32.mrb[16].mxu0  ;;  %v957_v13 = vadd.f32 %v1585_v56, %v956_v7  ;;  %v1926_v14 = vpop.f32.mrb[16].mxu1 }
 0x116   :  { %v432_v15 = vpop.f32.mrb[17].mxu0  ;;  %v1928_v16 = vpop.f32.mrb[17].mxu1  ;;  %v1031_v35 = vmul.f32 %v1588_v12, %v1588_v12 }
 0x117   :  { %v958_v17 = vadd.f32 %v957_v13, %v432_v15  ;;  %v1029_v18 = vmul.f32 %v432_v15, %v432_v15  ;;  %v1091_v19 = vadd.f32 %v1090_v11, %v1028_v10  ;;  %v1589_v20 = vpop.f32.mrb[18].mxu0  ;;  %v1930_v21 = vpop.f32.mrb[18].mxu1 }
 0x118   :  { %v1371_v23 = vpack.c.bf16 %v1589_v20, %v1588_v12  ;;  %v435_v25 = vpop.f32.mrb[19].mxu0  ;;  %v1451_v26 = vpack.c.bf16 %v1930_v21, %v1926_v14  ;;  %v1934_v27 = vpop.f32.mrb[19].mxu1  ;;  %v1032_v38 = vmul.f32 %v1589_v20, %v1589_v20 }
 0x119   :  { %v1092_v28 = vadd.f32 %v1091_v19, %v1029_v18  ;;  %v1366_v30 = vpack.c.bf16 %v435_v25, %v432_v15  ;;  %v959_v31 = vadd.f32 %v958_v17, %v435_v25  ;;  %v1030_v32 = vmul.f32 %v435_v25, %v435_v25 }
 0x11a   :  { %1491 = vst [vmem:[%s2126_s2 + $0x48] sm:$0xff] %v1371_v23   ;;  %1507 = vst [vmem:[%s2126_s2 + $0xc8] sm:$0xff] %v1451_v26   ;;  %v1446_v34 = vpack.c.bf16 %v1934_v27, %v1928_v16 }
 0x11b   :  { %1490 = vst [vmem:[%s2126_s2 + $0x40] sm:$0xff] %v1366_v30   ;;  %v960_v36 = vadd.f32 %v1588_v12, %v959_v31  ;;  %v1093_v37 = vadd.f32 %v1092_v28, %v1030_v32 }
 0x11c   :  { %1506 = vst [vmem:[%s2126_s2 + $0xc0] sm:$0xff] %v1446_v34  }
 0x11d   :  { %v1094_v39 = vadd.f32 %v1093_v37, %v1031_v35  ;;  %v1592_v40 = vpop.f32.mrb[20].mxu0  ;;  %v961_v42 = vadd.f32 %v1589_v20, %v960_v36  ;;  %v1950_v44 = vpop.f32.mrb[20].mxu1 }
 0x11e   :  { %v448_v46 = vpop.f32.mrb[21].mxu0  ;;  %v1952_v47 = vpop.f32.mrb[21].mxu1  ;;  %v1035_v6 = vmul.f32 %v1592_v40, %v1592_v40 }
 0x11f   :  { %v962_v48 = vadd.f32 %v961_v42, %v448_v46  ;;  %v1033_v51 = vmul.f32 %v448_v46, %v448_v46  ;;  %v1095_v53 = vadd.f32 %v1094_v39, %v1032_v38  ;;  %v1593_v54 = vpop.f32.mrb[22].mxu0  ;;  %v1954_v55 = vpop.f32.mrb[22].mxu1 }
 0x120   :  { %v1381_v56 = vpack.c.bf16 %v1593_v54, %v1592_v40  ;;  %v451_v58 = vpop.f32.mrb[23].mxu0  ;;  %v1461_v59 = vpack.c.bf16 %v1954_v55, %v1950_v44  ;;  %v1958_v60 = vpop.f32.mrb[23].mxu1  ;;  %v1036_v10 = vmul.f32 %v1593_v54, %v1593_v54 }
 0x121   :  { %v1096_v63 = vadd.f32 %v1095_v53, %v1033_v51  ;;  %v1376_v1 = vpack.c.bf16 %v451_v58, %v448_v46  ;;  %v963_v2 = vadd.f32 %v962_v48, %v451_v58  ;;  %v1034_v3 = vmul.f32 %v451_v58, %v451_v58 }
 0x122   :  { %1493 = vst [vmem:[%s2126_s2 + $0x58] sm:$0xff] %v1381_v56   ;;  %1509 = vst [vmem:[%s2126_s2 + $0xd8] sm:$0xff] %v1461_v59   ;;  %v1456_v4 = vpack.c.bf16 %v1958_v60, %v1952_v47 }
 0x123   :  { %1492 = vst [vmem:[%s2126_s2 + $0x50] sm:$0xff] %v1376_v1   ;;  %v964_v7 = vadd.f32 %v1592_v40, %v963_v2  ;;  %v1097_v8 = vadd.f32 %v1096_v63, %v1034_v3 }
 0x124   :  { %1508 = vst [vmem:[%s2126_s2 + $0xd0] sm:$0xff] %v1456_v4  }
 0x125   :  { %v1098_v11 = vadd.f32 %v1097_v8, %v1035_v6  ;;  %v1596_v12 = vpop.f32.mrb[24].mxu0  ;;  %v965_v13 = vadd.f32 %v1593_v54, %v964_v7  ;;  %v1974_v15 = vpop.f32.mrb[24].mxu1 }
 0x126   :  { %v464_v17 = vpop.f32.mrb[25].mxu0  ;;  %v1976_v18 = vpop.f32.mrb[25].mxu1  ;;  %v1039_v39 = vmul.f32 %v1596_v12, %v1596_v12 }
 0x127   :  { %v966_v19 = vadd.f32 %v965_v13, %v464_v17  ;;  %v1037_v20 = vmul.f32 %v464_v17, %v464_v17  ;;  %v1099_v23 = vadd.f32 %v1098_v11, %v1036_v10  ;;  %v1597_v25 = vpop.f32.mrb[26].mxu0  ;;  %v1978_v26 = vpop.f32.mrb[26].mxu1 }
 0x128   :  { %v1391_v28 = vpack.c.bf16 %v1597_v25, %v1596_v12  ;;  %v467_v30 = vpop.f32.mrb[27].mxu0  ;;  %v1471_v31 = vpack.c.bf16 %v1978_v26, %v1974_v15  ;;  %v1982_v32 = vpop.f32.mrb[27].mxu1  ;;  %v1040_v46 = vmul.f32 %v1597_v25, %v1597_v25 }
 0x129   :  { %v1100_v34 = vadd.f32 %v1099_v23, %v1037_v20  ;;  %v1386_v35 = vpack.c.bf16 %v467_v30, %v464_v17  ;;  %v967_v36 = vadd.f32 %v966_v19, %v467_v30  ;;  %v1038_v37 = vmul.f32 %v467_v30, %v467_v30 }
 0x12a   :  { %1495 = vst [vmem:[%s2126_s2 + $0x68] sm:$0xff] %v1391_v28   ;;  %1511 = vst [vmem:[%s2126_s2 + $0xe8] sm:$0xff] %v1471_v31   ;;  %v1466_v38 = vpack.c.bf16 %v1982_v32, %v1976_v18  ;;  %v1045_v31 = vmul.f32 %v1832_v43, %v1832_v43 }
 0x12b   :  { %1494 = vst [vmem:[%s2126_s2 + $0x60] sm:$0xff] %v1386_v35   ;;  %v968_v40 = vadd.f32 %v1596_v12, %v967_v36  ;;  %v1101_v42 = vadd.f32 %v1100_v34, %v1038_v37 }
 0x12c   :  { %1510 = vst [vmem:[%s2126_s2 + $0xe0] sm:$0xff] %v1466_v38   ;;  %v1046_v38 = vmul.f32 %v1838_v50, %v1838_v50 }
 0x12d   :  { %v1102_v48 = vadd.f32 %v1101_v42, %v1039_v39  ;;  %v1600_v51 = vpop.f32.mrb[28].mxu0  ;;  %v969_v53 = vadd.f32 %v1597_v25, %v968_v40  ;;  %v1998_v54 = vpop.f32.mrb[28].mxu1  ;;  %v1047_v39 = vmul.f32 %v1830_v41, %v1830_v41 }
 0x12e   :  { %v480_v56 = vpop.f32.mrb[29].mxu0  ;;  %v2000_v58 = vpop.f32.mrb[29].mxu1  ;;  %v1043_v19 = vmul.f32 %v1600_v51, %v1600_v51 }
 0x12f   :  { %v970_v59 = vadd.f32 %v969_v53, %v480_v56  ;;  %v1041_v63 = vmul.f32 %v480_v56, %v480_v56  ;;  %v1103_v1 = vadd.f32 %v1102_v48, %v1040_v46  ;;  %v1601_v2 = vpop.f32.mrb[30].mxu0  ;;  %v2002_v3 = vpop.f32.mrb[30].mxu1  ;;  %v1048_v46 = vmul.f32 %v1834_v45, %v1834_v45 }
 0x130   :  { %v1401_v4 = vpack.c.bf16 %v1601_v2, %v1600_v51  ;;  %v483_v6 = vpop.f32.mrb[31].mxu0  ;;  %v1481_v7 = vpack.c.bf16 %v2002_v3, %v1998_v54  ;;  %v2006_v8 = vpop.f32.mrb[31].mxu1  ;;  %v1044_v25 = vmul.f32 %v1601_v2, %v1601_v2 }
 0x131   :  { %v1104_v10 = vadd.f32 %v1103_v1, %v1041_v63  ;;  %v1396_v11 = vpack.c.bf16 %v483_v6, %v480_v56  ;;  %v971_v12 = vadd.f32 %v970_v59, %v483_v6  ;;  %v1042_v13 = vmul.f32 %v483_v6, %v483_v6 }
 0x132   :  { %1497 = vst [vmem:[%s2126_s2 + $0x78] sm:$0xff] %v1401_v4   ;;  %1513 = vst [vmem:[%s2126_s2 + $0xf8] sm:$0xff] %v1481_v7   ;;  %v1476_v17 = vpack.c.bf16 %v2006_v8, %v2000_v58  ;;  %v1050_v63 = vmul.f32 %v1862_v9, %v1862_v9 }
 0x133   :  { %1496 = vst [vmem:[%s2126_s2 + $0x70] sm:$0xff] %v1396_v11   ;;  %v972_v20 = vadd.f32 %v1600_v51, %v971_v12  ;;  %v1105_v23 = vadd.f32 %v1104_v10, %v1042_v13  ;;  %v1054_v12 = vmul.f32 %v1886_v33, %v1886_v33 }
 0x134   :  { %1512 = vst [vmem:[%s2126_s2 + $0xf0] sm:$0xff] %v1476_v17  }
 0x135   :  { %v1106_v28 = vadd.f32 %v1105_v23, %v1043_v19  ;;  %v973_v30 = vadd.f32 %v1601_v2, %v972_v20 }
 0x137   :  { %v974_v34 = vadd.f32 %v973_v30, %v1832_v43  ;;  %v1107_v35 = vadd.f32 %v1106_v28, %v1044_v25  ;;  %v1049_v43 = vmul.f32 %v1856_v0, %v1856_v0  ;;  %v1058_v30 = vmul.f32 %v1910_v61, %v1910_v61 }
 0x139   :  { %v1108_v36 = vadd.f32 %v1107_v35, %v1045_v31  ;;  %v975_v37 = vadd.f32 %v974_v34, %v1838_v50 }
 0x13b   :  { %v976_v40 = vadd.f32 %v1830_v41, %v975_v37  ;;  %v1109_v42 = vadd.f32 %v1108_v36, %v1046_v38  ;;  %v1051_v41 = vmul.f32 %v1854_v62, %v1854_v62 }
 0x13d   :  { %v1110_v48 = vadd.f32 %v1109_v42, %v1047_v39  ;;  %v977_v51 = vadd.f32 %v1834_v45, %v976_v40  ;;  %v1052_v45 = vmul.f32 %v1858_v5, %v1858_v5  ;;  %v1062_v40 = vmul.f32 %v1934_v27, %v1934_v27 }
 0x13f   :  { %v978_v53 = vadd.f32 %v977_v51, %v1856_v0  ;;  %v1111_v56 = vadd.f32 %v1110_v48, %v1048_v46  ;;  %v1053_v0 = vmul.f32 %v1880_v24, %v1880_v24 }
 0x141   :  { %v1112_v59 = vadd.f32 %v1111_v56, %v1049_v43  ;;  %v979_v50 = vadd.f32 %v978_v53, %v1862_v9 }
 0x143   :  { %v980_v1 = vadd.f32 %v1854_v62, %v979_v50  ;;  %v1113_v2 = vadd.f32 %v1112_v59, %v1050_v63  ;;  %v1055_v62 = vmul.f32 %v1878_v22, %v1878_v22  ;;  %v1066_v59 = vmul.f32 %v1958_v60, %v1958_v60 }
 0x145   :  { %v1114_v4 = vadd.f32 %v1113_v2, %v1051_v41  ;;  %v981_v6 = vadd.f32 %v1858_v5, %v980_v1  ;;  %v1056_v5 = vmul.f32 %v1882_v29, %v1882_v29 }
 0x147   :  { %v982_v7 = vadd.f32 %v981_v6, %v1880_v24  ;;  %v1115_v10 = vadd.f32 %v1114_v4, %v1052_v45  ;;  %v1057_v24 = vmul.f32 %v1904_v52, %v1904_v52  ;;  %v1070_v6 = vmul.f32 %v1982_v32, %v1982_v32 }
 0x149   :  { %v1116_v11 = vadd.f32 %v1115_v10, %v1053_v0  ;;  %v983_v9 = vadd.f32 %v982_v7, %v1886_v33 }
 0x14b   :  { %v984_v13 = vadd.f32 %v1878_v22, %v983_v9  ;;  %v1117_v17 = vadd.f32 %v1116_v11, %v1054_v12  ;;  %v1059_v22 = vmul.f32 %v1902_v49, %v1902_v49 }
 0x14d   :  { %v1118_v19 = vadd.f32 %v1117_v17, %v1055_v62  ;;  %v985_v20 = vadd.f32 %v1882_v29, %v984_v13  ;;  %v1060_v29 = vmul.f32 %v1906_v57, %v1906_v57  ;;  %v1074_v13 = vmul.f32 %v2006_v8, %v2006_v8 }
 0x14f   :  { %v986_v23 = vadd.f32 %v985_v20, %v1904_v52  ;;  %v1119_v25 = vadd.f32 %v1118_v19, %v1056_v5  ;;  %v1061_v52 = vmul.f32 %v1928_v16, %v1928_v16 }
 0x151   :  { %v1120_v28 = vadd.f32 %v1119_v25, %v1057_v24  ;;  %v987_v33 = vadd.f32 %v986_v23, %v1910_v61 }
 0x153   :  { %v988_v31 = vadd.f32 %v1902_v49, %v987_v33  ;;  %v1121_v34 = vadd.f32 %v1120_v28, %v1058_v30  ;;  %v1063_v49 = vmul.f32 %v1926_v14, %v1926_v14 }
 0x155   :  { %v1122_v35 = vadd.f32 %v1121_v34, %v1059_v22  ;;  %v989_v36 = vadd.f32 %v1906_v57, %v988_v31  ;;  %v1064_v57 = vmul.f32 %v1930_v21, %v1930_v21 }
 0x157   :  { %v990_v37 = vadd.f32 %v989_v36, %v1928_v16  ;;  %v1123_v38 = vadd.f32 %v1122_v35, %v1060_v29  ;;  %v1065_v16 = vmul.f32 %v1952_v47, %v1952_v47 }
 0x159   :  { %v1124_v39 = vadd.f32 %v1123_v38, %v1061_v52  ;;  %v991_v61 = vadd.f32 %v990_v37, %v1934_v27 }
 0x15b   :  { %v992_v42 = vadd.f32 %v1926_v14, %v991_v61  ;;  %v1125_v46 = vadd.f32 %v1124_v39, %v1062_v40  ;;  %v1067_v14 = vmul.f32 %v1950_v44, %v1950_v44 }
 0x15d   :  { %v1126_v48 = vadd.f32 %v1125_v46, %v1063_v49  ;;  %v993_v51 = vadd.f32 %v1930_v21, %v992_v42  ;;  %v1068_v21 = vmul.f32 %v1954_v55, %v1954_v55 }
 0x15f   :  { %v994_v43 = vadd.f32 %v993_v51, %v1952_v47  ;;  %v1127_v53 = vadd.f32 %v1126_v48, %v1064_v57  ;;  %v1069_v47 = vmul.f32 %v1976_v18, %v1976_v18 }
 0x161   :  { %v1128_v56 = vadd.f32 %v1127_v53, %v1065_v16  ;;  %v995_v27 = vadd.f32 %v994_v43, %v1958_v60 }
 0x163   :  { %v996_v50 = vadd.f32 %v1950_v44, %v995_v27  ;;  %v1129_v63 = vadd.f32 %v1128_v56, %v1066_v59  ;;  %v1071_v44 = vmul.f32 %v1974_v15, %v1974_v15 }
 0x165   :  { %v1130_v41 = vadd.f32 %v1129_v63, %v1067_v14  ;;  %v997_v1 = vadd.f32 %v1954_v55, %v996_v50  ;;  %v1072_v55 = vmul.f32 %v1978_v26, %v1978_v26 }
 0x167   :  { %v998_v2 = vadd.f32 %v997_v1, %v1976_v18  ;;  %v1131_v45 = vadd.f32 %v1130_v41, %v1068_v21  ;;  %v1073_v18 = vmul.f32 %v2000_v58, %v2000_v58 }
 0x169   :  { %v1132_v4 = vadd.f32 %v1131_v45, %v1069_v47  ;;  %v999_v60 = vadd.f32 %v998_v2, %v1982_v32 }
 0x16b   :  { %v1000_v0 = vadd.f32 %v1974_v15, %v999_v60  ;;  %v1133_v7 = vadd.f32 %v1132_v4, %v1070_v6  ;;  %v1075_v15 = vmul.f32 %v1998_v54, %v1998_v54 }
 0x16d   :  { %v1134_v10 = vadd.f32 %v1133_v7, %v1071_v44  ;;  %v1001_v11 = vadd.f32 %v1978_v26, %v1000_v0  ;;  %v1076_v26 = vmul.f32 %v2002_v3, %v2002_v3 }
 0x16f   :  { %v1002_v9 = vadd.f32 %v1001_v11, %v2000_v58  ;;  %v1135_v12 = vadd.f32 %v1134_v10, %v1072_v55 }
 0x171   :  { %v1136_v62 = vadd.f32 %v1135_v12, %v1073_v18  ;;  %v1003_v32 = vadd.f32 %v1002_v9, %v2006_v8 }
 0x173   :  { %v1004_v17 = vadd.f32 %v1998_v54, %v1003_v32  ;;  %v1137_v5 = vadd.f32 %v1136_v62, %v1074_v13 }
 0x175   :  { %v1005_v19 = vadd.f32 %v2002_v3, %v1004_v17  ;;  %v1138_v20 = vadd.f32 %v1137_v5, %v1075_v15 }
 0x177   :  { %v1006_v58 = vrot.slane %v1005_v19, 4  ;;  %v1139_v24 = vadd.f32 %v1138_v20, %v1076_v26 }
 0x179   :  { %v1007_v23 = vadd.f32 %v1006_v58, %v1005_v19  ;;  %v1140_v25 = vrot.slane %v1139_v24, 4 }
 0x17b   :  { %v1008_v28 = vrot.slane %v1007_v23, 2  ;;  %v1141_v33 = vadd.f32 %v1140_v25, %v1139_v24 }
 0x17d   :  { %v1009_v30 = vadd.f32 %v1008_v28, %v1007_v23  ;;  %v1142_v8 = vrot.slane %v1141_v33, 2 }
 0x17f   :  { %v1010_v22 = vrot.slane %v1009_v30, 1  ;;  %v1143_v31 = vadd.f32 %v1142_v8, %v1141_v33 }
 0x181   :  { %v1011_v34 = vadd.f32 %v1010_v22, %v1009_v30  ;;  %v1144_v29 = vrot.slane %v1143_v31, 1 }
 0x183   :  { %1012 = vst [vmem:[%s2127_s3] sm:$0x1] %v1011_v34  ;;  %v1145_v54 = vadd.f32 %v1144_v29, %v1143_v31 }
 0x185   :  { %1146 = vst [vmem:[%s2127_s3 + $0x1] sm:$0x1] %v1145_v54 }

// kernel: dc_discriminator_forward.10
= control target key start
LH: loop header
LB: loop body
LE: loop exit
PB: predicated region body
PF: predicated region fallthrough
CT: control target
= control target key end

     0   :  { %s1566_s0 = inlined_call_operand.vmem [shape: bf16[512,128], index: 0, kind: input, shape index: {}]   ;;  %s1567_s1 = inlined_call_operand.vmem [shape: f32[1,128], index: 1, kind: input, shape index: {}]   ;;  %s1568_s2 = inlined_call_operand.vmem [shape: f32[1,128], index: 2, kind: input, shape index: {}]   ;;  %s1569_s3 = inlined_call_operand.vmem [shape: bf16[512,128], index: 3, kind: output, shape index: {}]  }
   0x1   :  { %v867_v0 = vld [vmem:[%s1566_s0] sm:$0xff]   ;;  %v1154_v4 = vld [vmem:[%s1566_s0 + $0x8] sm:$0xff]   ;;  %v1155_v5 = vld [vmem:[%s1566_s0 + $0x10] sm:$0xff]  }
   0x2   :  { %v1242_v1 = vld [vmem:[%s1567_s1] ss:$0 sm:$0xff]  ;;  %v868_v2 = vunpack.c.l.bf16 %v867_v0  ;;  %v869_v3 = vunpack.c.h.bf16 %v867_v0  ;;  %v1156_v6 = vld [vmem:[%s1566_s0 + $0x18] sm:$0xff]   ;;  %v872_v8 = vunpack.c.l.bf16 %v1154_v4  ;;  %v873_v9 = vunpack.c.h.bf16 %v1154_v4  ;;  %v1158_v41 = vld [vmem:[%s1566_s0 + $0x28] sm:$0xff]  }
   0x3   :  { %v1256_v7 = vld [vmem:[%s1568_s2] ss:$0 sm:$0xff]  ;;  %v876_v10 = vunpack.c.l.bf16 %v1155_v5  ;;  %v877_v11 = vunpack.c.h.bf16 %v1155_v5  ;;  %v880_v14 = vunpack.c.l.bf16 %v1156_v6  ;;  %v881_v15 = vunpack.c.h.bf16 %v1156_v6  ;;  %v1159_v46 = vld [vmem:[%s1566_s0 + $0x30] sm:$0xff]   ;;  %v1160_v55 = vld [vmem:[%s1566_s0 + $0x38] sm:$0xff]  }
   0x4   :  { %v149_v12 = vmul.f32 %v868_v2, %v1242_v1  ;;  %v150_v13 = vmul.f32 %v869_v3, %v1242_v1  ;;  %v151_v16 = vmul.f32 %v872_v8, %v1242_v1  ;;  %v152_v17 = vmul.f32 %v873_v9, %v1242_v1  ;;  %v1157_v24 = vld [vmem:[%s1566_s0 + $0x20] sm:$0xff]  }
   0x5   :  { %v153_v18 = vmul.f32 %v876_v10, %v1242_v1  ;;  %v154_v19 = vmul.f32 %v877_v11, %v1242_v1  ;;  %v155_v22 = vmul.f32 %v880_v14, %v1242_v1  ;;  %v156_v23 = vmul.f32 %v881_v15, %v1242_v1  ;;  %v1161_v14 = vld [vmem:[%s1566_s0 + $0x40] sm:$0xff]  }
   0x6   :  { %v220_v20 = vadd.f32 %v1256_v7, %v149_v12  ;;  %v221_v21 = vadd.f32 %v1256_v7, %v150_v13  ;;  %v222_v25 = vadd.f32 %v1256_v7, %v151_v16  ;;  %v223_v26 = vadd.f32 %v1256_v7, %v152_v17 }
   0x7   :  { %v224_v27 = vadd.f32 %v1256_v7, %v153_v18  ;;  %v225_v28 = vadd.f32 %v1256_v7, %v154_v19  ;;  %v226_v31 = vadd.f32 %v1256_v7, %v155_v22  ;;  %v227_v32 = vadd.f32 %v1256_v7, %v156_v23 }
   0x8   :  { %v284_v29 = vmul.f32 0.2, %v220_v20  ;;  %v285_v30 = vmul.f32 0.2, %v221_v21  ;;  %v286_v33 = vmul.f32 0.2, %v222_v25  ;;  %v884_v36 = vunpack.c.l.bf16 %v1157_v24 }
   0x9   :  { %v287_v34 = vmul.f32 0.2, %v223_v26  ;;  %v288_v35 = vmul.f32 0.2, %v224_v27  ;;  %v289_v39 = vmul.f32 0.2, %v225_v28  ;;  %v885_v50 = vunpack.c.h.bf16 %v1157_v24 }
   0xa   :  { %v348_v37 = vmax.f32 %v220_v20, %v284_v29  ;;  %v349_v38 = vmax.f32 %v221_v21, %v285_v30  ;;  %v290_v40 = vmul.f32 0.2, %v226_v31  ;;  %v350_v42 = vmax.f32 %v222_v25, %v286_v33 }
   0xb   :  { %v351_v43 = vmax.f32 %v223_v26, %v287_v34  ;;  %v352_v44 = vmax.f32 %v224_v27, %v288_v35  ;;  %v291_v45 = vmul.f32 0.2, %v227_v32  ;;  %v353_v48 = vmax.f32 %v225_v28, %v289_v39  ;;  %v1162_v27 = vld [vmem:[%s1566_s0 + $0x48] sm:$0xff]  }
   0xc   :  { %v997_v47 = vpack.c.bf16 %v349_v38, %v348_v37  ;;  %v354_v49 = vmax.f32 %v226_v31, %v290_v40  ;;  %v157_v53 = vmul.f32 %v884_v36, %v1242_v1  ;;  %v888_v54 = vunpack.c.l.bf16 %v1158_v41  ;;  %v1163_v36 = vld [vmem:[%s1566_s0 + $0x50] sm:$0xff]  }
   0xd   :  { %v1002_v51 = vpack.c.bf16 %v351_v43, %v350_v42  ;;  %v355_v52 = vmax.f32 %v227_v32, %v291_v45  ;;  %v1007_v56 = vpack.c.bf16 %v353_v48, %v352_v44  ;;  %v158_v57 = vmul.f32 %v885_v50, %v1242_v1 }
   0xe   :  { %998 = vst [vmem:[%s1569_s3] sm:$0xff] %v997_v47   ;;  %v889_v58 = vunpack.c.h.bf16 %v1158_v41  ;;  %v892_v59 = vunpack.c.l.bf16 %v1159_v46  ;;  %v228_v61 = vadd.f32 %v1256_v7, %v157_v53  ;;  %v159_v62 = vmul.f32 %v888_v54, %v1242_v1  ;;  %v1164_v41 = vld [vmem:[%s1566_s0 + $0x58] sm:$0xff]  }
   0xf   :  { %1185 = vst [vmem:[%s1569_s3 + $0x8] sm:$0xff] %v1002_v51   ;;  %v1012_v60 = vpack.c.bf16 %v355_v52, %v354_v49  ;;  %v893_v63 = vunpack.c.h.bf16 %v1159_v46  ;;  %1186 = vst [vmem:[%s1569_s3 + $0x10] sm:$0xff] %v1007_v56   ;;  %v229_v0 = vadd.f32 %v1256_v7, %v158_v57  ;;  %v896_v4 = vunpack.c.l.bf16 %v1160_v55 }
  0x10   :  { %v160_v2 = vmul.f32 %v889_v58, %v1242_v1  ;;  %v161_v3 = vmul.f32 %v892_v59, %v1242_v1  ;;  %v292_v5 = vmul.f32 0.2, %v228_v61  ;;  %v230_v6 = vadd.f32 %v1256_v7, %v159_v62  ;;  %v1165_v58 = vld [vmem:[%s1566_s0 + $0x60] sm:$0xff]  }
  0x11   :  { %1187 = vst [vmem:[%s1569_s3 + $0x18] sm:$0xff] %v1012_v60   ;;  %v162_v8 = vmul.f32 %v893_v63, %v1242_v1  ;;  %v897_v9 = vunpack.c.h.bf16 %v1160_v55  ;;  %v293_v10 = vmul.f32 0.2, %v229_v0  ;;  %v163_v13 = vmul.f32 %v896_v4, %v1242_v1 }
  0x12   :  { %v231_v11 = vadd.f32 %v1256_v7, %v160_v2  ;;  %v232_v12 = vadd.f32 %v1256_v7, %v161_v3  ;;  %v356_v15 = vmax.f32 %v228_v61, %v292_v5  ;;  %v294_v16 = vmul.f32 0.2, %v230_v6 }
  0x13   :  { %v233_v17 = vadd.f32 %v1256_v7, %v162_v8  ;;  %v164_v18 = vmul.f32 %v897_v9, %v1242_v1  ;;  %v357_v19 = vmax.f32 %v229_v0, %v293_v10  ;;  %v234_v22 = vadd.f32 %v1256_v7, %v163_v13  ;;  %v1166_v13 = vld [vmem:[%s1566_s0 + $0x68] sm:$0xff]  }
  0x14   :  { %v295_v20 = vmul.f32 0.2, %v231_v11  ;;  %v296_v21 = vmul.f32 0.2, %v232_v12  ;;  %v358_v23 = vmax.f32 %v230_v6, %v294_v16  ;;  %v900_v26 = vunpack.c.l.bf16 %v1161_v14 }
  0x15   :  { %v297_v24 = vmul.f32 0.2, %v233_v17  ;;  %v235_v25 = vadd.f32 %v1256_v7, %v164_v18  ;;  %v1017_v28 = vpack.c.bf16 %v357_v19, %v356_v15  ;;  %v298_v31 = vmul.f32 0.2, %v234_v22  ;;  %v1167_v18 = vld [vmem:[%s1566_s0 + $0x70] sm:$0xff]  }
  0x16   :  { %v359_v29 = vmax.f32 %v231_v11, %v295_v20  ;;  %v360_v30 = vmax.f32 %v232_v12, %v296_v21  ;;  %v901_v34 = vunpack.c.h.bf16 %v1161_v14  ;;  %v165_v35 = vmul.f32 %v900_v26, %v1242_v1 }
  0x17   :  { %v361_v32 = vmax.f32 %v233_v17, %v297_v24  ;;  %v299_v33 = vmul.f32 0.2, %v235_v25  ;;  %1188 = vst [vmem:[%s1569_s3 + $0x20] sm:$0xff] %v1017_v28   ;;  %v362_v38 = vmax.f32 %v234_v22, %v298_v31  ;;  %v904_v39 = vunpack.c.l.bf16 %v1162_v27 }
  0x18   :  { %v1022_v37 = vpack.c.bf16 %v359_v29, %v358_v23  ;;  %v905_v40 = vunpack.c.h.bf16 %v1162_v27  ;;  %v166_v44 = vmul.f32 %v901_v34, %v1242_v1  ;;  %v236_v45 = vadd.f32 %v1256_v7, %v165_v35  ;;  %v1168_v27 = vld [vmem:[%s1566_s0 + $0x78] sm:$0xff]  }
  0x19   :  { %v1027_v42 = vpack.c.bf16 %v361_v32, %v360_v30  ;;  %v363_v43 = vmax.f32 %v235_v25, %v299_v33  ;;  %v167_v46 = vmul.f32 %v904_v39, %v1242_v1  ;;  %v908_v48 = vunpack.c.l.bf16 %v1163_v36 }
  0x1a   :  { %1189 = vst [vmem:[%s1569_s3 + $0x28] sm:$0xff] %v1022_v37   ;;  %v168_v47 = vmul.f32 %v905_v40, %v1242_v1  ;;  %v909_v49 = vunpack.c.h.bf16 %v1163_v36  ;;  %v237_v51 = vadd.f32 %v1256_v7, %v166_v44  ;;  %v300_v52 = vmul.f32 0.2, %v236_v45  ;;  %v1169_v44 = vld [vmem:[%s1566_s0 + $0x80] sm:$0xff]  }
  0x1b   :  { %1190 = vst [vmem:[%s1569_s3 + $0x30] sm:$0xff] %v1027_v42   ;;  %v1032_v50 = vpack.c.bf16 %v363_v43, %v362_v38  ;;  %v912_v53 = vunpack.c.l.bf16 %v1164_v41  ;;  %v238_v54 = vadd.f32 %v1256_v7, %v167_v46  ;;  %v169_v56 = vmul.f32 %v908_v48, %v1242_v1 }
  0x1c   :  { %v239_v55 = vadd.f32 %v1256_v7, %v168_v47  ;;  %v170_v57 = vmul.f32 %v909_v49, %v1242_v1  ;;  %v301_v59 = vmul.f32 0.2, %v237_v51  ;;  %v364_v60 = vmax.f32 %v236_v45, %v300_v52 }
  0x1d   :  { %1191 = vst [vmem:[%s1569_s3 + $0x38] sm:$0xff] %v1032_v50   ;;  %v913_v61 = vunpack.c.h.bf16 %v1164_v41  ;;  %v171_v62 = vmul.f32 %v912_v53, %v1242_v1  ;;  %v302_v63 = vmul.f32 0.2, %v238_v54  ;;  %v240_v2 = vadd.f32 %v1256_v7, %v169_v56 }
  0x1e   :  { %v303_v0 = vmul.f32 0.2, %v239_v55  ;;  %v241_v3 = vadd.f32 %v1256_v7, %v170_v57  ;;  %v365_v4 = vmax.f32 %v237_v51, %v301_v59  ;;  %v916_v8 = vunpack.c.l.bf16 %v1165_v58  ;;  %v1170_v57 = vld [vmem:[%s1566_s0 + $0x88] sm:$0xff]  }
  0x1f   :  { %v172_v5 = vmul.f32 %v913_v61, %v1242_v1  ;;  %v242_v6 = vadd.f32 %v1256_v7, %v171_v62  ;;  %v366_v9 = vmax.f32 %v238_v54, %v302_v63  ;;  %v304_v11 = vmul.f32 0.2, %v240_v2 }
  0x20   :  { %v367_v10 = vmax.f32 %v239_v55, %v303_v0  ;;  %v305_v12 = vmul.f32 0.2, %v241_v3  ;;  %v1037_v14 = vpack.c.bf16 %v365_v4, %v364_v60  ;;  %v917_v17 = vunpack.c.h.bf16 %v1165_v58 }
  0x21   :  { %v243_v15 = vadd.f32 %v1256_v7, %v172_v5  ;;  %v306_v16 = vmul.f32 0.2, %v242_v6  ;;  %v368_v20 = vmax.f32 %v240_v2, %v304_v11  ;;  %v173_v22 = vmul.f32 %v916_v8, %v1242_v1  ;;  %v1171_v8 = vld [vmem:[%s1566_s0 + $0x90] sm:$0xff]  }
  0x22   :  { %v1042_v19 = vpack.c.bf16 %v367_v10, %v366_v9  ;;  %v369_v21 = vmax.f32 %v241_v3, %v305_v12  ;;  %1192 = vst [vmem:[%s1569_s3 + $0x40] sm:$0xff] %v1037_v14   ;;  %v174_v25 = vmul.f32 %v917_v17, %v1242_v1  ;;  %v920_v26 = vunpack.c.l.bf16 %v1166_v13 }
  0x23   :  { %v307_v23 = vmul.f32 0.2, %v243_v15  ;;  %v370_v24 = vmax.f32 %v242_v6, %v306_v16  ;;  %v244_v29 = vadd.f32 %v1256_v7, %v173_v22  ;;  %v921_v30 = vunpack.c.h.bf16 %v1166_v13  ;;  %v1172_v13 = vld [vmem:[%s1566_s0 + $0x98] sm:$0xff]  }
  0x24   :  { %1193 = vst [vmem:[%s1569_s3 + $0x48] sm:$0xff] %v1042_v19   ;;  %v1047_v28 = vpack.c.bf16 %v369_v21, %v368_v20  ;;  %v924_v31 = vunpack.c.l.bf16 %v1167_v18  ;;  %v245_v33 = vadd.f32 %v1256_v7, %v174_v25  ;;  %v175_v34 = vmul.f32 %v920_v26, %v1242_v1 }
  0x25   :  { %v371_v32 = vmax.f32 %v243_v15, %v307_v23  ;;  %v925_v35 = vunpack.c.h.bf16 %v1167_v18  ;;  %v308_v36 = vmul.f32 0.2, %v244_v29  ;;  %v176_v37 = vmul.f32 %v921_v30, %v1242_v1  ;;  %v1173_v30 = vld [vmem:[%s1566_s0 + $0xa0] sm:$0xff]  }
  0x26   :  { %1194 = vst [vmem:[%s1569_s3 + $0x50] sm:$0xff] %v1047_v28   ;;  %v177_v38 = vmul.f32 %v924_v31, %v1242_v1  ;;  %v928_v39 = vunpack.c.l.bf16 %v1168_v27  ;;  %v309_v41 = vmul.f32 0.2, %v245_v33  ;;  %v246_v42 = vadd.f32 %v1256_v7, %v175_v34 }
  0x27   :  { %v1052_v40 = vpack.c.bf16 %v371_v32, %v370_v24  ;;  %v178_v43 = vmul.f32 %v925_v35, %v1242_v1  ;;  %v372_v45 = vmax.f32 %v244_v29, %v308_v36  ;;  %v247_v46 = vadd.f32 %v1256_v7, %v176_v37 }
  0x28   :  { %v248_v47 = vadd.f32 %v1256_v7, %v177_v38  ;;  %v929_v48 = vunpack.c.h.bf16 %v1168_v27  ;;  %v373_v49 = vmax.f32 %v245_v33, %v309_v41  ;;  %v310_v50 = vmul.f32 0.2, %v246_v42 }
  0x29   :  { %1195 = vst [vmem:[%s1569_s3 + $0x58] sm:$0xff] %v1052_v40   ;;  %v249_v51 = vadd.f32 %v1256_v7, %v178_v43  ;;  %v179_v52 = vmul.f32 %v928_v39, %v1242_v1  ;;  %v311_v53 = vmul.f32 0.2, %v247_v46  ;;  %v932_v56 = vunpack.c.l.bf16 %v1169_v44  ;;  %v1174_v43 = vld [vmem:[%s1566_s0 + $0xa8] sm:$0xff]  }
  0x2a   :  { %v312_v54 = vmul.f32 0.2, %v248_v47  ;;  %v180_v55 = vmul.f32 %v929_v48, %v1242_v1  ;;  %v1057_v58 = vpack.c.bf16 %v373_v49, %v372_v45  ;;  %v374_v59 = vmax.f32 %v246_v42, %v310_v50 }
  0x2b   :  { %v313_v60 = vmul.f32 0.2, %v249_v51  ;;  %v250_v61 = vadd.f32 %v1256_v7, %v179_v52  ;;  %v375_v62 = vmax.f32 %v247_v46, %v311_v53  ;;  %v933_v2 = vunpack.c.h.bf16 %v1169_v44  ;;  %v1175_v52 = vld [vmem:[%s1566_s0 + $0xb0] sm:$0xff]  }
  0x2c   :  { %v376_v63 = vmax.f32 %v248_v47, %v312_v54  ;;  %v251_v0 = vadd.f32 %v1256_v7, %v180_v55  ;;  %1196 = vst [vmem:[%s1569_s3 + $0x60] sm:$0xff] %v1057_v58   ;;  %v181_v5 = vmul.f32 %v932_v56, %v1242_v1  ;;  %v936_v6 = vunpack.c.l.bf16 %v1170_v57 }
  0x2d   :  { %v377_v3 = vmax.f32 %v249_v51, %v313_v60  ;;  %v314_v4 = vmul.f32 0.2, %v250_v61  ;;  %v1062_v9 = vpack.c.bf16 %v375_v62, %v374_v59  ;;  %v182_v11 = vmul.f32 %v933_v2, %v1242_v1  ;;  %v1176_v2 = vld [vmem:[%s1566_s0 + $0xb8] sm:$0xff]  }
  0x2e   :  { %v315_v10 = vmul.f32 0.2, %v251_v0  ;;  %v937_v12 = vunpack.c.h.bf16 %v1170_v57  ;;  %v252_v16 = vadd.f32 %v1256_v7, %v181_v5  ;;  %v183_v17 = vmul.f32 %v936_v6, %v1242_v1 }
  0x2f   :  { %v1067_v14 = vpack.c.bf16 %v377_v3, %v376_v63  ;;  %v378_v15 = vmax.f32 %v250_v61, %v314_v4  ;;  %1197 = vst [vmem:[%s1569_s3 + $0x68] sm:$0xff] %v1062_v9   ;;  %v253_v19 = vadd.f32 %v1256_v7, %v182_v11  ;;  %v940_v21 = vunpack.c.l.bf16 %v1171_v8 }
  0x30   :  { %v379_v18 = vmax.f32 %v251_v0, %v315_v10  ;;  %v184_v20 = vmul.f32 %v937_v12, %v1242_v1  ;;  %v316_v22 = vmul.f32 0.2, %v252_v16  ;;  %v254_v23 = vadd.f32 %v1256_v7, %v183_v17  ;;  %v1177_v12 = vld [vmem:[%s1566_s0 + $0xc0] sm:$0xff]  }
  0x31   :  { %1198 = vst [vmem:[%s1569_s3 + $0x70] sm:$0xff] %v1067_v14   ;;  %v941_v24 = vunpack.c.h.bf16 %v1171_v8  ;;  %v944_v25 = vunpack.c.l.bf16 %v1172_v13  ;;  %v317_v27 = vmul.f32 0.2, %v253_v19  ;;  %v185_v29 = vmul.f32 %v940_v21, %v1242_v1 }
  0x32   :  { %v1072_v26 = vpack.c.bf16 %v379_v18, %v378_v15  ;;  %v255_v28 = vadd.f32 %v1256_v7, %v184_v20  ;;  %v380_v31 = vmax.f32 %v252_v16, %v316_v22  ;;  %v318_v32 = vmul.f32 0.2, %v254_v23 }
  0x33   :  { %v186_v33 = vmul.f32 %v941_v24, %v1242_v1  ;;  %v945_v34 = vunpack.c.h.bf16 %v1172_v13  ;;  %v381_v35 = vmax.f32 %v253_v19, %v317_v27  ;;  %v256_v37 = vadd.f32 %v1256_v7, %v185_v29  ;;  %v1178_v29 = vld [vmem:[%s1566_s0 + $0xc8] sm:$0xff]  }
  0x34   :  { %1199 = vst [vmem:[%s1569_s3 + $0x78] sm:$0xff] %v1072_v26   ;;  %v319_v36 = vmul.f32 0.2, %v255_v28  ;;  %v187_v38 = vmul.f32 %v944_v25, %v1242_v1  ;;  %v382_v39 = vmax.f32 %v254_v23, %v318_v32  ;;  %v948_v42 = vunpack.c.l.bf16 %v1173_v30 }
  0x35   :  { %v257_v40 = vadd.f32 %v1256_v7, %v186_v33  ;;  %v188_v41 = vmul.f32 %v945_v34, %v1242_v1  ;;  %v1077_v44 = vpack.c.bf16 %v381_v35, %v380_v31  ;;  %v320_v46 = vmul.f32 0.2, %v256_v37 }
  0x36   :  { %v383_v45 = vmax.f32 %v255_v28, %v319_v36  ;;  %v258_v47 = vadd.f32 %v1256_v7, %v187_v38  ;;  %v949_v50 = vunpack.c.h.bf16 %v1173_v30  ;;  %v189_v51 = vmul.f32 %v948_v42, %v1242_v1  ;;  %v1179_v42 = vld [vmem:[%s1566_s0 + $0xd0] sm:$0xff]  }
  0x37   :  { %v321_v48 = vmul.f32 0.2, %v257_v40  ;;  %v259_v49 = vadd.f32 %v1256_v7, %v188_v41  ;;  %1200 = vst [vmem:[%s1569_s3 + $0x80] sm:$0xff] %v1077_v44   ;;  %v384_v54 = vmax.f32 %v256_v37, %v320_v46  ;;  %v952_v56 = vunpack.c.l.bf16 %v1174_v43 }
  0x38   :  { %v1082_v53 = vpack.c.bf16 %v383_v45, %v382_v39  ;;  %v322_v55 = vmul.f32 0.2, %v258_v47  ;;  %v190_v59 = vmul.f32 %v949_v50, %v1242_v1  ;;  %v260_v60 = vadd.f32 %v1256_v7, %v189_v51  ;;  %v1180_v51 = vld [vmem:[%s1566_s0 + $0xd8] sm:$0xff]  }
  0x39   :  { %v385_v57 = vmax.f32 %v257_v40, %v321_v48  ;;  %v323_v58 = vmul.f32 0.2, %v259_v49  ;;  %v953_v62 = vunpack.c.h.bf16 %v1174_v43  ;;  %v191_v63 = vmul.f32 %v952_v56, %v1242_v1 }
  0x3a   :  { %1201 = vst [vmem:[%s1569_s3 + $0x88] sm:$0xff] %v1082_v53   ;;  %v386_v61 = vmax.f32 %v258_v47, %v322_v55  ;;  %v956_v0 = vunpack.c.l.bf16 %v1175_v52  ;;  %v261_v5 = vadd.f32 %v1256_v7, %v190_v59  ;;  %v324_v6 = vmul.f32 0.2, %v260_v60 }
  0x3b   :  { %v1087_v3 = vpack.c.bf16 %v385_v57, %v384_v54  ;;  %v387_v4 = vmax.f32 %v259_v49, %v323_v58  ;;  %v192_v8 = vmul.f32 %v953_v62, %v1242_v1  ;;  %v262_v9 = vadd.f32 %v1256_v7, %v191_v63 }
  0x3c   :  { %v957_v10 = vunpack.c.h.bf16 %v1175_v52  ;;  %v193_v11 = vmul.f32 %v956_v0, %v1242_v1  ;;  %v325_v14 = vmul.f32 0.2, %v261_v5  ;;  %v388_v15 = vmax.f32 %v260_v60, %v324_v6  ;;  %v1181_v0 = vld [vmem:[%s1566_s0 + $0xe0] sm:$0xff]  }
  0x3d   :  { %1202 = vst [vmem:[%s1569_s3 + $0x90] sm:$0xff] %v1087_v3   ;;  %v1092_v13 = vpack.c.bf16 %v387_v4, %v386_v61  ;;  %v960_v16 = vunpack.c.l.bf16 %v1176_v2  ;;  %v263_v17 = vadd.f32 %v1256_v7, %v192_v8  ;;  %v326_v18 = vmul.f32 0.2, %v262_v9 }
  0x3e   :  { %v194_v19 = vmul.f32 %v957_v10, %v1242_v1  ;;  %v264_v20 = vadd.f32 %v1256_v7, %v193_v11  ;;  %v389_v21 = vmax.f32 %v261_v5, %v325_v14  ;;  %v961_v22 = vunpack.c.h.bf16 %v1176_v2  ;;  %v1182_v11 = vld [vmem:[%s1566_s0 + $0xe8] sm:$0xff]  }
  0x3f   :  { %1203 = vst [vmem:[%s1569_s3 + $0x98] sm:$0xff] %v1092_v13   ;;  %v195_v23 = vmul.f32 %v960_v16, %v1242_v1  ;;  %v964_v24 = vunpack.c.l.bf16 %v1177_v12  ;;  %v327_v25 = vmul.f32 0.2, %v263_v17  ;;  %v390_v26 = vmax.f32 %v262_v9, %v326_v18 }
  0x40   :  { %v265_v27 = vadd.f32 %v1256_v7, %v194_v19  ;;  %v328_v28 = vmul.f32 0.2, %v264_v20  ;;  %v1097_v30 = vpack.c.bf16 %v389_v21, %v388_v15  ;;  %v196_v31 = vmul.f32 %v961_v22, %v1242_v1 }
  0x41   :  { %v266_v32 = vadd.f32 %v1256_v7, %v195_v23  ;;  %v965_v33 = vunpack.c.h.bf16 %v1177_v12  ;;  %v391_v34 = vmax.f32 %v263_v17, %v327_v25  ;;  %v197_v37 = vmul.f32 %v964_v24, %v1242_v1  ;;  %v1183_v24 = vld [vmem:[%s1566_s0 + $0xf0] sm:$0xff]  }
  0x42   :  { %v329_v35 = vmul.f32 0.2, %v265_v27  ;;  %v392_v36 = vmax.f32 %v264_v20, %v328_v28  ;;  %1204 = vst [vmem:[%s1569_s3 + $0xa0] sm:$0xff] %v1097_v30   ;;  %v267_v38 = vadd.f32 %v1256_v7, %v196_v31  ;;  %v968_v41 = vunpack.c.l.bf16 %v1178_v29 }
  0x43   :  { %v330_v39 = vmul.f32 0.2, %v266_v32  ;;  %v198_v40 = vmul.f32 %v965_v33, %v1242_v1  ;;  %v1102_v43 = vpack.c.bf16 %v391_v34, %v390_v26  ;;  %v268_v45 = vadd.f32 %v1256_v7, %v197_v37  ;;  %v1184_v37 = vld [vmem:[%s1566_s0 + $0xf8] sm:$0xff]  }
  0x44   :  { %v393_v44 = vmax.f32 %v265_v27, %v329_v35  ;;  %v969_v46 = vunpack.c.h.bf16 %v1178_v29  ;;  %v331_v47 = vmul.f32 0.2, %v267_v38  ;;  %v199_v50 = vmul.f32 %v968_v41, %v1242_v1 }
  0x45   :  { %v394_v48 = vmax.f32 %v266_v32, %v330_v39  ;;  %v269_v49 = vadd.f32 %v1256_v7, %v198_v40  ;;  %1205 = vst [vmem:[%s1569_s3 + $0xa8] sm:$0xff] %v1102_v43   ;;  %v332_v53 = vmul.f32 0.2, %v268_v45  ;;  %v972_v55 = vunpack.c.l.bf16 %v1179_v42 }
  0x46   :  { %v1107_v52 = vpack.c.bf16 %v393_v44, %v392_v36  ;;  %v200_v54 = vmul.f32 %v969_v46, %v1242_v1  ;;  %v395_v56 = vmax.f32 %v267_v38, %v331_v47  ;;  %v270_v58 = vadd.f32 %v1256_v7, %v199_v50 }
  0x47   :  { %v333_v57 = vmul.f32 0.2, %v269_v49  ;;  %v973_v59 = vunpack.c.h.bf16 %v1179_v42  ;;  %v396_v60 = vmax.f32 %v268_v45, %v332_v53  ;;  %v201_v62 = vmul.f32 %v972_v55, %v1242_v1 }
  0x48   :  { %1206 = vst [vmem:[%s1569_s3 + $0xb0] sm:$0xff] %v1107_v52   ;;  %v271_v61 = vadd.f32 %v1256_v7, %v200_v54  ;;  %v976_v63 = vunpack.c.l.bf16 %v1180_v51  ;;  %v1112_v2 = vpack.c.bf16 %v395_v56, %v394_v48  ;;  %v334_v4 = vmul.f32 0.2, %v270_v58 }
  0x49   :  { %v397_v3 = vmax.f32 %v269_v49, %v333_v57  ;;  %v202_v5 = vmul.f32 %v973_v59, %v1242_v1  ;;  %v272_v8 = vadd.f32 %v1256_v7, %v201_v62  ;;  %v977_v9 = vunpack.c.h.bf16 %v1180_v51 }
  0x4a   :  { %v335_v6 = vmul.f32 0.2, %v271_v61  ;;  %v203_v10 = vmul.f32 %v976_v63, %v1242_v1  ;;  %1207 = vst [vmem:[%s1569_s3 + $0xb8] sm:$0xff] %v1112_v2   ;;  %v398_v13 = vmax.f32 %v270_v58, %v334_v4  ;;  %v980_v15 = vunpack.c.l.bf16 %v1181_v0 }
  0x4b   :  { %v1117_v12 = vpack.c.bf16 %v397_v3, %v396_v60  ;;  %v273_v14 = vadd.f32 %v1256_v7, %v202_v5  ;;  %v336_v17 = vmul.f32 0.2, %v272_v8  ;;  %v204_v18 = vmul.f32 %v977_v9, %v1242_v1 }
  0x4c   :  { %v399_v16 = vmax.f32 %v271_v61, %v335_v6  ;;  %v274_v19 = vadd.f32 %v1256_v7, %v203_v10  ;;  %v981_v21 = vunpack.c.h.bf16 %v1181_v0  ;;  %v205_v22 = vmul.f32 %v980_v15, %v1242_v1 }
  0x4d   :  { %1208 = vst [vmem:[%s1569_s3 + $0xc0] sm:$0xff] %v1117_v12   ;;  %v337_v20 = vmul.f32 0.2, %v273_v14  ;;  %v984_v23 = vunpack.c.l.bf16 %v1182_v11  ;;  %v400_v26 = vmax.f32 %v272_v8, %v336_v17  ;;  %v275_v27 = vadd.f32 %v1256_v7, %v204_v18 }
  0x4e   :  { %v1122_v25 = vpack.c.bf16 %v399_v16, %v398_v13  ;;  %v338_v28 = vmul.f32 0.2, %v274_v19  ;;  %v206_v30 = vmul.f32 %v981_v21, %v1242_v1  ;;  %v276_v31 = vadd.f32 %v1256_v7, %v205_v22 }
  0x4f   :  { %v401_v29 = vmax.f32 %v273_v14, %v337_v20  ;;  %v985_v32 = vunpack.c.h.bf16 %v1182_v11  ;;  %v339_v33 = vmul.f32 0.2, %v275_v27  ;;  %v207_v35 = vmul.f32 %v984_v23, %v1242_v1 }
  0x50   :  { %1209 = vst [vmem:[%s1569_s3 + $0xc8] sm:$0xff] %v1122_v25   ;;  %v402_v34 = vmax.f32 %v274_v19, %v338_v28  ;;  %v988_v36 = vunpack.c.l.bf16 %v1183_v24  ;;  %v277_v39 = vadd.f32 %v1256_v7, %v206_v30  ;;  %v340_v40 = vmul.f32 0.2, %v276_v31 }
  0x51   :  { %v1127_v38 = vpack.c.bf16 %v401_v29, %v400_v26  ;;  %v208_v41 = vmul.f32 %v985_v32, %v1242_v1  ;;  %v403_v42 = vmax.f32 %v275_v27, %v339_v33  ;;  %v278_v43 = vadd.f32 %v1256_v7, %v207_v35 }
  0x52   :  { %v989_v44 = vunpack.c.h.bf16 %v1183_v24  ;;  %v209_v45 = vmul.f32 %v988_v36, %v1242_v1  ;;  %v341_v46 = vmul.f32 0.2, %v277_v39  ;;  %v404_v47 = vmax.f32 %v276_v31, %v340_v40 }
  0x53   :  { %1210 = vst [vmem:[%s1569_s3 + $0xd0] sm:$0xff] %v1127_v38   ;;  %v279_v48 = vadd.f32 %v1256_v7, %v208_v41  ;;  %v992_v49 = vunpack.c.l.bf16 %v1184_v37  ;;  %v1132_v50 = vpack.c.bf16 %v403_v42, %v402_v34  ;;  %v342_v51 = vmul.f32 0.2, %v278_v43 }
  0x54   :  { %v210_v52 = vmul.f32 %v989_v44, %v1242_v1  ;;  %v280_v53 = vadd.f32 %v1256_v7, %v209_v45  ;;  %v405_v54 = vmax.f32 %v277_v39, %v341_v46  ;;  %v993_v56 = vunpack.c.h.bf16 %v1184_v37 }
  0x55   :  { %v343_v55 = vmul.f32 0.2, %v279_v48  ;;  %v211_v57 = vmul.f32 %v992_v49, %v1242_v1  ;;  %1211 = vst [vmem:[%s1569_s3 + $0xd8] sm:$0xff] %v1132_v50   ;;  %v406_v58 = vmax.f32 %v278_v43, %v342_v51 }
  0x56   :  { %v281_v59 = vadd.f32 %v1256_v7, %v210_v52  ;;  %v344_v60 = vmul.f32 0.2, %v280_v53  ;;  %v1137_v61 = vpack.c.bf16 %v405_v54, %v404_v47  ;;  %v212_v63 = vmul.f32 %v993_v56, %v1242_v1 }
  0x57   :  { %v407_v62 = vmax.f32 %v279_v48, %v343_v55  ;;  %v282_v0 = vadd.f32 %v1256_v7, %v211_v57 }
  0x58   :  { %v345_v2 = vmul.f32 0.2, %v281_v59  ;;  %v408_v3 = vmax.f32 %v280_v53, %v344_v60  ;;  %1212 = vst [vmem:[%s1569_s3 + $0xe0] sm:$0xff] %v1137_v61   ;;  %v283_v5 = vadd.f32 %v1256_v7, %v212_v63 }
  0x59   :  { %v1142_v4 = vpack.c.bf16 %v407_v62, %v406_v58  ;;  %v346_v6 = vmul.f32 0.2, %v282_v0 }
  0x5a   :  { %v409_v8 = vmax.f32 %v281_v59, %v345_v2  ;;  %v347_v9 = vmul.f32 0.2, %v283_v5 }
  0x5b   :  { %1213 = vst [vmem:[%s1569_s3 + $0xe8] sm:$0xff] %v1142_v4   ;;  %v410_v10 = vmax.f32 %v282_v0, %v346_v6 }
  0x5c   :  { %v1147_v1 = vpack.c.bf16 %v409_v8, %v408_v3  ;;  %v411_v11 = vmax.f32 %v283_v5, %v347_v9 }
  0x5e   :  { %1214 = vst [vmem:[%s1569_s3 + $0xf0] sm:$0xff] %v1147_v1   ;;  %v1152_v12 = vpack.c.bf16 %v411_v11, %v410_v10 }
  0x60   :  { %1215 = vst [vmem:[%s1569_s3 + $0xf8] sm:$0xff] %v1152_v12  }

// kernel: dc_discriminator_forward.11
= control target key start
LH: loop header
LB: loop body
LE: loop exit
PB: predicated region body
PF: predicated region fallthrough
CT: control target
= control target key end

     0   :  { %s878_s1 = inlined_call_operand.vmem [shape: bf16[256,128], index: 1, kind: input, shape index: {}]   ;;  %s879_s0 = inlined_call_operand.vmem [shape: bf16[128,256], index: 0, kind: input, shape index: {}]   ;;  %s880_s2 = inlined_call_operand.vmem [shape: bf16[128,128], index: 2, kind: output, shape index: {0}]   ;;  %s881_s3 = inlined_call_operand.vmem [shape: f32[1,8,128], index: 3, kind: output, shape index: {1}]  }
   0x1   :  { %v674_v0 = vld [vmem:[%s878_s1 + $0x40] sm:$0xff]   ;;  %v676_v2 = vld [vmem:[%s878_s1 + $0x48] sm:$0xff]   ;;  %v678_v4 = vld [vmem:[%s878_s1 + $0x50] sm:$0xff]  }
   0x2   :  { %v675_v1 = vld [vmem:[%s878_s1] sm:$0xff]   ;;  %594 = vmatprep.subr.bf16.mxu0 %v674_v0  ;;  %658 = vmatprep.subr.bf16.mxu1 %v674_v0  ;;  %v677_v3 = vld [vmem:[%s878_s1 + $0x8] sm:$0xff]   ;;  %v679_v5 = vld [vmem:[%s878_s1 + $0x10] sm:$0xff]  }
   0x3   :  { %595 = vmatpush3.bf16.msra.mxu0 %v675_v1  ;;  %666 = vmatpush3.bf16.msra.mxu1 %v675_v1  ;;  %v680_v6 = vld [vmem:[%s878_s1 + $0x58] sm:$0xff]   ;;  %v682_v8 = vld [vmem:[%s878_s1 + $0x60] sm:$0xff]   ;;  %v684_v10 = vld [vmem:[%s878_s1 + $0x68] sm:$0xff]  }
   0x4   :  { %596 = vmatprep.subr.bf16.mxu0 %v676_v2  ;;  %659 = vmatprep.subr.bf16.mxu1 %v676_v2  ;;  %v681_v7 = vld [vmem:[%s878_s1 + $0x18] sm:$0xff]   ;;  %v683_v9 = vld [vmem:[%s878_s1 + $0x20] sm:$0xff]   ;;  %v685_v12 = vld [vmem:[%s878_s1 + $0x28] sm:$0xff]  }
   0x5   :  { %v692_v11 = vld [vmem:[%s879_s0 + $0x4] ss:$8 sps:$4 sm:$0xff]   ;;  %v686_v14 = vld [vmem:[%s878_s1 + $0x70] sm:$0xff]   ;;  %v688_v16 = vld [vmem:[%s878_s1 + $0x78] sm:$0xff]  }
   0x6   :  { %v698_v13 = vld [vmem:[%s879_s0 + $0x44] ss:$8 sps:$4 sm:$0xff]   ;;  %270 = vmatprep.mubr.bf16.mxu0 %v692_v11  ;;  %v687_v15 = vld [vmem:[%s878_s1 + $0x30] sm:$0xff]   ;;  %v689_v17 = vld [vmem:[%s878_s1 + $0x38] sm:$0xff]  }
   0x7   :  { %597 = vmatpush3.bf16.msra.mxu0 %v677_v3  ;;  %667 = vmatpush3.bf16.msra.mxu1 %v677_v3  ;;  %v690_v18 = vld [vmem:[%s879_s0] ss:$8 sps:$4 sm:$0xff]   ;;  %v693_v20 = vld [vmem:[%s879_s0 + $0x14] ss:$8 sps:$4 sm:$0xff]   ;;  %v695_v22 = vld [vmem:[%s879_s0 + $0x10] ss:$8 sps:$4 sm:$0xff]  }
   0x8   :  { %598 = vmatprep.subr.bf16.mxu0 %v678_v4  ;;  %660 = vmatprep.subr.bf16.mxu1 %v678_v4  ;;  %v696_v19 = vld [vmem:[%s879_s0 + $0x40] ss:$8 sps:$4 sm:$0xff]   ;;  %v702_v21 = vld [vmem:[%s879_s0 + $0x54] ss:$8 sps:$4 sm:$0xff]   ;;  %v704_v23 = vld [vmem:[%s879_s0 + $0x50] ss:$8 sps:$4 sm:$0xff]  }
   0x9   :  { %302 = vmatprep.mubr.bf16.mxu1 %v698_v13  ;;  %v699_v24 = vld [vmem:[%s879_s0 + $0x24] ss:$8 sps:$4 sm:$0xff]   ;;  %v701_v26 = vld [vmem:[%s879_s0 + $0x20] ss:$8 sps:$4 sm:$0xff]   ;;  %v705_v28 = vld [vmem:[%s879_s0 + $0x34] ss:$8 sps:$4 sm:$0xff]  }
   0xa   :  { %v708_v25 = vld [vmem:[%s879_s0 + $0x64] ss:$8 sps:$4 sm:$0xff]   ;;  %v710_v27 = vld [vmem:[%s879_s0 + $0x60] ss:$8 sps:$4 sm:$0xff]   ;;  %v711_v29 = vld [vmem:[%s879_s0 + $0x74] ss:$8 sps:$4 sm:$0xff]  }
   0xb   :  { %599 = vmatpush3.bf16.msra.mxu0 %v679_v5  ;;  %668 = vmatpush3.bf16.msra.mxu1 %v679_v5  ;;  %v707_v30 = vld [vmem:[%s879_s0 + $0x30] ss:$8 sps:$4 sm:$0xff]  }
   0xc   :  { %600 = vmatprep.subr.bf16.mxu0 %v680_v6  ;;  %661 = vmatprep.subr.bf16.mxu1 %v680_v6  ;;  %v713_v31 = vld [vmem:[%s879_s0 + $0x70] ss:$8 sps:$4 sm:$0xff]  }
   0xf   :  { %601 = vmatpush3.bf16.msra.mxu0 %v681_v7  ;;  %669 = vmatpush3.bf16.msra.mxu1 %v681_v7 }
  0x10   :  { %602 = vmatprep.subr.bf16.mxu0 %v682_v8  ;;  %662 = vmatprep.subr.bf16.mxu1 %v682_v8 }
  0x13   :  { %603 = vmatpush3.bf16.msra.mxu0 %v683_v9  ;;  %670 = vmatpush3.bf16.msra.mxu1 %v683_v9 }
  0x14   :  { %604 = vmatprep.subr.bf16.mxu0 %v684_v10  ;;  %663 = vmatprep.subr.bf16.mxu1 %v684_v10 }
  0x17   :  { %605 = vmatpush3.bf16.msra.mxu0 %v685_v12  ;;  %671 = vmatpush3.bf16.msra.mxu1 %v685_v12 }
  0x18   :  { %606 = vmatprep.subr.bf16.mxu0 %v686_v14  ;;  %664 = vmatprep.subr.bf16.mxu1 %v686_v14 }
  0x1b   :  { %607 = vmatpush3.bf16.msra.mxu0 %v687_v15  ;;  %672 = vmatpush3.bf16.msra.mxu1 %v687_v15 }
  0x1c   :  { %608 = vmatprep.subr.bf16.mxu0 %v688_v16  ;;  %665 = vmatprep.subr.bf16.mxu1 %v688_v16 }
  0x1f   :  { %609 = vmatpush3.bf16.msra.mxu0 %v689_v17  ;;  %673 = vmatpush3.bf16.msra.mxu1 %v689_v17 }
  0x22   :  { %271 = vmatmul.mubr.bf16.vlgmr.msra.gmra.mrb[0].mxu0 %v690_v18  ;;  %303 = vmatmul.mubr.bf16.vlgmr.msra.gmra.mrb[0].mxu1 %v696_v19 }
  0x23   :  { %278 = vmatprep.mubr.bf16.mxu0 %v693_v20  ;;  %310 = vmatprep.mubr.bf16.mxu1 %v702_v21 }
  0x2a   :  { %279 = vmatmul.mubr.bf16.gmra.mrb[4].mxu0 %v695_v22  ;;  %311 = vmatmul.mubr.bf16.gmra.mrb[4].mxu1 %v704_v23 }
  0x2b   :  { %286 = vmatprep.mubr.bf16.mxu0 %v699_v24  ;;  %318 = vmatprep.mubr.bf16.mxu1 %v708_v25 }
  0x32   :  { %287 = vmatmul.mubr.bf16.gmra.mrb[8].mxu0 %v701_v26  ;;  %319 = vmatmul.mubr.bf16.gmra.mrb[8].mxu1 %v710_v27 }
  0x33   :  { %294 = vmatprep.mubr.bf16.mxu0 %v705_v28  ;;  %326 = vmatprep.mubr.bf16.mxu1 %v711_v29 }
  0x3a   :  { %295 = vmatmul.mubr.bf16.gmra.mrb[12].mxu0 %v707_v30  ;;  %327 = vmatmul.mubr.bf16.gmra.mrb[12].mxu1 %v713_v31 }
  0xf5   :  { %v610_v32 = vpop.f32.mrb[0].mxu0  ;;  %v634_v33 = vpop.f32.mrb[0].mxu1 }
  0xf6   :  { %v611_v34 = vpop.f32.mrb[1].mxu0  ;;  %v635_v35 = vpop.f32.mrb[1].mxu1 }
  0xf7   :  { %v612_v36 = vadd.f32 %v611_v34, %v610_v32  ;;  %v613_v37 = vpop.f32.mrb[2].mxu0  ;;  %v830_v38 = vadd.f32 %v635_v35, %v634_v33  ;;  %v637_v39 = vpop.f32.mrb[2].mxu1 }
  0xf8   :  { %v614_v40 = vpop.f32.mrb[3].mxu0  ;;  %v638_v41 = vpop.f32.mrb[3].mxu1 }
  0xf9   :  { %v615_v42 = vadd.f32 %v614_v40, %v613_v37  ;;  %v832_v43 = vadd.f32 %v638_v41, %v637_v39  ;;  %v437_v44 = vmul.f32 %v612_v36, %v612_v36 }
  0xfb   :  { %v550_v45 = vpack.c.bf16 %v615_v42, %v612_v36  ;;  %v415_v46 = vadd.f32 %v615_v42, %v612_v36  ;;  %v438_v47 = vmul.f32 %v615_v42, %v615_v42  ;;  %v570_v48 = vpack.c.bf16 %v832_v43, %v830_v38 }
  0xfd   :  { %551 = vst [vmem:[%s880_s2] sm:$0xff] %v550_v45   ;;  %v453_v49 = vadd.f32 %v438_v47, %v437_v44  ;;  %v616_v50 = vpop.f32.mrb[4].mxu0  ;;  %590 = vst [vmem:[%s880_s2 + $0x20] sm:$0xff] %v570_v48   ;;  %v640_v51 = vpop.f32.mrb[4].mxu1  ;;  %v445_v47 = vmul.f32 %v830_v38, %v830_v38 }
  0xfe   :  { %v617_v52 = vpop.f32.mrb[5].mxu0  ;;  %v641_v53 = vpop.f32.mrb[5].mxu1 }
  0xff   :  { %v618_v54 = vadd.f32 %v617_v52, %v616_v50  ;;  %v619_v55 = vpop.f32.mrb[6].mxu0  ;;  %v842_v56 = vadd.f32 %v641_v53, %v640_v51  ;;  %v643_v57 = vpop.f32.mrb[6].mxu1  ;;  %v446_v50 = vmul.f32 %v832_v43, %v832_v43 }
 0x100   :  { %v620_v58 = vpop.f32.mrb[7].mxu0  ;;  %v644_v59 = vpop.f32.mrb[7].mxu1 }
 0x101   :  { %v416_v60 = vadd.f32 %v618_v54, %v415_v46  ;;  %v439_v61 = vmul.f32 %v618_v54, %v618_v54  ;;  %v621_v62 = vadd.f32 %v620_v58, %v619_v55  ;;  %v645_v63 = vadd.f32 %v644_v59, %v643_v57 }
 0x102   :  { %v447_v53 = vmul.f32 %v842_v56, %v842_v56 }
 0x103   :  { %v454_v0 = vadd.f32 %v453_v49, %v439_v61  ;;  %v555_v1 = vpack.c.bf16 %v621_v62, %v618_v54  ;;  %v417_v2 = vadd.f32 %v621_v62, %v416_v60  ;;  %v440_v3 = vmul.f32 %v621_v62, %v621_v62 }
 0x104   :  { %v575_v4 = vpack.c.bf16 %v645_v63, %v842_v56  ;;  %v448_v57 = vmul.f32 %v645_v63, %v645_v63 }
 0x105   :  { %587 = vst [vmem:[%s880_s2 + $0x8] sm:$0xff] %v555_v1   ;;  %v455_v5 = vadd.f32 %v454_v0, %v440_v3  ;;  %v622_v6 = vpop.f32.mrb[8].mxu0  ;;  %v646_v7 = vpop.f32.mrb[8].mxu1 }
 0x106   :  { %v623_v8 = vpop.f32.mrb[9].mxu0  ;;  %591 = vst [vmem:[%s880_s2 + $0x28] sm:$0xff] %v575_v4   ;;  %v647_v9 = vpop.f32.mrb[9].mxu1 }
 0x107   :  { %v624_v10 = vadd.f32 %v623_v8, %v622_v6  ;;  %v625_v11 = vpop.f32.mrb[10].mxu0  ;;  %v648_v12 = vadd.f32 %v647_v9, %v646_v7  ;;  %v649_v13 = vpop.f32.mrb[10].mxu1 }
 0x108   :  { %v626_v14 = vpop.f32.mrb[11].mxu0  ;;  %v650_v15 = vpop.f32.mrb[11].mxu1 }
 0x109   :  { %v418_v16 = vadd.f32 %v624_v10, %v417_v2  ;;  %v441_v17 = vmul.f32 %v624_v10, %v624_v10  ;;  %v627_v18 = vadd.f32 %v626_v14, %v625_v11  ;;  %v651_v19 = vadd.f32 %v650_v15, %v649_v13 }
 0x10a   :  { %v449_v60 = vmul.f32 %v648_v12, %v648_v12 }
 0x10b   :  { %v456_v20 = vadd.f32 %v455_v5, %v441_v17  ;;  %v560_v21 = vpack.c.bf16 %v627_v18, %v624_v10  ;;  %v419_v22 = vadd.f32 %v627_v18, %v418_v16  ;;  %v442_v23 = vmul.f32 %v627_v18, %v627_v18 }
 0x10c   :  { %v580_v24 = vpack.c.bf16 %v651_v19, %v648_v12  ;;  %v450_v1 = vmul.f32 %v651_v19, %v651_v19 }
 0x10d   :  { %588 = vst [vmem:[%s880_s2 + $0x10] sm:$0xff] %v560_v21   ;;  %v457_v25 = vadd.f32 %v456_v20, %v442_v23  ;;  %v628_v26 = vpop.f32.mrb[12].mxu0  ;;  %v652_v27 = vpop.f32.mrb[12].mxu1 }
 0x10e   :  { %v629_v28 = vpop.f32.mrb[13].mxu0  ;;  %592 = vst [vmem:[%s880_s2 + $0x30] sm:$0xff] %v580_v24   ;;  %v653_v29 = vpop.f32.mrb[13].mxu1 }
 0x10f   :  { %v630_v30 = vadd.f32 %v629_v28, %v628_v26  ;;  %v631_v31 = vpop.f32.mrb[14].mxu0  ;;  %v654_v32 = vadd.f32 %v653_v29, %v652_v27  ;;  %v655_v33 = vpop.f32.mrb[14].mxu1 }
 0x110   :  { %v632_v34 = vpop.f32.mrb[15].mxu0  ;;  %v656_v35 = vpop.f32.mrb[15].mxu1 }
 0x111   :  { %v420_v36 = vadd.f32 %v630_v30, %v419_v22  ;;  %v443_v37 = vmul.f32 %v630_v30, %v630_v30  ;;  %v633_v39 = vadd.f32 %v632_v34, %v631_v31  ;;  %v657_v40 = vadd.f32 %v656_v35, %v655_v33 }
 0x112   :  { %v451_v2 = vmul.f32 %v654_v32, %v654_v32 }
 0x113   :  { %v458_v41 = vadd.f32 %v457_v25, %v443_v37  ;;  %v565_v42 = vpack.c.bf16 %v633_v39, %v630_v30  ;;  %v421_v44 = vadd.f32 %v633_v39, %v420_v36  ;;  %v444_v45 = vmul.f32 %v633_v39, %v633_v39 }
 0x114   :  { %v585_v46 = vpack.c.bf16 %v657_v40, %v654_v32  ;;  %v452_v6 = vmul.f32 %v657_v40, %v657_v40 }
 0x115   :  { %589 = vst [vmem:[%s880_s2 + $0x18] sm:$0xff] %v565_v42   ;;  %v422_v48 = vadd.f32 %v830_v38, %v421_v44  ;;  %v459_v49 = vadd.f32 %v458_v41, %v444_v45 }
 0x116   :  { %593 = vst [vmem:[%s880_s2 + $0x38] sm:$0xff] %v585_v46  }
 0x117   :  { %v423_v51 = vadd.f32 %v832_v43, %v422_v48  ;;  %v460_v52 = vadd.f32 %v459_v49, %v445_v47 }
 0x119   :  { %v461_v54 = vadd.f32 %v460_v52, %v446_v50  ;;  %v424_v55 = vadd.f32 %v842_v56, %v423_v51 }
 0x11b   :  { %v425_v58 = vadd.f32 %v645_v63, %v424_v55  ;;  %v462_v38 = vadd.f32 %v461_v54, %v447_v53 }
 0x11d   :  { %v426_v59 = vadd.f32 %v648_v12, %v425_v58  ;;  %v463_v61 = vadd.f32 %v462_v38, %v448_v57 }
 0x11f   :  { %v464_v62 = vadd.f32 %v463_v61, %v449_v60  ;;  %v427_v0 = vadd.f32 %v651_v19, %v426_v59 }
 0x121   :  { %v465_v3 = vadd.f32 %v464_v62, %v450_v1  ;;  %v428_v4 = vadd.f32 %v654_v32, %v427_v0 }
 0x123   :  { %v466_v43 = vadd.f32 %v465_v3, %v451_v2  ;;  %v429_v5 = vadd.f32 %v657_v40, %v428_v4 }
 0x125   :  { %v430_v7 = vrot.slane %v429_v5, 4  ;;  %v467_v8 = vadd.f32 %v466_v43, %v452_v6 }
 0x127   :  { %v431_v9 = vadd.f32 %v430_v7, %v429_v5  ;;  %v468_v10 = vrot.slane %v467_v8, 4 }
 0x129   :  { %v432_v56 = vrot.slane %v431_v9, 2  ;;  %v469_v11 = vadd.f32 %v468_v10, %v467_v8 }
 0x12b   :  { %v433_v63 = vadd.f32 %v432_v56, %v431_v9  ;;  %v470_v13 = vrot.slane %v469_v11, 2 }
 0x12d   :  { %v434_v14 = vrot.slane %v433_v63, 1  ;;  %v471_v12 = vadd.f32 %v470_v13, %v469_v11 }
 0x12f   :  { %v435_v15 = vadd.f32 %v434_v14, %v433_v63  ;;  %v472_v16 = vrot.slane %v471_v12, 1 }
 0x131   :  { %436 = vst [vmem:[%s881_s3] sm:$0x1] %v435_v15  ;;  %v473_v17 = vadd.f32 %v472_v16, %v471_v12 }
 0x133   :  { %474 = vst [vmem:[%s881_s3 + $0x1] sm:$0x1] %v473_v17 }

// kernel: dc_discriminator_forward.12
= control target key start
LH: loop header
LB: loop body
LE: loop exit
PB: predicated region body
PF: predicated region fallthrough
CT: control target
= control target key end

     0   :  { %s438_s0 = inlined_call_operand.vmem [shape: bf16[128,128], index: 0, kind: input, shape index: {}]   ;;  %s439_s1 = inlined_call_operand.vmem [shape: f32[1,128], index: 1, kind: input, shape index: {}]   ;;  %s440_s2 = inlined_call_operand.vmem [shape: f32[1,128], index: 2, kind: input, shape index: {}]   ;;  %s441_s3 = inlined_call_operand.vmem [shape: bf16[128,128], index: 3, kind: output, shape index: {}]  }
   0x1   :  { %v243_v0 = vld [vmem:[%s438_s0] sm:$0xff]   ;;  %v314_v4 = vld [vmem:[%s438_s0 + $0x8] sm:$0xff]   ;;  %v315_v5 = vld [vmem:[%s438_s0 + $0x10] sm:$0xff]  }
   0x2   :  { %v354_v1 = vld [vmem:[%s439_s1] ss:$0 sm:$0xff]  ;;  %v244_v2 = vunpack.c.l.bf16 %v243_v0  ;;  %v245_v3 = vunpack.c.h.bf16 %v243_v0  ;;  %v316_v6 = vld [vmem:[%s438_s0 + $0x18] sm:$0xff]   ;;  %v248_v8 = vunpack.c.l.bf16 %v314_v4  ;;  %v249_v9 = vunpack.c.h.bf16 %v314_v4  ;;  %v318_v41 = vld [vmem:[%s438_s0 + $0x28] sm:$0xff]  }
   0x3   :  { %v368_v7 = vld [vmem:[%s440_s2] ss:$0 sm:$0xff]  ;;  %v252_v10 = vunpack.c.l.bf16 %v315_v5  ;;  %v253_v11 = vunpack.c.h.bf16 %v315_v5  ;;  %v256_v14 = vunpack.c.l.bf16 %v316_v6  ;;  %v257_v15 = vunpack.c.h.bf16 %v316_v6  ;;  %v319_v46 = vld [vmem:[%s438_s0 + $0x30] sm:$0xff]   ;;  %v320_v55 = vld [vmem:[%s438_s0 + $0x38] sm:$0xff]  }
   0x4   :  { %v53_v12 = vmul.f32 %v244_v2, %v354_v1  ;;  %v54_v13 = vmul.f32 %v245_v3, %v354_v1  ;;  %v55_v16 = vmul.f32 %v248_v8, %v354_v1  ;;  %v56_v17 = vmul.f32 %v249_v9, %v354_v1  ;;  %v317_v24 = vld [vmem:[%s438_s0 + $0x20] sm:$0xff]  }
   0x5   :  { %v57_v18 = vmul.f32 %v252_v10, %v354_v1  ;;  %v58_v19 = vmul.f32 %v253_v11, %v354_v1  ;;  %v59_v22 = vmul.f32 %v256_v14, %v354_v1  ;;  %v60_v23 = vmul.f32 %v257_v15, %v354_v1 }
   0x6   :  { %v76_v20 = vadd.f32 %v368_v7, %v53_v12  ;;  %v77_v21 = vadd.f32 %v368_v7, %v54_v13  ;;  %v78_v25 = vadd.f32 %v368_v7, %v55_v16  ;;  %v79_v26 = vadd.f32 %v368_v7, %v56_v17 }
   0x7   :  { %v80_v27 = vadd.f32 %v368_v7, %v57_v18  ;;  %v81_v28 = vadd.f32 %v368_v7, %v58_v19  ;;  %v82_v31 = vadd.f32 %v368_v7, %v59_v22  ;;  %v83_v32 = vadd.f32 %v368_v7, %v60_v23 }
   0x8   :  { %v92_v29 = vmul.f32 0.2, %v76_v20  ;;  %v93_v30 = vmul.f32 0.2, %v77_v21  ;;  %v94_v33 = vmul.f32 0.2, %v78_v25  ;;  %v260_v36 = vunpack.c.l.bf16 %v317_v24 }
   0x9   :  { %v95_v34 = vmul.f32 0.2, %v79_v26  ;;  %v96_v35 = vmul.f32 0.2, %v80_v27  ;;  %v97_v39 = vmul.f32 0.2, %v81_v28  ;;  %v261_v50 = vunpack.c.h.bf16 %v317_v24 }
   0xa   :  { %v108_v37 = vmax.f32 %v76_v20, %v92_v29  ;;  %v109_v38 = vmax.f32 %v77_v21, %v93_v30  ;;  %v98_v40 = vmul.f32 0.2, %v82_v31  ;;  %v110_v42 = vmax.f32 %v78_v25, %v94_v33 }
   0xb   :  { %v111_v43 = vmax.f32 %v79_v26, %v95_v34  ;;  %v112_v44 = vmax.f32 %v80_v27, %v96_v35  ;;  %v99_v45 = vmul.f32 0.2, %v83_v32  ;;  %v113_v48 = vmax.f32 %v81_v28, %v97_v39 }
   0xc   :  { %v277_v47 = vpack.c.bf16 %v109_v38, %v108_v37  ;;  %v114_v49 = vmax.f32 %v82_v31, %v98_v40  ;;  %v61_v53 = vmul.f32 %v260_v36, %v354_v1  ;;  %v264_v54 = vunpack.c.l.bf16 %v318_v41 }
   0xd   :  { %v282_v51 = vpack.c.bf16 %v111_v43, %v110_v42  ;;  %v115_v52 = vmax.f32 %v83_v32, %v99_v45  ;;  %v287_v56 = vpack.c.bf16 %v113_v48, %v112_v44  ;;  %v62_v57 = vmul.f32 %v261_v50, %v354_v1 }
   0xe   :  { %278 = vst [vmem:[%s441_s3] sm:$0xff] %v277_v47   ;;  %v265_v58 = vunpack.c.h.bf16 %v318_v41  ;;  %v268_v59 = vunpack.c.l.bf16 %v319_v46  ;;  %v84_v61 = vadd.f32 %v368_v7, %v61_v53  ;;  %v63_v62 = vmul.f32 %v264_v54, %v354_v1 }
   0xf   :  { %321 = vst [vmem:[%s441_s3 + $0x8] sm:$0xff] %v282_v51   ;;  %v292_v60 = vpack.c.bf16 %v115_v52, %v114_v49  ;;  %v269_v63 = vunpack.c.h.bf16 %v319_v46  ;;  %322 = vst [vmem:[%s441_s3 + $0x10] sm:$0xff] %v287_v56   ;;  %v85_v0 = vadd.f32 %v368_v7, %v62_v57  ;;  %v272_v4 = vunpack.c.l.bf16 %v320_v55 }
  0x10   :  { %v64_v2 = vmul.f32 %v265_v58, %v354_v1  ;;  %v65_v3 = vmul.f32 %v268_v59, %v354_v1  ;;  %v100_v5 = vmul.f32 0.2, %v84_v61  ;;  %v86_v6 = vadd.f32 %v368_v7, %v63_v62 }
  0x11   :  { %323 = vst [vmem:[%s441_s3 + $0x18] sm:$0xff] %v292_v60   ;;  %v66_v8 = vmul.f32 %v269_v63, %v354_v1  ;;  %v273_v9 = vunpack.c.h.bf16 %v320_v55  ;;  %v101_v10 = vmul.f32 0.2, %v85_v0  ;;  %v67_v13 = vmul.f32 %v272_v4, %v354_v1 }
  0x12   :  { %v87_v11 = vadd.f32 %v368_v7, %v64_v2  ;;  %v88_v12 = vadd.f32 %v368_v7, %v65_v3  ;;  %v116_v14 = vmax.f32 %v84_v61, %v100_v5  ;;  %v102_v15 = vmul.f32 0.2, %v86_v6 }
  0x13   :  { %v89_v16 = vadd.f32 %v368_v7, %v66_v8  ;;  %v68_v17 = vmul.f32 %v273_v9, %v354_v1  ;;  %v117_v18 = vmax.f32 %v85_v0, %v101_v10  ;;  %v90_v21 = vadd.f32 %v368_v7, %v67_v13 }
  0x14   :  { %v103_v19 = vmul.f32 0.2, %v87_v11  ;;  %v104_v20 = vmul.f32 0.2, %v88_v12  ;;  %v118_v22 = vmax.f32 %v86_v6, %v102_v15 }
  0x15   :  { %v105_v23 = vmul.f32 0.2, %v89_v16  ;;  %v91_v24 = vadd.f32 %v368_v7, %v68_v17  ;;  %v297_v25 = vpack.c.bf16 %v117_v18, %v116_v14  ;;  %v106_v28 = vmul.f32 0.2, %v90_v21 }
  0x16   :  { %v119_v26 = vmax.f32 %v87_v11, %v103_v19  ;;  %v120_v27 = vmax.f32 %v88_v12, %v104_v20 }
  0x17   :  { %v121_v29 = vmax.f32 %v89_v16, %v105_v23  ;;  %v107_v30 = vmul.f32 0.2, %v91_v24  ;;  %324 = vst [vmem:[%s441_s3 + $0x20] sm:$0xff] %v297_v25   ;;  %v122_v31 = vmax.f32 %v90_v21, %v106_v28 }
  0x18   :  { %v302_v1 = vpack.c.bf16 %v119_v26, %v118_v22 }
  0x19   :  { %v307_v32 = vpack.c.bf16 %v121_v29, %v120_v27  ;;  %v123_v33 = vmax.f32 %v91_v24, %v107_v30 }
  0x1a   :  { %325 = vst [vmem:[%s441_s3 + $0x28] sm:$0xff] %v302_v1  }
  0x1b   :  { %326 = vst [vmem:[%s441_s3 + $0x30] sm:$0xff] %v307_v32   ;;  %v312_v7 = vpack.c.bf16 %v123_v33, %v122_v31 }
  0x1d   :  { %327 = vst [vmem:[%s441_s3 + $0x38] sm:$0xff] %v312_v7  }

// kernel: dc_discriminator_forward.14
= control target key start
LH: loop header
LB: loop body
LE: loop exit
PB: predicated region body
PF: predicated region fallthrough
CT: control target
= control target key end

     0   :  { %s144_s0 = inlined_call_operand.vmem [shape: bf16[32,128], index: 0, kind: input, shape index: {}]   ;;  %s145_s1 = inlined_call_operand.vmem [shape: f32[1,128], index: 1, kind: input, shape index: {}]   ;;  %s146_s2 = inlined_call_operand.vmem [shape: f32[1,128], index: 2, kind: input, shape index: {}]   ;;  %s147_s3 = inlined_call_operand.vmem [shape: bf16[32,128], index: 3, kind: output, shape index: {}]  }
   0x1   :  { %v87_v0 = vld [vmem:[%s144_s0] sm:$0xff]   ;;  %v104_v4 = vld [vmem:[%s144_s0 + $0x8] sm:$0xff]  }
   0x2   :  { %v76_v1 = vld [vmem:[%s145_s1] ss:$0 sm:$0xff]  ;;  %v88_v2 = vunpack.c.l.bf16 %v87_v0  ;;  %v89_v3 = vunpack.c.h.bf16 %v87_v0  ;;  %v92_v6 = vunpack.c.l.bf16 %v104_v4  ;;  %v93_v7 = vunpack.c.h.bf16 %v104_v4 }
   0x3   :  { %v77_v5 = vld [vmem:[%s146_s2] ss:$0 sm:$0xff] }
   0x4   :  { %v29_v8 = vmul.f32 %v88_v2, %v76_v1  ;;  %v30_v9 = vmul.f32 %v89_v3, %v76_v1  ;;  %v31_v10 = vmul.f32 %v92_v6, %v76_v1  ;;  %v32_v11 = vmul.f32 %v93_v7, %v76_v1 }
   0x6   :  { %v40_v12 = vadd.f32 %v77_v5, %v29_v8  ;;  %v41_v13 = vadd.f32 %v77_v5, %v30_v9  ;;  %v42_v14 = vadd.f32 %v77_v5, %v31_v10  ;;  %v43_v15 = vadd.f32 %v77_v5, %v32_v11 }
   0x8   :  { %v44_v16 = vmul.f32 0.2, %v40_v12  ;;  %v45_v17 = vmul.f32 0.2, %v41_v13  ;;  %v46_v18 = vmul.f32 0.2, %v42_v14 }
   0x9   :  { %v47_v19 = vmul.f32 0.2, %v43_v15 }
   0xa   :  { %v48_v20 = vmax.f32 %v40_v12, %v44_v16  ;;  %v49_v21 = vmax.f32 %v41_v13, %v45_v17  ;;  %v50_v22 = vmax.f32 %v42_v14, %v46_v18 }
   0xb   :  { %v51_v23 = vmax.f32 %v43_v15, %v47_v19 }
   0xc   :  { %v97_v24 = vpack.c.bf16 %v49_v21, %v48_v20 }
   0xd   :  { %v102_v25 = vpack.c.bf16 %v51_v23, %v50_v22 }
   0xe   :  { %98 = vst [vmem:[%s147_s3] sm:$0xff] %v97_v24  }
   0xf   :  { %105 = vst [vmem:[%s147_s3 + $0x8] sm:$0xff] %v102_v25  }

// kernel: dc_discriminator_forward.13
= control target key start
LH: loop header
LB: loop body
LE: loop exit
PB: predicated region body
PF: predicated region fallthrough
CT: control target
= control target key end

     0   :  { %s779_s1 = inlined_call_operand.vmem [shape: bf16[512,128], index: 1, kind: input, shape index: {}]   ;;  %s780_s0 = inlined_call_operand.vmem [shape: bf16[32,512], index: 0, kind: input, shape index: {}]   ;;  %s781_s2 = inlined_call_operand.vmem [shape: bf16[32,128], index: 2, kind: output, shape index: {0}]   ;;  %s782_s3 = inlined_call_operand.vmem [shape: f32[1,8,128], index: 3, kind: output, shape index: {1}]  }
   0x1   :  { %v583_v0 = vld [vmem:[%s779_s1 + $0x40] sm:$0xff]   ;;  %v587_v4 = vld [vmem:[%s779_s1 + $0x48] sm:$0xff]   ;;  %v591_v8 = vld [vmem:[%s779_s1 + $0x50] sm:$0xff]  }
   0x2   :  { %v584_v1 = vld [vmem:[%s779_s1 + $0xc0] sm:$0xff]   ;;  %527 = vmatprep.subr.bf16.mxu0 %v583_v0  ;;  %v588_v5 = vld [vmem:[%s779_s1 + $0xc8] sm:$0xff]   ;;  %v592_v9 = vld [vmem:[%s779_s1 + $0xd0] sm:$0xff]  }
   0x3   :  { %v585_v2 = vld [vmem:[%s779_s1] sm:$0xff]   ;;  %555 = vmatprep.subr.bf16.mxu1 %v584_v1  ;;  %v589_v6 = vld [vmem:[%s779_s1 + $0x8] sm:$0xff]   ;;  %v593_v10 = vld [vmem:[%s779_s1 + $0x10] sm:$0xff]  }
   0x4   :  { %v586_v3 = vld [vmem:[%s779_s1 + $0x80] sm:$0xff]   ;;  %528 = vmatpush3.bf16.msra.mxu0 %v585_v2  ;;  %v590_v7 = vld [vmem:[%s779_s1 + $0x88] sm:$0xff]   ;;  %v594_v11 = vld [vmem:[%s779_s1 + $0x90] sm:$0xff]  }
   0x5   :  { %556 = vmatpush3.bf16.msra.mxu1 %v586_v3  ;;  %529 = vmatprep.subr.bf16.mxu0 %v587_v4  ;;  %v595_v12 = vld [vmem:[%s779_s1 + $0x58] sm:$0xff]   ;;  %v599_v16 = vld [vmem:[%s779_s1 + $0x60] sm:$0xff]   ;;  %v603_v20 = vld [vmem:[%s779_s1 + $0x68] sm:$0xff]  }
   0x6   :  { %557 = vmatprep.subr.bf16.mxu1 %v588_v5  ;;  %v596_v13 = vld [vmem:[%s779_s1 + $0xd8] sm:$0xff]   ;;  %v600_v17 = vld [vmem:[%s779_s1 + $0xe0] sm:$0xff]   ;;  %v604_v21 = vld [vmem:[%s779_s1 + $0xe8] sm:$0xff]  }
   0x7   :  { %v597_v14 = vld [vmem:[%s779_s1 + $0x18] sm:$0xff]   ;;  %v601_v18 = vld [vmem:[%s779_s1 + $0x20] sm:$0xff]   ;;  %v605_v22 = vld [vmem:[%s779_s1 + $0x28] sm:$0xff]  }
   0x8   :  { %530 = vmatpush3.bf16.msra.mxu0 %v589_v6  ;;  %v598_v15 = vld [vmem:[%s779_s1 + $0x98] sm:$0xff]   ;;  %v602_v19 = vld [vmem:[%s779_s1 + $0xa0] sm:$0xff]   ;;  %v606_v23 = vld [vmem:[%s779_s1 + $0xa8] sm:$0xff]  }
   0x9   :  { %558 = vmatpush3.bf16.msra.mxu1 %v590_v7  ;;  %531 = vmatprep.subr.bf16.mxu0 %v591_v8  ;;  %v607_v24 = vld [vmem:[%s779_s1 + $0x70] sm:$0xff]   ;;  %v611_v28 = vld [vmem:[%s779_s1 + $0x78] sm:$0xff]  }
   0xa   :  { %559 = vmatprep.subr.bf16.mxu1 %v592_v9  ;;  %v608_v25 = vld [vmem:[%s779_s1 + $0xf0] sm:$0xff]   ;;  %v612_v29 = vld [vmem:[%s779_s1 + $0xf8] sm:$0xff]  }
   0xb   :  { %v609_v26 = vld [vmem:[%s779_s1 + $0x30] sm:$0xff]   ;;  %v613_v30 = vld [vmem:[%s779_s1 + $0x38] sm:$0xff]  }
   0xc   :  { %532 = vmatpush3.bf16.msra.mxu0 %v593_v10  ;;  %v610_v27 = vld [vmem:[%s779_s1 + $0xb0] sm:$0xff]   ;;  %v614_v31 = vld [vmem:[%s779_s1 + $0xb8] sm:$0xff]  }
   0xd   :  { %560 = vmatpush3.bf16.msra.mxu1 %v594_v11  ;;  %533 = vmatprep.subr.bf16.mxu0 %v595_v12  ;;  %v615_v32 = vld [vmem:[%s780_s0] ss:$16 sps:$4 sm:$0xff]   ;;  %v617_v33 = vld [vmem:[%s780_s0 + $0x4] ss:$16 sps:$4 sm:$0xff]   ;;  %v618_v34 = vld [vmem:[%s780_s0 + $0x8] ss:$16 sps:$4 sm:$0xff]  }
   0xe   :  { %561 = vmatprep.subr.bf16.mxu1 %v596_v13  ;;  %v620_v35 = vld [vmem:[%s780_s0 + $0xc] ss:$16 sps:$4 sm:$0xff]   ;;  %350 = vmatprep.mubr.bf16.mxu0 %v617_v33  ;;  %v621_v36 = vld [vmem:[%s780_s0 + $0x24] ss:$16 sps:$4 sm:$0xff]   ;;  %v625_v38 = vld [vmem:[%s780_s0 + $0x20] ss:$16 sps:$4 sm:$0xff]  }
   0xf   :  { %399 = vmatprep.mubr.bf16.mxu1 %v620_v35  ;;  %v623_v37 = vld [vmem:[%s780_s0 + $0x2c] ss:$16 sps:$4 sm:$0xff]   ;;  %v626_v39 = vld [vmem:[%s780_s0 + $0x28] ss:$16 sps:$4 sm:$0xff]  }
  0x10   :  { %534 = vmatpush3.bf16.msra.mxu0 %v597_v14 }
  0x11   :  { %562 = vmatpush3.bf16.msra.mxu1 %v598_v15  ;;  %535 = vmatprep.subr.bf16.mxu0 %v599_v16 }
  0x12   :  { %563 = vmatprep.subr.bf16.mxu1 %v600_v17 }
  0x14   :  { %536 = vmatpush3.bf16.msra.mxu0 %v601_v18 }
  0x15   :  { %564 = vmatpush3.bf16.msra.mxu1 %v602_v19  ;;  %537 = vmatprep.subr.bf16.mxu0 %v603_v20 }
  0x16   :  { %565 = vmatprep.subr.bf16.mxu1 %v604_v21 }
  0x18   :  { %538 = vmatpush3.bf16.msra.mxu0 %v605_v22 }
  0x19   :  { %566 = vmatpush3.bf16.msra.mxu1 %v606_v23  ;;  %539 = vmatprep.subr.bf16.mxu0 %v607_v24 }
  0x1a   :  { %567 = vmatprep.subr.bf16.mxu1 %v608_v25 }
  0x1c   :  { %540 = vmatpush3.bf16.msra.mxu0 %v609_v26 }
  0x1d   :  { %568 = vmatpush3.bf16.msra.mxu1 %v610_v27  ;;  %541 = vmatprep.subr.bf16.mxu0 %v611_v28 }
  0x1e   :  { %569 = vmatprep.subr.bf16.mxu1 %v612_v29 }
  0x20   :  { %542 = vmatpush3.bf16.msra.mxu0 %v613_v30 }
  0x21   :  { %570 = vmatpush3.bf16.msra.mxu1 %v614_v31 }
  0x23   :  { %351 = vmatmul.mubr.bf16.vlgmr.msra.gmra.mrb[0].mxu0 %v615_v32 }
  0x24   :  { %400 = vmatmul.mubr.bf16.vlgmr.msra.gmra.mrb[0].mxu1 %v618_v34  ;;  %358 = vmatprep.mubr.bf16.mxu0 %v621_v36 }
  0x25   :  { %407 = vmatprep.mubr.bf16.mxu1 %v623_v37 }
  0x2b   :  { %359 = vmatmul.mubr.bf16.gmra.mrb[4].mxu0 %v625_v38 }
  0x2c   :  { %408 = vmatmul.mubr.bf16.gmra.mrb[4].mxu1 %v626_v39 }
  0xf6   :  { %v543_v40 = vpop.f32.mrb[0].mxu0 }
  0xf7   :  { %v571_v41 = vpop.f32.mrb[0].mxu1  ;;  %v544_v42 = vpop.f32.mrb[1].mxu0 }
  0xf8   :  { %v545_v43 = vadd.f32 %v544_v42, %v543_v40  ;;  %v572_v44 = vpop.f32.mrb[1].mxu1  ;;  %v546_v45 = vpop.f32.mrb[2].mxu0 }
  0xf9   :  { %v573_v46 = vadd.f32 %v572_v44, %v571_v41  ;;  %v574_v47 = vpop.f32.mrb[2].mxu1  ;;  %v547_v48 = vpop.f32.mrb[3].mxu0 }
  0xfa   :  { %v548_v49 = vadd.f32 %v547_v48, %v546_v45  ;;  %v575_v50 = vpop.f32.mrb[3].mxu1 }
  0xfb   :  { %v402_v51 = vadd.f32 %v573_v46, %v545_v43  ;;  %v576_v52 = vadd.f32 %v575_v50, %v574_v47 }
  0xfd   :  { %v405_v53 = vadd.f32 %v576_v52, %v548_v49  ;;  %v446_v55 = vmul.f32 %v402_v51, %v402_v51 }
  0xfe   :  { %v549_v54 = vpop.f32.mrb[4].mxu0 }
  0xff   :  { %v519_v56 = vpack.c.bf16 %v405_v53, %v402_v51  ;;  %v436_v57 = vadd.f32 %v405_v53, %v402_v51  ;;  %v447_v58 = vmul.f32 %v405_v53, %v405_v53  ;;  %v577_v59 = vpop.f32.mrb[4].mxu1  ;;  %v550_v60 = vpop.f32.mrb[5].mxu0 }
 0x100   :  { %v551_v61 = vadd.f32 %v550_v60, %v549_v54  ;;  %v578_v62 = vpop.f32.mrb[5].mxu1  ;;  %v552_v63 = vpop.f32.mrb[6].mxu0 }
 0x101   :  { %520 = vst [vmem:[%s781_s2] sm:$0xff] %v519_v56   ;;  %v450_v0 = vadd.f32 %v447_v58, %v446_v55  ;;  %v579_v1 = vadd.f32 %v578_v62, %v577_v59  ;;  %v580_v2 = vpop.f32.mrb[6].mxu1  ;;  %v553_v3 = vpop.f32.mrb[7].mxu0 }
 0x102   :  { %v554_v4 = vadd.f32 %v553_v3, %v552_v63  ;;  %v581_v5 = vpop.f32.mrb[7].mxu1 }
 0x103   :  { %v410_v6 = vadd.f32 %v579_v1, %v551_v61  ;;  %v582_v7 = vadd.f32 %v581_v5, %v580_v2 }
 0x105   :  { %v437_v8 = vadd.f32 %v436_v57, %v410_v6  ;;  %v448_v9 = vmul.f32 %v410_v6, %v410_v6  ;;  %v413_v10 = vadd.f32 %v582_v7, %v554_v4 }
 0x107   :  { %v451_v11 = vadd.f32 %v450_v0, %v448_v9  ;;  %v524_v12 = vpack.c.bf16 %v413_v10, %v410_v6  ;;  %v438_v13 = vadd.f32 %v437_v8, %v413_v10  ;;  %v449_v14 = vmul.f32 %v413_v10, %v413_v10 }
 0x109   :  { %526 = vst [vmem:[%s781_s2 + $0x8] sm:$0xff] %v524_v12   ;;  %v439_v15 = vrot.slane %v438_v13, 4  ;;  %v452_v16 = vadd.f32 %v451_v11, %v449_v14 }
 0x10b   :  { %v440_v17 = vadd.f32 %v439_v15, %v438_v13  ;;  %v453_v18 = vrot.slane %v452_v16, 4 }
 0x10d   :  { %v441_v19 = vrot.slane %v440_v17, 2  ;;  %v454_v20 = vadd.f32 %v453_v18, %v452_v16 }
 0x10f   :  { %v442_v21 = vadd.f32 %v441_v19, %v440_v17  ;;  %v455_v22 = vrot.slane %v454_v20, 2 }
 0x111   :  { %v443_v23 = vrot.slane %v442_v21, 1  ;;  %v456_v24 = vadd.f32 %v455_v22, %v454_v20 }
 0x113   :  { %v444_v25 = vadd.f32 %v443_v23, %v442_v21  ;;  %v457_v26 = vrot.slane %v456_v24, 1 }
 0x115   :  { %445 = vst [vmem:[%s782_s3] sm:$0x1] %v444_v25  ;;  %v458_v27 = vadd.f32 %v457_v26, %v456_v24 }
 0x117   :  { %459 = vst [vmem:[%s782_s3 + $0x1] sm:$0x1] %v458_v27 }

// kernel: dc_discriminator_forward.15
= control target key start
LH: loop header
LB: loop body
LE: loop exit
PB: predicated region body
PF: predicated region fallthrough
CT: control target
= control target key end

     0   :  { %s1186_s1 = inlined_call_operand.vmem [shape: bf16[1024,128], index: 1, kind: input, shape index: {}]   ;;  %s1187_s0 = inlined_call_operand.vmem [shape: bf16[8,1024], index: 0, kind: input, shape index: {}]   ;;  %s1188_s2 = inlined_call_operand.vmem [shape: f32[8,128], index: 2, kind: output, shape index: {}]  }
   0x1   :  { %v888_v0 = vld [vmem:[%s1186_s1 + $0x40] sm:$0xff]   ;;  %v892_v4 = vld [vmem:[%s1186_s1 + $0x48] sm:$0xff]   ;;  %v896_v8 = vld [vmem:[%s1186_s1 + $0x50] sm:$0xff]  }
   0x2   :  { %v889_v1 = vld [vmem:[%s1186_s1 + $0xc0] sm:$0xff]   ;;  %800 = vmatprep.subr.bf16.mxu0 %v888_v0  ;;  %v893_v5 = vld [vmem:[%s1186_s1 + $0xc8] sm:$0xff]   ;;  %v897_v9 = vld [vmem:[%s1186_s1 + $0xd0] sm:$0xff]  }
   0x3   :  { %v890_v2 = vld [vmem:[%s1186_s1] sm:$0xff]   ;;  %822 = vmatprep.subr.bf16.mxu1 %v889_v1  ;;  %v894_v6 = vld [vmem:[%s1186_s1 + $0x8] sm:$0xff]   ;;  %v898_v10 = vld [vmem:[%s1186_s1 + $0x10] sm:$0xff]  }
   0x4   :  { %v891_v3 = vld [vmem:[%s1186_s1 + $0x80] sm:$0xff]   ;;  %801 = vmatpush3.bf16.msra.mxu0 %v890_v2  ;;  %v895_v7 = vld [vmem:[%s1186_s1 + $0x88] sm:$0xff]   ;;  %v899_v11 = vld [vmem:[%s1186_s1 + $0x90] sm:$0xff]  }
   0x5   :  { %823 = vmatpush3.bf16.msra.mxu1 %v891_v3  ;;  %802 = vmatprep.subr.bf16.mxu0 %v892_v4  ;;  %v900_v12 = vld [vmem:[%s1186_s1 + $0x58] sm:$0xff]   ;;  %v904_v16 = vld [vmem:[%s1186_s1 + $0x60] sm:$0xff]   ;;  %v908_v20 = vld [vmem:[%s1186_s1 + $0x68] sm:$0xff]  }
   0x6   :  { %824 = vmatprep.subr.bf16.mxu1 %v893_v5  ;;  %v901_v13 = vld [vmem:[%s1186_s1 + $0xd8] sm:$0xff]   ;;  %v905_v17 = vld [vmem:[%s1186_s1 + $0xe0] sm:$0xff]   ;;  %v909_v21 = vld [vmem:[%s1186_s1 + $0xe8] sm:$0xff]  }
   0x7   :  { %v902_v14 = vld [vmem:[%s1186_s1 + $0x18] sm:$0xff]   ;;  %v906_v18 = vld [vmem:[%s1186_s1 + $0x20] sm:$0xff]   ;;  %v910_v22 = vld [vmem:[%s1186_s1 + $0x28] sm:$0xff]  }
   0x8   :  { %803 = vmatpush3.bf16.msra.mxu0 %v894_v6  ;;  %v903_v15 = vld [vmem:[%s1186_s1 + $0x98] sm:$0xff]   ;;  %v907_v19 = vld [vmem:[%s1186_s1 + $0xa0] sm:$0xff]   ;;  %v911_v23 = vld [vmem:[%s1186_s1 + $0xa8] sm:$0xff]  }
   0x9   :  { %825 = vmatpush3.bf16.msra.mxu1 %v895_v7  ;;  %804 = vmatprep.subr.bf16.mxu0 %v896_v8  ;;  %v912_v24 = vld [vmem:[%s1186_s1 + $0x70] sm:$0xff]   ;;  %v916_v28 = vld [vmem:[%s1186_s1 + $0x78] sm:$0xff]   ;;  %v12_v32 = vld [vmem:[%s1187_s0] sm:$0xff] }
   0xa   :  { %826 = vmatprep.subr.bf16.mxu1 %v897_v9  ;;  %v913_v25 = vld [vmem:[%s1186_s1 + $0xf0] sm:$0xff]   ;;  %v917_v29 = vld [vmem:[%s1186_s1 + $0xf8] sm:$0xff]   ;;  %v13_v33 = vld [vmem:[%s1187_s0 + $0x8] sm:$0xff]  ;;  %v727_v34 = vcombine.low %v12_v32, %v12_v32  ;;  %v728_v35 = vcombine.high %v12_v32, %v12_v32 }
   0xb   :  { %v914_v26 = vld [vmem:[%s1186_s1 + $0x30] sm:$0xff]   ;;  %v918_v30 = vld [vmem:[%s1186_s1 + $0x38] sm:$0xff]   ;;  %v729_v36 = vcombine.low %v13_v33, %v13_v33  ;;  %v730_v37 = vcombine.high %v13_v33, %v13_v33  ;;  %v924_v38 = vld [vmem:[%s1186_s1 + $0x140] sm:$0xff]  }
   0xc   :  { %805 = vmatpush3.bf16.msra.mxu0 %v898_v10  ;;  %v915_v27 = vld [vmem:[%s1186_s1 + $0xb0] sm:$0xff]   ;;  %v919_v31 = vld [vmem:[%s1186_s1 + $0xb8] sm:$0xff]   ;;  %v925_v39 = vld [vmem:[%s1186_s1 + $0x1c0] sm:$0xff]   ;;  %588 = vmatprep.mubr.bf16.mxu0 %v728_v35 }
   0xd   :  { %827 = vmatpush3.bf16.msra.mxu1 %v899_v11  ;;  %806 = vmatprep.subr.bf16.mxu0 %v900_v12  ;;  %v926_v40 = vld [vmem:[%s1186_s1 + $0x100] sm:$0xff]   ;;  %v928_v42 = vld [vmem:[%s1186_s1 + $0x148] sm:$0xff]   ;;  %v932_v46 = vld [vmem:[%s1186_s1 + $0x150] sm:$0xff]  }
   0xe   :  { %828 = vmatprep.subr.bf16.mxu1 %v901_v13  ;;  %628 = vmatprep.mubr.bf16.mxu1 %v730_v37  ;;  %v927_v41 = vld [vmem:[%s1186_s1 + $0x180] sm:$0xff]   ;;  %v929_v43 = vld [vmem:[%s1186_s1 + $0x1c8] sm:$0xff]   ;;  %v933_v47 = vld [vmem:[%s1186_s1 + $0x1d0] sm:$0xff]  }
   0xf   :  { %v930_v44 = vld [vmem:[%s1186_s1 + $0x108] sm:$0xff]   ;;  %v934_v48 = vld [vmem:[%s1186_s1 + $0x110] sm:$0xff]   ;;  %v936_v50 = vld [vmem:[%s1186_s1 + $0x158] sm:$0xff]  }
  0x10   :  { %807 = vmatpush3.bf16.msra.mxu0 %v902_v14  ;;  %v931_v45 = vld [vmem:[%s1186_s1 + $0x188] sm:$0xff]   ;;  %v935_v49 = vld [vmem:[%s1186_s1 + $0x190] sm:$0xff]   ;;  %v937_v51 = vld [vmem:[%s1186_s1 + $0x1d8] sm:$0xff]  }
  0x11   :  { %829 = vmatpush3.bf16.msra.mxu1 %v903_v15  ;;  %808 = vmatprep.subr.bf16.mxu0 %v904_v16  ;;  %v938_v52 = vld [vmem:[%s1186_s1 + $0x118] sm:$0xff]   ;;  %v940_v54 = vld [vmem:[%s1186_s1 + $0x160] sm:$0xff]   ;;  %v944_v58 = vld [vmem:[%s1186_s1 + $0x168] sm:$0xff]  }
  0x12   :  { %830 = vmatprep.subr.bf16.mxu1 %v905_v17  ;;  %v939_v53 = vld [vmem:[%s1186_s1 + $0x198] sm:$0xff]   ;;  %v941_v55 = vld [vmem:[%s1186_s1 + $0x1e0] sm:$0xff]   ;;  %v945_v59 = vld [vmem:[%s1186_s1 + $0x1e8] sm:$0xff]  }
  0x13   :  { %v942_v56 = vld [vmem:[%s1186_s1 + $0x120] sm:$0xff]   ;;  %v946_v60 = vld [vmem:[%s1186_s1 + $0x128] sm:$0xff]   ;;  %v948_v62 = vld [vmem:[%s1186_s1 + $0x170] sm:$0xff]  }
  0x14   :  { %809 = vmatpush3.bf16.msra.mxu0 %v906_v18  ;;  %v943_v57 = vld [vmem:[%s1186_s1 + $0x1a0] sm:$0xff]   ;;  %v947_v61 = vld [vmem:[%s1186_s1 + $0x1a8] sm:$0xff]   ;;  %v949_v63 = vld [vmem:[%s1186_s1 + $0x1f0] sm:$0xff]  }
  0x15   :  { %831 = vmatpush3.bf16.msra.mxu1 %v907_v19  ;;  %810 = vmatprep.subr.bf16.mxu0 %v908_v20  ;;  %v950_v0 = vld [vmem:[%s1186_s1 + $0x130] sm:$0xff]   ;;  %v952_v2 = vld [vmem:[%s1186_s1 + $0x178] sm:$0xff]  }
  0x16   :  { %832 = vmatprep.subr.bf16.mxu1 %v909_v21  ;;  %v951_v1 = vld [vmem:[%s1186_s1 + $0x1b0] sm:$0xff]   ;;  %v953_v3 = vld [vmem:[%s1186_s1 + $0x1f8] sm:$0xff]  }
  0x17   :  { %v954_v4 = vld [vmem:[%s1186_s1 + $0x138] sm:$0xff]   ;;  %v14_v6 = vld [vmem:[%s1187_s0 + $0x10] sm:$0xff] }
  0x18   :  { %811 = vmatpush3.bf16.msra.mxu0 %v910_v22  ;;  %v955_v5 = vld [vmem:[%s1186_s1 + $0x1b8] sm:$0xff]   ;;  %v731_v7 = vcombine.low %v14_v6, %v14_v6  ;;  %v732_v8 = vcombine.high %v14_v6, %v14_v6 }
  0x19   :  { %833 = vmatpush3.bf16.msra.mxu1 %v911_v23  ;;  %812 = vmatprep.subr.bf16.mxu0 %v912_v24  ;;  %v15_v9 = vld [vmem:[%s1187_s0 + $0x18] sm:$0xff] }
  0x1a   :  { %834 = vmatprep.subr.bf16.mxu1 %v913_v25  ;;  %v733_v10 = vcombine.low %v15_v9, %v15_v9  ;;  %v734_v11 = vcombine.high %v15_v9, %v15_v9 }
  0x1c   :  { %813 = vmatpush3.bf16.msra.mxu0 %v914_v26 }
  0x1d   :  { %835 = vmatpush3.bf16.msra.mxu1 %v915_v27  ;;  %814 = vmatprep.subr.bf16.mxu0 %v916_v28 }
  0x1e   :  { %836 = vmatprep.subr.bf16.mxu1 %v917_v29 }
  0x20   :  { %815 = vmatpush3.bf16.msra.mxu0 %v918_v30 }
  0x21   :  { %837 = vmatpush3.bf16.msra.mxu1 %v919_v31  ;;  %844 = vmatprep.subr.bf16.mxu0 %v924_v38 }
  0x22   :  { %866 = vmatprep.subr.bf16.mxu1 %v925_v39 }
  0x23   :  { %589 = vmatmul.mubr.bf16.vlgmr.msra.gmra.mrb[0].mxu0 %v727_v34 }
  0x24   :  { %629 = vmatmul.mubr.bf16.vlgmr.msra.gmra.mrb[0].mxu1 %v729_v36  ;;  %845 = vmatpush3.bf16.msra.mxu0 %v926_v40 }
  0x25   :  { %867 = vmatpush3.bf16.msra.mxu1 %v927_v41  ;;  %846 = vmatprep.subr.bf16.mxu0 %v928_v42 }
  0x26   :  { %868 = vmatprep.subr.bf16.mxu1 %v929_v43  ;;  %668 = vmatprep.mubr.bf16.mxu0 %v732_v8 }
  0x27   :  { %708 = vmatprep.mubr.bf16.mxu1 %v734_v11 }
  0x28   :  { %847 = vmatpush3.bf16.msra.mxu0 %v930_v44 }
  0x29   :  { %869 = vmatpush3.bf16.msra.mxu1 %v931_v45  ;;  %848 = vmatprep.subr.bf16.mxu0 %v932_v46 }
  0x2a   :  { %870 = vmatprep.subr.bf16.mxu1 %v933_v47 }
  0x2c   :  { %849 = vmatpush3.bf16.msra.mxu0 %v934_v48 }
  0x2d   :  { %871 = vmatpush3.bf16.msra.mxu1 %v935_v49  ;;  %850 = vmatprep.subr.bf16.mxu0 %v936_v50 }
  0x2e   :  { %872 = vmatprep.subr.bf16.mxu1 %v937_v51 }
  0x30   :  { %851 = vmatpush3.bf16.msra.mxu0 %v938_v52 }
  0x31   :  { %873 = vmatpush3.bf16.msra.mxu1 %v939_v53  ;;  %852 = vmatprep.subr.bf16.mxu0 %v940_v54 }
  0x32   :  { %874 = vmatprep.subr.bf16.mxu1 %v941_v55 }
  0x34   :  { %853 = vmatpush3.bf16.msra.mxu0 %v942_v56 }
  0x35   :  { %875 = vmatpush3.bf16.msra.mxu1 %v943_v57  ;;  %854 = vmatprep.subr.bf16.mxu0 %v944_v58 }
  0x36   :  { %876 = vmatprep.subr.bf16.mxu1 %v945_v59 }
  0x38   :  { %855 = vmatpush3.bf16.msra.mxu0 %v946_v60 }
  0x39   :  { %877 = vmatpush3.bf16.msra.mxu1 %v947_v61  ;;  %856 = vmatprep.subr.bf16.mxu0 %v948_v62 }
  0x3a   :  { %878 = vmatprep.subr.bf16.mxu1 %v949_v63 }
  0x3c   :  { %857 = vmatpush3.bf16.msra.mxu0 %v950_v0 }
  0x3d   :  { %879 = vmatpush3.bf16.msra.mxu1 %v951_v1  ;;  %858 = vmatprep.subr.bf16.mxu0 %v952_v2 }
  0x3e   :  { %880 = vmatprep.subr.bf16.mxu1 %v953_v3 }
  0x40   :  { %859 = vmatpush3.bf16.msra.mxu0 %v954_v4 }
  0x41   :  { %881 = vmatpush3.bf16.msra.mxu1 %v955_v5 }
  0x43   :  { %669 = vmatmul.mubr.bf16.vlgmr.msra.gmra.mrb[4].mxu0 %v731_v7 }
  0x44   :  { %709 = vmatmul.mubr.bf16.vlgmr.msra.gmra.mrb[4].mxu1 %v733_v10 }
  0xf6   :  { %v816_v12 = vpop.f32.mrb[0].mxu0 }
  0xf7   :  { %v838_v13 = vpop.f32.mrb[0].mxu1  ;;  %v817_v14 = vpop.f32.mrb[1].mxu0 }
  0xf8   :  { %v839_v15 = vpop.f32.mrb[1].mxu1  ;;  %v818_v16 = vadd.f32 %v817_v14, %v816_v12  ;;  %v819_v18 = vpop.f32.mrb[2].mxu0 }
  0xf9   :  { %v840_v17 = vadd.f32 %v839_v15, %v838_v13  ;;  %v841_v19 = vpop.f32.mrb[2].mxu1  ;;  %v820_v20 = vpop.f32.mrb[3].mxu0 }
  0xfa   :  { %v842_v21 = vpop.f32.mrb[3].mxu1 }
  0xfb   :  { %v631_v22 = vadd.f32 %v840_v17, %v818_v16 }
 0x116   :  { %v860_v23 = vpop.f32.mrb[4].mxu0 }
 0x117   :  { %v882_v24 = vpop.f32.mrb[4].mxu1  ;;  %v861_v25 = vpop.f32.mrb[5].mxu0 }
 0x118   :  { %v883_v26 = vpop.f32.mrb[5].mxu1  ;;  %v862_v27 = vadd.f32 %v861_v25, %v860_v23  ;;  %v863_v29 = vpop.f32.mrb[6].mxu0 }
 0x119   :  { %v884_v28 = vadd.f32 %v883_v26, %v882_v24  ;;  %v885_v30 = vpop.f32.mrb[6].mxu1  ;;  %v864_v31 = vpop.f32.mrb[7].mxu0 }
 0x11a   :  { %v886_v32 = vpop.f32.mrb[7].mxu1  ;;  %v671_v33 = vadd.f32 %v862_v27, %v631_v22 }
 0x11c   :  { %v711_v34 = vadd.f32 %v884_v28, %v671_v33 }
 0x11e   :  { %v799_v35 = vmul.f32 -1.442695, %v711_v34 }
 0x120   :  { %960 = vpow2.f32 %v799_v35 }
 0x12a   :  { %v961_v36 = vpop.eup %960 }
 0x12b   :  { %v719_v37 = vadd.f32 1.0, %v961_v36 }
 0x12d   :  { %962 = vrcp.f32 %v719_v37 }
 0x137   :  { %v963_v38 = vpop.eup %962 }
 0x138   :  { %722 = vst [vmem:[%s1188_s2] sm:$0xff] %v963_v38 }

</bundles_post_ra>
